<compile_context>
chip_gen: v5e
topology: v5e:2x2
jax: 0.10.0
libtpu: 0.0.40
codegen_flags: <defaults>
</compile_context>

<pallas_src>
import functools

import jax
import jax.numpy as jnp
from jax.experimental import pallas as pl
from jax.experimental.pallas import tpu as pltpu

EPS = 1e-5
LANE = 128                       # pad channel (lane) dims to a multiple of this
TM_MAX = 512                     # largest row tile
VMEM_LIMIT = 32 * 1024 * 1024    # explicit scoped-VMEM budget (fits all gens)


# ----------------------------------------------------------------------------
# small static helpers
# ----------------------------------------------------------------------------
def _round_up(x, m):
    return (x + m - 1) // m * m


def _pick_tm(m, tm_max=TM_MAX):
    """Row tile: as large as possible, but keep >= 2 grid steps when we can
    (v7x has 2 TensorCores) and stay sublane (8) aligned."""
    if m >= 2 * tm_max:
        return tm_max
    return max(8, min(tm_max, _round_up(-(-m // 2), 8)))


def fold_bn(gamma, beta, mean, var, eps=EPS):
    scale = gamma / jnp.sqrt(var + eps)
    bias = beta - mean * scale
    return scale, bias


def _w_1x1(w_oihw, scale, k_pad, n_pad):
    """(Cout, Cin, 1, 1) -> (k_pad, n_pad) bf16 with the BN scale folded in."""
    cout, cin = w_oihw.shape[:2]
    w = jnp.transpose(w_oihw[:, :, 0, 0], (1, 0)) * scale[None, :]
    w = jnp.pad(w, ((0, k_pad - cin), (0, n_pad - cout)))
    return w.astype(jnp.bfloat16)


def _w_3x3(w_oihw, scale, k_pad, n_pad):
    """(Cout, Cin, 3, 3) -> (9, k_pad, n_pad) bf16, tap index t = kh*3 + kw."""
    cout, cin = w_oihw.shape[:2]
    w = jnp.transpose(w_oihw, (2, 3, 1, 0)).reshape(9, cin, cout)
    w = w * scale[None, None, :]
    w = jnp.pad(w, ((0, 0), (0, k_pad - cin), (0, n_pad - cout)))
    return w.astype(jnp.bfloat16)


def _bias(b, n_pad):
    return jnp.pad(b, (0, n_pad - b.shape[0])).reshape(1, n_pad).astype(jnp.float32)


def avg_pool_nhwc(x, s):
    """nn.AvgPool2d(s): kernel=s, stride=s, no padding (H, W divisible by s).
    Kept as cheap XLA glue (reshape + mean)."""
    if s == 1:
        return x
    n, h, w, c = x.shape
    return x.reshape(n, h // s, s, w // s, s, c).mean(axis=(2, 4))


# ----------------------------------------------------------------------------
# Pallas kernel 1: fused  out = [relu]( X @ W + bias [+ residual] )
# (1x1 convs; BN scale already folded into W, bias is the folded BN bias)
# ----------------------------------------------------------------------------
def _make_mm_kernel(relu, has_residual):
    if has_residual:
        def kernel(x_ref, w_ref, b_ref, r_ref, o_ref):
            acc = jnp.dot(x_ref[...], w_ref[...],
                          preferred_element_type=jnp.float32)
            acc = acc + b_ref[...] + r_ref[...]
            if relu:
                acc = jnp.maximum(acc, 0.0)
            o_ref[...] = acc.astype(o_ref.dtype)
    else:
        def kernel(x_ref, w_ref, b_ref, o_ref):
            acc = jnp.dot(x_ref[...], w_ref[...],
                          preferred_element_type=jnp.float32)
            acc = acc + b_ref[...]
            if relu:
                acc = jnp.maximum(acc, 0.0)
            o_ref[...] = acc.astype(o_ref.dtype)
    return kernel


def matmul_bias_act(x2d, w, bias, residual=None, relu=True,
                    out_dtype=jnp.float32):
    """Row-tiled fused matmul.

    x2d : (M, K)  bf16   (K padded to a lane multiple by the caller)
    w   : (K, N)  bf16   (BN scale folded into the columns)
    bias: (1, N)  f32
    """
    M, K = x2d.shape
    _, n_out = w.shape
    tm = _pick_tm(M)
    mp = _round_up(M, tm)
    if mp != M:                       # pad rows up to a tile multiple (no giant
        x2d = jnp.pad(x2d, ((0, mp - M), (0, 0)))      # single-block fallback)
        if residual is not None:
            residual = jnp.pad(residual, ((0, mp - M), (0, 0)))

    in_specs = [
        pl.BlockSpec((tm, K), lambda i: (i, 0)),
        # weights / bias: constant index_map -> fetched once, kept resident
        pl.BlockSpec((K, n_out), lambda i: (0, 0)),
        pl.BlockSpec((1, n_out), lambda i: (0, 0)),
    ]
    args = [x2d, w, bias]
    if residual is not None:
        in_specs.append(pl.BlockSpec((tm, n_out), lambda i: (i, 0)))
        args.append(residual)

    out = pl.pallas_call(
        _make_mm_kernel(relu, residual is not None),
        out_shape=jax.ShapeDtypeStruct((mp, n_out), out_dtype),
        grid=(mp // tm,),
        in_specs=in_specs,
        out_specs=pl.BlockSpec((tm, n_out), lambda i: (i, 0)),
        compiler_params=pltpu.CompilerParams(
            dimension_semantics=("parallel",),
            vmem_limit_bytes=VMEM_LIMIT),
    )(*args)
    return out[:M] if mp != M else out


# ----------------------------------------------------------------------------
# Pallas kernel 2: 3x3 conv (pad=1, stride=1) + folded-BN bias + ReLU
# 9 accumulated MXU matmuls per row tile -- no im2col tensor in HBM.
# ----------------------------------------------------------------------------
def conv3x3_bn_relu(h_nhwc, w9, bias):
    """h_nhwc: (N, H, W, Cp) bf16; w9: (9, Cp, Np) bf16; bias: (1, Np) f32."""
    N, H, W, Cp = h_nhwc.shape
    _, _, Np = w9.shape
    mhw = H * W
    tm = _pick_tm(mhw)
    mhw_p = _round_up(mhw, tm)
    nb = mhw_p // tm

    # Per-batch slab: 2 zero H-rows on top and enough zero rows at the bottom
    # so every tap window [i*tm + off, +tm) with off in [W-1, 3W+1] stays in
    # bounds.  Output row r = y*W + x of tap (dy, dx) reads slab row
    # r + (dy+1)*W + (dx-1); zero H-padding covers the top/bottom taps.
    rows_needed = mhw_p + 4 * W + 8
    total_h = max(H + 4, -(-rows_needed // W))
    xp = jnp.pad(h_nhwc, ((0, 0), (2, total_h - H - 2), (0, 0), (0, 0)))
    R = total_h * W
    xp = xp.reshape(N, R, Cp)

    win = _round_up(tm + 3 * W + 2, 8)   # rows loaded per tile (aligned start)

    def kernel(x_ref, w_ref, b_ref, o_ref):
        base = pl.multiple_of(pl.program_id(1) * tm, 8)
        xwin = x_ref[0, pl.ds(base, win), :]                 # (win, Cp) bf16

        # columns that wrap across a W boundary must be zeroed for the
        # left (dx==0) / right (dx==2) taps
        col = (jax.lax.broadcasted_iota(jnp.int32, (tm, 1), 0) + base) % W
        left_ok = col != 0
        right_ok = col != (W - 1)

        acc = jnp.zeros((tm, Np), jnp.float32)
        for t in range(9):                                   # statically unrolled taps
            dy, dx = divmod(t, 3)
            off = (dy + 1) * W + (dx - 1)                    # static row offset
            xb = xwin[off:off + tm, :]
            if dx == 0:
                xb = jnp.where(left_ok, xb, jnp.zeros_like(xb))
            elif dx == 2:
                xb = jnp.where(right_ok, xb, jnp.zeros_like(xb))
            acc = acc + jnp.dot(xb, w_ref[t],
                                preferred_element_type=jnp.float32)

        o_ref[0] = jnp.maximum(acc + b_ref[...], 0.0).astype(o_ref.dtype)

    out = pl.pallas_call(
        kernel,
        out_shape=jax.ShapeDtypeStruct((N, mhw_p, Np), jnp.bfloat16),
        grid=(N, nb),
        in_specs=[
            # whole per-batch slab resident in VMEM (index changes only with n)
            pl.BlockSpec((1, R, Cp), lambda n, i: (n, 0, 0)),
            # all 9 taps' (scale-folded) weights resident (constant index_map)
            pl.BlockSpec((9, Cp, Np), lambda n, i: (0, 0, 0)),
            pl.BlockSpec((1, Np), lambda n, i: (0, 0)),
        ],
        out_specs=pl.BlockSpec((1, tm, Np), lambda n, i: (n, i, 0)),
        compiler_params=pltpu.CompilerParams(
            dimension_semantics=("parallel", "parallel"),
            vmem_limit_bytes=VMEM_LIMIT),
    )(xp, w9, bias)

    return out[:, :mhw, :].reshape(N, H, W, Np)


# ----------------------------------------------------------------------------
# Bottleneck forward
# ----------------------------------------------------------------------------
def bottleneck_forward(x_nchw, P, stride):
    N, Cin, H, W = x_nchw.shape
    planes = P["w1"].shape[0]
    expansion = 4
    cout = planes * expansion

    cin_p = _round_up(Cin, LANE)
    p_p = _round_up(planes, LANE)
    e_p = _round_up(cout, LANE)

    # NHWC, channel-padded; keep an f32 copy for the identity path
    x = jnp.transpose(x_nchw, (0, 2, 3, 1)).astype(jnp.float32)
    x = jnp.pad(x, ((0, 0), (0, 0), (0, 0), (0, cin_p - Cin)))
    x_bf = x.astype(jnp.bfloat16)

    s1, b1 = fold_bn(P["bn1_g"], P["bn1_b"], P["bn1_m"], P["bn1_v"])
    s2, b2 = fold_bn(P["bn2_g"], P["bn2_b"], P["bn2_m"], P["bn2_v"])
    s3, b3 = fold_bn(P["bn3_g"], P["bn3_b"], P["bn3_m"], P["bn3_v"])

    # conv1 (1x1) + bn1 + relu1
    h = matmul_bias_act(x_bf.reshape(-1, cin_p),
                        _w_1x1(P["w1"], s1, cin_p, p_p), _bias(b1, p_p),
                        relu=True, out_dtype=jnp.bfloat16)
    h = h.reshape(N, H, W, p_p)

    # conv2 (3x3, pad=1) + bn2 + relu2 -- 9-tap in-kernel accumulation
    h = conv3x3_bn_relu(h, _w_3x3(P["w2"], s2, p_p, p_p), _bias(b2, p_p))

    # avgpool (identity if stride == 1); cheap XLA glue.  Fusing the pool into
    # the conv2 store epilogue would save one more HBM round trip of `h`.
    h = avg_pool_nhwc(h, stride)
    ho, wo = h.shape[1], h.shape[2]

    # downsample branch: AvgPool2d(stride) -> 1x1 conv -> bn
    if stride > 1 or Cin != cout:
        sd, bd = fold_bn(P["bnd_g"], P["bnd_b"], P["bnd_m"], P["bnd_v"])
        xd = avg_pool_nhwc(x, stride).astype(jnp.bfloat16).reshape(-1, cin_p)
        identity = matmul_bias_act(xd, _w_1x1(P["wd"], sd, cin_p, e_p),
                                   _bias(bd, e_p), relu=False,
                                   out_dtype=jnp.float32)
    else:
        identity = x.reshape(-1, cin_p)            # cin_p == e_p in this branch

    # conv3 (1x1) + bn3 + residual add + relu3, fused in one kernel
    out = matmul_bias_act(h.reshape(-1, p_p),
                          _w_1x1(P["w3"], s3, p_p, e_p), _bias(b3, e_p),
                          residual=identity, relu=True,
                          out_dtype=jnp.float32)
    out = out[:, :cout].reshape(N, ho, wo, cout)
    return jnp.transpose(out, (0, 3, 1, 2))        # back to NCHW


# ----------------------------------------------------------------------------
# Pure-JAX f32 reference (lax.conv) for a correctness cross-check
# ----------------------------------------------------------------------------
def reference_forward(x, P, stride):
    def conv(x, w, pad):
        return jax.lax.conv_general_dilated(
            x, w, (1, 1), [(pad, pad), (pad, pad)],
            dimension_numbers=("NCHW", "OIHW", "NCHW"))

    def bn(x, g, b, m, v):
        def e(a):
            return a[None, :, None, None]
        return (x - e(m)) / jnp.sqrt(e(v) + EPS) * e(g) + e(b)

    def pool(x, s):
        if s == 1:
            return x
        n, c, h, w = x.shape
        return x.reshape(n, c, h // s, s, w // s, s).mean(axis=(3, 5))

    out = jax.nn.relu(bn(conv(x, P["w1"], 0), P["bn1_g"], P["bn1_b"],
                         P["bn1_m"], P["bn1_v"]))
    out = jax.nn.relu(bn(conv(out, P["w2"], 1), P["bn2_g"], P["bn2_b"],
                         P["bn2_m"], P["bn2_v"]))
    out = pool(out, stride)
    out = bn(conv(out, P["w3"], 0), P["bn3_g"], P["bn3_b"],
             P["bn3_m"], P["bn3_v"])
    planes4 = P["w3"].shape[0]
    if stride > 1 or x.shape[1] != planes4:
        identity = bn(conv(pool(x, stride), P["wd"], 0),
                      P["bnd_g"], P["bnd_b"], P["bnd_m"], P["bnd_v"])
    else:
        identity = x
    return jax.nn.relu(out + identity)


# ----------------------------------------------------------------------------
# Deterministic synthetic parameters
# ----------------------------------------------------------------------------
def init_params(key, inplanes, planes):
    exp = 4
    keys = jax.random.split(key, 20)
    k = iter(keys)

    def w(shape):
        return 0.1 * jax.random.normal(next(k), shape, jnp.float32)

    def bn(c):
        return dict(
            g=jax.random.uniform(next(k), (c,), jnp.float32, 0.5, 1.5),
            b=0.1 * jax.random.normal(next(k), (c,), jnp.float32),
            m=0.1 * jax.random.normal(next(k), (c,), jnp.float32),
            v=jax.random.uniform(next(k), (c,), jnp.float32, 0.5, 1.5),
        )

    P = {}
    P["w1"] = w((planes, inplanes, 1, 1))
    b1 = bn(planes)
    P["w2"] = w((planes, planes, 3, 3))
    b2 = bn(planes)
    P["w3"] = w((planes * exp, planes, 1, 1))
    b3 = bn(planes * exp)
    P["wd"] = w((planes * exp, inplanes, 1, 1))
    bd = bn(planes * exp)
    for name, d in (("bn1", b1), ("bn2", b2), ("bn3", b3), ("bnd", bd)):
        for kk, vv in d.items():
            P[f"{name}_{kk}"] = vv
    return P


if __name__ == "__main__":
    inplanes, planes, stride = 4, 4, 2
    N, H, W = 2, 16, 16

    key = jax.random.PRNGKey(0)
    kp, kx = jax.random.split(key)
    params = init_params(kp, inplanes, planes)
    x = jax.random.normal(kx, (N, inplanes, H, W), jnp.float32)

    fwd = jax.jit(functools.partial(bottleneck_forward, stride=stride))
    out = jax.block_until_ready(fwd(x, params))

    ref = reference_forward(x, params, stride)
    assert out.shape == ref.shape, (out.shape, ref.shape)
    err = float(jnp.max(jnp.abs(out - ref)))
    scale = float(jnp.max(jnp.abs(ref)))
    tol = 5e-2 * scale + 1e-2        # bf16 MXU operands vs f32 reference
    if err > tol:
        raise RuntimeError(f"mismatch vs reference: max abs err {err} > {tol}")

    print("KERNEL_OK")
</pallas_src>

<mosaic_0001>
module attributes {stable_mosaic.version = 11 : i64} {
  func.func @kernel(%arg0: i32, %arg1: memref<256x128xbf16, #tpu.memory_space<vmem>>, %arg2: memref<128x128xbf16, #tpu.memory_space<vmem>>, %arg3: memref<1x128xf32, #tpu.memory_space<vmem>>, %arg4: memref<256x128xbf16, #tpu.memory_space<vmem>>) attributes {dimension_semantics = [#tpu.dimension_semantics<parallel>], iteration_bounds = array<i64: 2>, scalar_prefetch = 0 : i64, scratch_operands = 0 : i64, tpu.core_type = #tpu.core_type<tc>, window_params = [{transform_indices = @transform_0, window_bounds = array<i64: 256, 128>}, {pipeline_mode = #tpu.pipeline_mode<synchronous>, transform_indices = @transform_1, window_bounds = array<i64: 128, 128>}, {pipeline_mode = #tpu.pipeline_mode<synchronous>, transform_indices = @transform_2, window_bounds = array<i64: 1, 128>}, {transform_indices = @transform_3, window_bounds = array<i64: 256, 128>}]} {
    %c0 = arith.constant 0 : index
    %c0_0 = arith.constant 0 : index
    %0 = vector.load %arg1[%c0, %c0_0] : memref<256x128xbf16, #tpu.memory_space<vmem>>, vector<256x128xbf16>
    %c0_1 = arith.constant 0 : index
    %c0_2 = arith.constant 0 : index
    %1 = vector.load %arg2[%c0_1, %c0_2] : memref<128x128xbf16, #tpu.memory_space<vmem>>, vector<128x128xbf16>
    %cst = arith.constant dense<0.000000e+00> : vector<256x128xf32>
    %2 = tpu.matmul %0, %1, %cst {dimension_numbers = #tpu.dot_dimension_numbers<[1], [0], [0], [1], [0, 0, 1, 1], [], []>} : vector<256x128xbf16>, vector<128x128xbf16>, vector<256x128xf32> -> vector<256x128xf32>
    %c0_3 = arith.constant 0 : index
    %c0_4 = arith.constant 0 : index
    %3 = vector.load %arg3[%c0_3, %c0_4] : memref<1x128xf32, #tpu.memory_space<vmem>>, vector<1x128xf32>
    %4 = vector.broadcast %3 : vector<1x128xf32> to vector<256x128xf32>
    %5 = arith.addf %2, %4 : vector<256x128xf32>
    %cst_5 = arith.constant 0.000000e+00 : f32
    %6 = vector.broadcast %cst_5 : f32 to vector<256x128xf32>
    %7 = arith.maximumf %5, %6 : vector<256x128xf32>
    %8 = arith.truncf %7 : vector<256x128xf32> to vector<256x128xbf16>
    %c0_6 = arith.constant 0 : index
    %c0_7 = arith.constant 0 : index
    %9 = vector.load %arg4[%c0_6, %c0_7] : memref<256x128xbf16, #tpu.memory_space<vmem>>, vector<256x128xbf16>
    tpu.vector_store %arg4[%c0_6, %c0_7], %8 {strides = array<i32>} : memref<256x128xbf16, #tpu.memory_space<vmem>>, vector<256x128xbf16>,
    return
  }
  func.func @transform_0(%arg0: i32) -> (i32, i32) {
    %c0_i32 = arith.constant 0 : i32
    %c0_i32_0 = arith.constant 0 : i32
    return %arg0, %c0_i32 : i32, i32
  }
  func.func @transform_1(%arg0: i32) -> (i32, i32) {
    %c0_i32 = arith.constant 0 : i32
    %c0_i32_0 = arith.constant 0 : i32
    %c0_i32_1 = arith.constant 0 : i32
    return %c0_i32, %c0_i32_0 : i32, i32
  }
  func.func @transform_2(%arg0: i32) -> (i32, i32) {
    %c0_i32 = arith.constant 0 : i32
    %c0_i32_0 = arith.constant 0 : i32
    %c0_i32_1 = arith.constant 0 : i32
    return %c0_i32, %c0_i32_0 : i32, i32
  }
  func.func @transform_3(%arg0: i32) -> (i32, i32) {
    %c0_i32 = arith.constant 0 : i32
    %c0_i32_0 = arith.constant 0 : i32
    return %arg0, %c0_i32 : i32, i32
  }
}

module attributes {stable_mosaic.version = 11 : i64} {
  func.func @kernel(%arg0: i32, %arg1: memref<64x128xbf16, #tpu.memory_space<vmem>>, %arg2: memref<128x128xbf16, #tpu.memory_space<vmem>>, %arg3: memref<1x128xf32, #tpu.memory_space<vmem>>, %arg4: memref<64x128xf32, #tpu.memory_space<vmem>>) attributes {dimension_semantics = [#tpu.dimension_semantics<parallel>], iteration_bounds = array<i64: 2>, scalar_prefetch = 0 : i64, scratch_operands = 0 : i64, tpu.core_type = #tpu.core_type<tc>, window_params = [{transform_indices = @transform_0, window_bounds = array<i64: 64, 128>}, {pipeline_mode = #tpu.pipeline_mode<synchronous>, transform_indices = @transform_1, window_bounds = array<i64: 128, 128>}, {pipeline_mode = #tpu.pipeline_mode<synchronous>, transform_indices = @transform_2, window_bounds = array<i64: 1, 128>}, {transform_indices = @transform_3, window_bounds = array<i64: 64, 128>}]} {
    %c0 = arith.constant 0 : index
    %c0_0 = arith.constant 0 : index
    %0 = vector.load %arg1[%c0, %c0_0] : memref<64x128xbf16, #tpu.memory_space<vmem>>, vector<64x128xbf16>
    %c0_1 = arith.constant 0 : index
    %c0_2 = arith.constant 0 : index
    %1 = vector.load %arg2[%c0_1, %c0_2] : memref<128x128xbf16, #tpu.memory_space<vmem>>, vector<128x128xbf16>
    %cst = arith.constant dense<0.000000e+00> : vector<64x128xf32>
    %2 = tpu.matmul %0, %1, %cst {dimension_numbers = #tpu.dot_dimension_numbers<[1], [0], [0], [1], [0, 0, 1, 1], [], []>} : vector<64x128xbf16>, vector<128x128xbf16>, vector<64x128xf32> -> vector<64x128xf32>
    %c0_3 = arith.constant 0 : index
    %c0_4 = arith.constant 0 : index
    %3 = vector.load %arg3[%c0_3, %c0_4] : memref<1x128xf32, #tpu.memory_space<vmem>>, vector<1x128xf32>
    %4 = vector.broadcast %3 : vector<1x128xf32> to vector<64x128xf32>
    %5 = arith.addf %2, %4 : vector<64x128xf32>
    %c0_5 = arith.constant 0 : index
    %c0_6 = arith.constant 0 : index
    %6 = vector.load %arg4[%c0_5, %c0_6] : memref<64x128xf32, #tpu.memory_space<vmem>>, vector<64x128xf32>
    tpu.vector_store %arg4[%c0_5, %c0_6], %5 {strides = array<i32>} : memref<64x128xf32, #tpu.memory_space<vmem>>, vector<64x128xf32>,
    return
  }
  func.func @transform_0(%arg0: i32) -> (i32, i32) {
    %c0_i32 = arith.constant 0 : i32
    %c0_i32_0 = arith.constant 0 : i32
    return %arg0, %c0_i32 : i32, i32
  }
  func.func @transform_1(%arg0: i32) -> (i32, i32) {
    %c0_i32 = arith.constant 0 : i32
    %c0_i32_0 = arith.constant 0 : i32
    %c0_i32_1 = arith.constant 0 : i32
    return %c0_i32, %c0_i32_0 : i32, i32
  }
  func.func @transform_2(%arg0: i32) -> (i32, i32) {
    %c0_i32 = arith.constant 0 : i32
    %c0_i32_0 = arith.constant 0 : i32
    %c0_i32_1 = arith.constant 0 : i32
    return %c0_i32, %c0_i32_0 : i32, i32
  }
  func.func @transform_3(%arg0: i32) -> (i32, i32) {
    %c0_i32 = arith.constant 0 : i32
    %c0_i32_0 = arith.constant 0 : i32
    return %arg0, %c0_i32 : i32, i32
  }
}

module attributes {stable_mosaic.version = 11 : i64} {
  func.func @kernel(%arg0: i32, %arg1: i32, %arg2: memref<1x336x128xbf16, #tpu.memory_space<vmem>>, %arg3: memref<9x128x128xbf16, #tpu.memory_space<vmem>>, %arg4: memref<1x128xf32, #tpu.memory_space<vmem>>, %arg5: memref<1x128x128xbf16, #tpu.memory_space<vmem>>) attributes {dimension_semantics = [#tpu.dimension_semantics<parallel>, #tpu.dimension_semantics<parallel>], iteration_bounds = array<i64: 2, 2>, scalar_prefetch = 0 : i64, scratch_operands = 0 : i64, tpu.core_type = #tpu.core_type<tc>, window_params = [{transform_indices = @transform_0, window_bounds = array<i64: 1, 336, 128>}, {pipeline_mode = #tpu.pipeline_mode<synchronous>, transform_indices = @transform_1, window_bounds = array<i64: 9, 128, 128>}, {pipeline_mode = #tpu.pipeline_mode<synchronous>, transform_indices = @transform_2, window_bounds = array<i64: 1, 128>}, {transform_indices = @transform_3, window_bounds = array<i64: 1, 128, 128>}]} {
    %c128_i32 = arith.constant 128 : i32
    %0 = arith.muli %arg1, %c128_i32 : i32
    %1 = tpu.assume_multiple %0, 8 : i32
    %c0 = arith.constant 0 : index
    %2 = arith.index_cast %1 : i32 to index
    %c0_0 = arith.constant 0 : index
    %3 = vector.load %arg2[%c0, %2, %c0_0] : memref<1x336x128xbf16, #tpu.memory_space<vmem>>, vector<1x184x128xbf16>
    %4 = vector.shape_cast %3 : vector<1x184x128xbf16> to vector<184x128xbf16>
    %5 = tpu.iota {dimensions = array<i32: 0>} : vector<128x1xi32>
    %6 = vector.broadcast %1 : i32 to vector<128x1xi32>
    %7 = arith.addi %5, %6 : vector<128x1xi32>
    %c16_i32 = arith.constant 16 : i32
    %c0_i32 = arith.constant 0 : i32
    %8 = arith.cmpi eq, %c16_i32, %c0_i32 : i32
    %c1_i32 = arith.constant 1 : i32
    %9 = arith.select %8, %c1_i32, %c16_i32 : i32
    %10 = vector.broadcast %9 : i32 to vector<128x1xi32>
    %11 = arith.remsi %7, %10 : vector<128x1xi32>
    %c0_i32_1 = arith.constant 0 : i32
    %12 = vector.broadcast %c0_i32_1 : i32 to vector<128x1xi32>
    %13 = arith.cmpi ne, %11, %12 : vector<128x1xi32>
    %c0_i32_2 = arith.constant 0 : i32
    %14 = vector.broadcast %c0_i32_2 : i32 to vector<128x1xi32>
    %15 = arith.cmpi slt, %11, %14 : vector<128x1xi32>
    %c0_i32_3 = arith.constant 0 : i32
    %16 = arith.cmpi slt, %9, %c0_i32_3 : i32
    %17 = vector.broadcast %16 : i1 to vector<128x1xi1>
    %18 = vector.broadcast %17 : vector<128x1xi1> to vector<128x1xi1>
    %19 = arith.xori %15, %18 : vector<128x1xi1>
    %20 = arith.andi %19, %13 : vector<128x1xi1>
    %21 = vector.broadcast %9 : i32 to vector<128x1xi32>
    %22 = arith.addi %11, %21 : vector<128x1xi32>
    %23 = arith.select %20, %22, %11 : vector<128x1xi1>, vector<128x1xi32>
    %c0_i32_4 = arith.constant 0 : i32
    %24 = vector.broadcast %c0_i32_4 : i32 to vector<128x1xi32>
    %25 = arith.cmpi ne, %23, %24 : vector<128x1xi32>
    %c15_i32 = arith.constant 15 : i32
    %26 = vector.broadcast %c15_i32 : i32 to vector<128x1xi32>
    %27 = arith.cmpi ne, %23, %26 : vector<128x1xi32>
    %cst = arith.constant 0.000000e+00 : f32
    %28 = vector.broadcast %cst : f32 to vector<128x128xf32>
    %29 = vector.extract_strided_slice %4 {offsets = [15, 0], sizes = [128, 128], strides = [1, 1]} : vector<184x128xbf16> to vector<128x128xbf16>
    %cst_5 = arith.constant 0.000000e+00 : bf16
    %30 = vector.broadcast %cst_5 : bf16 to vector<128x128xbf16>
    %31 = vector.shape_cast %25 : vector<128x1xi1> to vector<128x1xi1>
    %32 = vector.broadcast %31 : vector<128x1xi1> to vector<128x128xi1>
    %33 = arith.select %32, %29, %30 : vector<128x128xi1>, vector<128x128xbf16>
    %c0_6 = arith.constant 0 : index
    %c0_7 = arith.constant 0 : index
    %c0_8 = arith.constant 0 : index
    %34 = vector.load %arg3[%c0_6, %c0_7, %c0_8] : memref<9x128x128xbf16, #tpu.memory_space<vmem>>, vector<1x128x128xbf16>
    %35 = vector.shape_cast %34 : vector<1x128x128xbf16> to vector<128x128xbf16>
    %cst_9 = arith.constant dense<0.000000e+00> : vector<128x128xf32>
    %36 = tpu.matmul %33, %35, %cst_9 {dimension_numbers = #tpu.dot_dimension_numbers<[1], [0], [0], [1], [0, 0, 1, 1], [], []>} : vector<128x128xbf16>, vector<128x128xbf16>, vector<128x128xf32> -> vector<128x128xf32>
    %37 = arith.addf %28, %36 : vector<128x128xf32>
    %38 = vector.extract_strided_slice %4 {offsets = [16, 0], sizes = [128, 128], strides = [1, 1]} : vector<184x128xbf16> to vector<128x128xbf16>
    %c1 = arith.constant 1 : index
    %c0_10 = arith.constant 0 : index
    %c0_11 = arith.constant 0 : index
    %39 = vector.load %arg3[%c1, %c0_10, %c0_11] : memref<9x128x128xbf16, #tpu.memory_space<vmem>>, vector<1x128x128xbf16>
    %40 = vector.shape_cast %39 : vector<1x128x128xbf16> to vector<128x128xbf16>
    %cst_12 = arith.constant dense<0.000000e+00> : vector<128x128xf32>
    %41 = tpu.matmul %38, %40, %cst_12 {dimension_numbers = #tpu.dot_dimension_numbers<[1], [0], [0], [1], [0, 0, 1, 1], [], []>} : vector<128x128xbf16>, vector<128x128xbf16>, vector<128x128xf32> -> vector<128x128xf32>
    %42 = arith.addf %37, %41 : vector<128x128xf32>
    %43 = vector.extract_strided_slice %4 {offsets = [17, 0], sizes = [128, 128], strides = [1, 1]} : vector<184x128xbf16> to vector<128x128xbf16>
    %cst_13 = arith.constant 0.000000e+00 : bf16
    %44 = vector.broadcast %cst_13 : bf16 to vector<128x128xbf16>
    %45 = vector.shape_cast %27 : vector<128x1xi1> to vector<128x1xi1>
    %46 = vector.broadcast %45 : vector<128x1xi1> to vector<128x128xi1>
    %47 = arith.select %46, %43, %44 : vector<128x128xi1>, vector<128x128xbf16>
    %c2 = arith.constant 2 : index
    %c0_14 = arith.constant 0 : index
    %c0_15 = arith.constant 0 : index
    %48 = vector.load %arg3[%c2, %c0_14, %c0_15] : memref<9x128x128xbf16, #tpu.memory_space<vmem>>, vector<1x128x128xbf16>
    %49 = vector.shape_cast %48 : vector<1x128x128xbf16> to vector<128x128xbf16>
    %cst_16 = arith.constant dense<0.000000e+00> : vector<128x128xf32>
    %50 = tpu.matmul %47, %49, %cst_16 {dimension_numbers = #tpu.dot_dimension_numbers<[1], [0], [0], [1], [0, 0, 1, 1], [], []>} : vector<128x128xbf16>, vector<128x128xbf16>, vector<128x128xf32> -> vector<128x128xf32>
    %51 = arith.addf %42, %50 : vector<128x128xf32>
    %52 = vector.extract_strided_slice %4 {offsets = [31, 0], sizes = [128, 128], strides = [1, 1]} : vector<184x128xbf16> to vector<128x128xbf16>
    %cst_17 = arith.constant 0.000000e+00 : bf16
    %53 = vector.broadcast %cst_17 : bf16 to vector<128x128xbf16>
    %54 = vector.shape_cast %25 : vector<128x1xi1> to vector<128x1xi1>
    %55 = vector.broadcast %54 : vector<128x1xi1> to vector<128x128xi1>
    %56 = arith.select %55, %52, %53 : vector<128x128xi1>, vector<128x128xbf16>
    %c3 = arith.constant 3 : index
    %c0_18 = arith.constant 0 : index
    %c0_19 = arith.constant 0 : index
    %57 = vector.load %arg3[%c3, %c0_18, %c0_19] : memref<9x128x128xbf16, #tpu.memory_space<vmem>>, vector<1x128x128xbf16>
    %58 = vector.shape_cast %57 : vector<1x128x128xbf16> to vector<128x128xbf16>
    %cst_20 = arith.constant dense<0.000000e+00> : vector<128x128xf32>
    %59 = tpu.matmul %56, %58, %cst_20 {dimension_numbers = #tpu.dot_dimension_numbers<[1], [0], [0], [1], [0, 0, 1, 1], [], []>} : vector<128x128xbf16>, vector<128x128xbf16>, vector<128x128xf32> -> vector<128x128xf32>
    %60 = arith.addf %51, %59 : vector<128x128xf32>
    %61 = vector.extract_strided_slice %4 {offsets = [32, 0], sizes = [128, 128], strides = [1, 1]} : vector<184x128xbf16> to vector<128x128xbf16>
    %c4 = arith.constant 4 : index
    %c0_21 = arith.constant 0 : index
    %c0_22 = arith.constant 0 : index
    %62 = vector.load %arg3[%c4, %c0_21, %c0_22] : memref<9x128x128xbf16, #tpu.memory_space<vmem>>, vector<1x128x128xbf16>
    %63 = vector.shape_cast %62 : vector<1x128x128xbf16> to vector<128x128xbf16>
    %cst_23 = arith.constant dense<0.000000e+00> : vector<128x128xf32>
    %64 = tpu.matmul %61, %63, %cst_23 {dimension_numbers = #tpu.dot_dimension_numbers<[1], [0], [0], [1], [0, 0, 1, 1], [], []>} : vector<128x128xbf16>, vector<128x128xbf16>, vector<128x128xf32> -> vector<128x128xf32>
    %65 = arith.addf %60, %64 : vector<128x128xf32>
    %66 = vector.extract_strided_slice %4 {offsets = [33, 0], sizes = [128, 128], strides = [1, 1]} : vector<184x128xbf16> to vector<128x128xbf16>
    %cst_24 = arith.constant 0.000000e+00 : bf16
    %67 = vector.broadcast %cst_24 : bf16 to vector<128x128xbf16>
    %68 = vector.shape_cast %27 : vector<128x1xi1> to vector<128x1xi1>
    %69 = vector.broadcast %68 : vector<128x1xi1> to vector<128x128xi1>
    %70 = arith.select %69, %66, %67 : vector<128x128xi1>, vector<128x128xbf16>
    %c5 = arith.constant 5 : index
    %c0_25 = arith.constant 0 : index
    %c0_26 = arith.constant 0 : index
    %71 = vector.load %arg3[%c5, %c0_25, %c0_26] : memref<9x128x128xbf16, #tpu.memory_space<vmem>>, vector<1x128x128xbf16>
    %72 = vector.shape_cast %71 : vector<1x128x128xbf16> to vector<128x128xbf16>
    %cst_27 = arith.constant dense<0.000000e+00> : vector<128x128xf32>
    %73 = tpu.matmul %70, %72, %cst_27 {dimension_numbers = #tpu.dot_dimension_numbers<[1], [0], [0], [1], [0, 0, 1, 1], [], []>} : vector<128x128xbf16>, vector<128x128xbf16>, vector<128x128xf32> -> vector<128x128xf32>
    %74 = arith.addf %65, %73 : vector<128x128xf32>
    %75 = vector.extract_strided_slice %4 {offsets = [47, 0], sizes = [128, 128], strides = [1, 1]} : vector<184x128xbf16> to vector<128x128xbf16>
    %cst_28 = arith.constant 0.000000e+00 : bf16
    %76 = vector.broadcast %cst_28 : bf16 to vector<128x128xbf16>
    %77 = vector.shape_cast %25 : vector<128x1xi1> to vector<128x1xi1>
    %78 = vector.broadcast %77 : vector<128x1xi1> to vector<128x128xi1>
    %79 = arith.select %78, %75, %76 : vector<128x128xi1>, vector<128x128xbf16>
    %c6 = arith.constant 6 : index
    %c0_29 = arith.constant 0 : index
    %c0_30 = arith.constant 0 : index
    %80 = vector.load %arg3[%c6, %c0_29, %c0_30] : memref<9x128x128xbf16, #tpu.memory_space<vmem>>, vector<1x128x128xbf16>
    %81 = vector.shape_cast %80 : vector<1x128x128xbf16> to vector<128x128xbf16>
    %cst_31 = arith.constant dense<0.000000e+00> : vector<128x128xf32>
    %82 = tpu.matmul %79, %81, %cst_31 {dimension_numbers = #tpu.dot_dimension_numbers<[1], [0], [0], [1], [0, 0, 1, 1], [], []>} : vector<128x128xbf16>, vector<128x128xbf16>, vector<128x128xf32> -> vector<128x128xf32>
    %83 = arith.addf %74, %82 : vector<128x128xf32>
    %84 = vector.extract_strided_slice %4 {offsets = [48, 0], sizes = [128, 128], strides = [1, 1]} : vector<184x128xbf16> to vector<128x128xbf16>
    %c7 = arith.constant 7 : index
    %c0_32 = arith.constant 0 : index
    %c0_33 = arith.constant 0 : index
    %85 = vector.load %arg3[%c7, %c0_32, %c0_33] : memref<9x128x128xbf16, #tpu.memory_space<vmem>>, vector<1x128x128xbf16>
    %86 = vector.shape_cast %85 : vector<1x128x128xbf16> to vector<128x128xbf16>
    %cst_34 = arith.constant dense<0.000000e+00> : vector<128x128xf32>
    %87 = tpu.matmul %84, %86, %cst_34 {dimension_numbers = #tpu.dot_dimension_numbers<[1], [0], [0], [1], [0, 0, 1, 1], [], []>} : vector<128x128xbf16>, vector<128x128xbf16>, vector<128x128xf32> -> vector<128x128xf32>
    %88 = arith.addf %83, %87 : vector<128x128xf32>
    %89 = vector.extract_strided_slice %4 {offsets = [49, 0], sizes = [128, 128], strides = [1, 1]} : vector<184x128xbf16> to vector<128x128xbf16>
    %cst_35 = arith.constant 0.000000e+00 : bf16
    %90 = vector.broadcast %cst_35 : bf16 to vector<128x128xbf16>
    %91 = vector.shape_cast %27 : vector<128x1xi1> to vector<128x1xi1>
    %92 = vector.broadcast %91 : vector<128x1xi1> to vector<128x128xi1>
    %93 = arith.select %92, %89, %90 : vector<128x128xi1>, vector<128x128xbf16>
    %c8 = arith.constant 8 : index
    %c0_36 = arith.constant 0 : index
    %c0_37 = arith.constant 0 : index
    %94 = vector.load %arg3[%c8, %c0_36, %c0_37] : memref<9x128x128xbf16, #tpu.memory_space<vmem>>, vector<1x128x128xbf16>
    %95 = vector.shape_cast %94 : vector<1x128x128xbf16> to vector<128x128xbf16>
    %cst_38 = arith.constant dense<0.000000e+00> : vector<128x128xf32>
    %96 = tpu.matmul %93, %95, %cst_38 {dimension_numbers = #tpu.dot_dimension_numbers<[1], [0], [0], [1], [0, 0, 1, 1], [], []>} : vector<128x128xbf16>, vector<128x128xbf16>, vector<128x128xf32> -> vector<128x128xf32>
    %97 = arith.addf %88, %96 : vector<128x128xf32>
    %c0_39 = arith.constant 0 : index
    %c0_40 = arith.constant 0 : index
    %98 = vector.load %arg4[%c0_39, %c0_40] : memref<1x128xf32, #tpu.memory_space<vmem>>, vector<1x128xf32>
    %99 = vector.broadcast %98 : vector<1x128xf32> to vector<128x128xf32>
    %100 = arith.addf %97, %99 : vector<128x128xf32>
    %cst_41 = arith.constant 0.000000e+00 : f32
    %101 = vector.broadcast %cst_41 : f32 to vector<128x128xf32>
    %102 = arith.maximumf %100, %101 : vector<128x128xf32>
    %103 = arith.truncf %102 : vector<128x128xf32> to vector<128x128xbf16>
    %c0_42 = arith.constant 0 : index
    %c0_43 = arith.constant 0 : index
    %c0_44 = arith.constant 0 : index
    %104 = vector.load %arg5[%c0_42, %c0_43, %c0_44] : memref<1x128x128xbf16, #tpu.memory_space<vmem>>, vector<1x128x128xbf16>
    %105 = vector.shape_cast %104 : vector<1x128x128xbf16> to vector<128x128xbf16>
    %106 = vector.shape_cast %103 : vector<128x128xbf16> to vector<1x128x128xbf16>
    tpu.vector_store %arg5[%c0_42, %c0_43, %c0_44], %106 {strides = array<i32>} : memref<1x128x128xbf16, #tpu.memory_space<vmem>>, vector<1x128x128xbf16>,
    return
  }
  func.func @transform_0(%arg0: i32, %arg1: i32) -> (i32, i32, i32) {
    %c0_i32 = arith.constant 0 : i32
    %c0_i32_0 = arith.constant 0 : i32
    %c0_i32_1 = arith.constant 0 : i32
    return %arg0, %c0_i32, %c0_i32_0 : i32, i32, i32
  }
  func.func @transform_1(%arg0: i32, %arg1: i32) -> (i32, i32, i32) {
    %c0_i32 = arith.constant 0 : i32
    %c0_i32_0 = arith.constant 0 : i32
    %c0_i32_1 = arith.constant 0 : i32
    %c0_i32_2 = arith.constant 0 : i32
    return %c0_i32, %c0_i32_0, %c0_i32_1 : i32, i32, i32
  }
  func.func @transform_2(%arg0: i32, %arg1: i32) -> (i32, i32) {
    %c0_i32 = arith.constant 0 : i32
    %c0_i32_0 = arith.constant 0 : i32
    %c0_i32_1 = arith.constant 0 : i32
    return %c0_i32, %c0_i32_0 : i32, i32
  }
  func.func @transform_3(%arg0: i32, %arg1: i32) -> (i32, i32, i32) {
    %c0_i32 = arith.constant 0 : i32
    %c0_i32_0 = arith.constant 0 : i32
    return %arg0, %arg1, %c0_i32 : i32, i32, i32
  }
}

module attributes {stable_mosaic.version = 11 : i64} {
  func.func @kernel(%arg0: i32, %arg1: memref<64x128xbf16, #tpu.memory_space<vmem>>, %arg2: memref<128x128xbf16, #tpu.memory_space<vmem>>, %arg3: memref<1x128xf32, #tpu.memory_space<vmem>>, %arg4: memref<64x128xf32, #tpu.memory_space<vmem>>, %arg5: memref<64x128xf32, #tpu.memory_space<vmem>>) attributes {dimension_semantics = [#tpu.dimension_semantics<parallel>], iteration_bounds = array<i64: 2>, scalar_prefetch = 0 : i64, scratch_operands = 0 : i64, tpu.core_type = #tpu.core_type<tc>, window_params = [{transform_indices = @transform_0, window_bounds = array<i64: 64, 128>}, {pipeline_mode = #tpu.pipeline_mode<synchronous>, transform_indices = @transform_1, window_bounds = array<i64: 128, 128>}, {pipeline_mode = #tpu.pipeline_mode<synchronous>, transform_indices = @transform_2, window_bounds = array<i64: 1, 128>}, {transform_indices = @transform_3, window_bounds = array<i64: 64, 128>}, {transform_indices = @transform_4, window_bounds = array<i64: 64, 128>}]} {
    %c0 = arith.constant 0 : index
    %c0_0 = arith.constant 0 : index
    %0 = vector.load %arg1[%c0, %c0_0] : memref<64x128xbf16, #tpu.memory_space<vmem>>, vector<64x128xbf16>
    %c0_1 = arith.constant 0 : index
    %c0_2 = arith.constant 0 : index
    %1 = vector.load %arg2[%c0_1, %c0_2] : memref<128x128xbf16, #tpu.memory_space<vmem>>, vector<128x128xbf16>
    %cst = arith.constant dense<0.000000e+00> : vector<64x128xf32>
    %2 = tpu.matmul %0, %1, %cst {dimension_numbers = #tpu.dot_dimension_numbers<[1], [0], [0], [1], [0, 0, 1, 1], [], []>} : vector<64x128xbf16>, vector<128x128xbf16>, vector<64x128xf32> -> vector<64x128xf32>
    %c0_3 = arith.constant 0 : index
    %c0_4 = arith.constant 0 : index
    %3 = vector.load %arg3[%c0_3, %c0_4] : memref<1x128xf32, #tpu.memory_space<vmem>>, vector<1x128xf32>
    %4 = vector.broadcast %3 : vector<1x128xf32> to vector<64x128xf32>
    %5 = arith.addf %2, %4 : vector<64x128xf32>
    %c0_5 = arith.constant 0 : index
    %c0_6 = arith.constant 0 : index
    %6 = vector.load %arg4[%c0_5, %c0_6] : memref<64x128xf32, #tpu.memory_space<vmem>>, vector<64x128xf32>
    %7 = arith.addf %5, %6 : vector<64x128xf32>
    %cst_7 = arith.constant 0.000000e+00 : f32
    %8 = vector.broadcast %cst_7 : f32 to vector<64x128xf32>
    %9 = arith.maximumf %7, %8 : vector<64x128xf32>
    %c0_8 = arith.constant 0 : index
    %c0_9 = arith.constant 0 : index
    %10 = vector.load %arg5[%c0_8, %c0_9] : memref<64x128xf32, #tpu.memory_space<vmem>>, vector<64x128xf32>
    tpu.vector_store %arg5[%c0_8, %c0_9], %9 {strides = array<i32>} : memref<64x128xf32, #tpu.memory_space<vmem>>, vector<64x128xf32>,
    return
  }
  func.func @transform_0(%arg0: i32) -> (i32, i32) {
    %c0_i32 = arith.constant 0 : i32
    %c0_i32_0 = arith.constant 0 : i32
    return %arg0, %c0_i32 : i32, i32
  }
  func.func @transform_1(%arg0: i32) -> (i32, i32) {
    %c0_i32 = arith.constant 0 : i32
    %c0_i32_0 = arith.constant 0 : i32
    %c0_i32_1 = arith.constant 0 : i32
    return %c0_i32, %c0_i32_0 : i32, i32
  }
  func.func @transform_2(%arg0: i32) -> (i32, i32) {
    %c0_i32 = arith.constant 0 : i32
    %c0_i32_0 = arith.constant 0 : i32
    %c0_i32_1 = arith.constant 0 : i32
    return %c0_i32, %c0_i32_0 : i32, i32
  }
  func.func @transform_3(%arg0: i32) -> (i32, i32) {
    %c0_i32 = arith.constant 0 : i32
    %c0_i32_0 = arith.constant 0 : i32
    return %arg0, %c0_i32 : i32, i32
  }
  func.func @transform_4(%arg0: i32) -> (i32, i32) {
    %c0_i32 = arith.constant 0 : i32
    %c0_i32_0 = arith.constant 0 : i32
    return %arg0, %c0_i32 : i32, i32
  }
}

</mosaic_0001>

<bundles_post_ra>
// kernel: bottleneck_forward.6
= control target key start
LH: loop header
LB: loop body
LE: loop exit
PB: predicated region body
PF: predicated region fallthrough
CT: control target
= control target key end

     0   :  { %s499_s12 = smov 0   ;;  %s543_s0 = inlined_call_operand.vmem [shape: bf16[128,128], index: 0, kind: input, shape index: {}]   ;;  %s544_s1 = inlined_call_operand.vmem [shape: bf16[128,128], index: 1, kind: input, shape index: {}]   ;;  %s545_s2 = inlined_call_operand.vmem [shape: f32[1,128], index: 2, kind: input, shape index: {}]   ;;  %s546_s3 = inlined_call_operand.vmem [shape: f32[128,128], index: 3, kind: output, shape index: {}]  }
   0x1 LB: > { %s367_s13 = sadd.s32 4294967295, %s477_s12   ;;  %p371_p0 = scmp.ge.s32.totalorder %s477_s12, 1  ;;  %s477_s12 = sphi %s499_s12, %s13_s12  }
   0x2   : > { %p138_p1 = scmp.lt.s32.totalorder %s477_s12, 3 }
   0x4   : > { %p139_p2 = pnand %p371_p0, %p138_p1 }
   0x5   : > { %s372_s22 = sshll.u32 (!%p139_p2), %s367_s13, 3 }
   0x6   : > { %142 = sbr.rel (%p139_p2) target bundleno = 188 (0xbc), region = 32  ;;  %p163_p3 = scmp.lt.s32.totalorder (!%p139_p2), %s372_s22, 15 }
   0xb   : > { %v437_v0 = vld [vmem:[%s544_s1 + $0x38] sm:$0xff]  ;;  %v436_v1 = vld [vmem:[%s544_s1 + $0x30] sm:$0xff]  ;;  %v435_v2 = vld [vmem:[%s544_s1 + $0x28] sm:$0xff]  ;;  %s548_s22 = smov (!%p163_p3, %s372_s22), 15 }
   0xc   : > { %274 = vmatpush.bf16.msra.mxu0 %v437_v0  ;;  %438 = vmatpush.bf16.msra.mxu1 %v437_v0  ;;  %v434_v3 = vld [vmem:[%s544_s1 + $0x20] sm:$0xff]  ;;  %v433_v4 = vld [vmem:[%s544_s1 + $0x18] sm:$0xff]  ;;  %v432_v5 = vld [vmem:[%s544_s1 + $0x10] sm:$0xff]  ;;  %s373_s29 = sshll.u32 %s548_s22, 2  ;;  %s375_s8 = sshll.u32 %s548_s22, 3 }
   0xd   : > { %439 = vmatpush.bf16.msra.mxu2 %v437_v0  ;;  %440 = vmatpush.bf16.msra.mxu3 %v437_v0  ;;  %v431_v6 = vld [vmem:[%s544_s1 + $0x8] sm:$0xff]  ;;  %v430_v7 = vld [vmem:[%s544_s1] sm:$0xff]  ;;  %s166_s7 = scalar_lea.vmem %s543_s0, %s373_s29  ;;  %s172_s14 = scalar_lea.vmem %s546_s3, %s375_s8 }
   0xe   : > { %v426_v8 = vld [vmem:[%s166_s7] sm:$0xff]  ;;  %v427_v9 = vld [vmem:[%s166_s7 + $0x8] sm:$0xff]  ;;  %v428_v10 = vld [vmem:[%s166_s7 + $0x10] sm:$0xff] }
   0xf   : > { %v429_v11 = vld [vmem:[%s166_s7 + $0x18] sm:$0xff]  ;;  %v470_v12 = vld [vmem:[%s545_s2] ss:$0 sm:$0xff] }
  0x10   : > { %275 = vmatpush.bf16.msra.mxu0 %v436_v1  ;;  %441 = vmatpush.bf16.msra.mxu1 %v436_v1 }
  0x11   : > { %442 = vmatpush.bf16.msra.mxu2 %v436_v1  ;;  %443 = vmatpush.bf16.msra.mxu3 %v436_v1 }
  0x14   : > { %276 = vmatpush.bf16.msra.mxu0 %v435_v2  ;;  %444 = vmatpush.bf16.msra.mxu1 %v435_v2 }
  0x15   : > { %445 = vmatpush.bf16.msra.mxu2 %v435_v2  ;;  %446 = vmatpush.bf16.msra.mxu3 %v435_v2 }
  0x18   : > { %277 = vmatpush.bf16.msra.mxu0 %v434_v3  ;;  %447 = vmatpush.bf16.msra.mxu1 %v434_v3 }
  0x19   : > { %448 = vmatpush.bf16.msra.mxu2 %v434_v3  ;;  %449 = vmatpush.bf16.msra.mxu3 %v434_v3 }
  0x1c   : > { %278 = vmatpush.bf16.msra.mxu0 %v433_v4  ;;  %450 = vmatpush.bf16.msra.mxu1 %v433_v4 }
  0x1d   : > { %451 = vmatpush.bf16.msra.mxu2 %v433_v4  ;;  %452 = vmatpush.bf16.msra.mxu3 %v433_v4 }
  0x20   : > { %279 = vmatpush.bf16.msra.mxu0 %v432_v5  ;;  %453 = vmatpush.bf16.msra.mxu1 %v432_v5 }
  0x21   : > { %454 = vmatpush.bf16.msra.mxu2 %v432_v5  ;;  %455 = vmatpush.bf16.msra.mxu3 %v432_v5 }
  0x24   : > { %280 = vmatpush.bf16.msra.mxu0 %v431_v6  ;;  %456 = vmatpush.bf16.msra.mxu1 %v431_v6 }
  0x25   : > { %457 = vmatpush.bf16.msra.mxu2 %v431_v6  ;;  %458 = vmatpush.bf16.msra.mxu3 %v431_v6 }
  0x28   : > { %281 = vmatpush.bf16.msra.mxu0 %v430_v7  ;;  %459 = vmatpush.bf16.msra.mxu1 %v430_v7 }
  0x29   : > { %460 = vmatpush.bf16.msra.mxu2 %v430_v7  ;;  %461 = vmatpush.bf16.msra.mxu3 %v430_v7 }
  0x2b   : > { %282 = vmatmul.bf16.vlgmr.msra.gmra.mxu0 %v426_v8  ;;  %287 = vmatmul.bf16.vlgmr.msra.gmra.mxu1 %v427_v9 }
  0x2c   : > { %292 = vmatmul.bf16.vlgmr.msra.gmra.mxu2 %v428_v10  ;;  %297 = vmatmul.bf16.vlgmr.msra.gmra.mxu3 %v429_v11 }
  0xa8   : > { %v283_v13 = vpop.f32.mrf.mxu0  ;;  %v288_v14 = vpop.f32.mrf.mxu1 }
  0xa9   : > { %v284_v15 = vadd.f32 %v470_v12, %v283_v13  ;;  %v289_v16 = vadd.f32 %v470_v12, %v288_v14 }
  0xab   : > { %303 = vst [vmem:[%s172_s14] sm:$0xff] %v284_v15 }
  0xac   : > { %305 = vst [vmem:[%s172_s14 + $0x10] sm:$0xff] %v289_v16 }
  0xaf   : > { %v293_v17 = vpop.f32.mrf.mxu2  ;;  %v298_v18 = vpop.f32.mrf.mxu3 }
  0xb0   : > { %v294_v19 = vadd.f32 %v470_v12, %v293_v17  ;;  %v299_v20 = vadd.f32 %v470_v12, %v298_v18  ;;  %v285_v21 = vpop.f32.mrf.mxu0  ;;  %v290_v22 = vpop.f32.mrf.mxu1 }
  0xb1   : > { %v286_v23 = vadd.f32 %v470_v12, %v285_v21  ;;  %v291_v24 = vadd.f32 %v470_v12, %v290_v22 }
  0xb2   : > { %307 = vst [vmem:[%s172_s14 + $0x20] sm:$0xff] %v294_v19 }
  0xb3   : > { %309 = vst [vmem:[%s172_s14 + $0x30] sm:$0xff] %v299_v20 }
  0xb4   : > { %304 = vst [vmem:[%s172_s14 + $0x8] sm:$0xff] %v286_v23 }
  0xb5   : > { %306 = vst [vmem:[%s172_s14 + $0x18] sm:$0xff] %v291_v24 }
  0xb7   : > { %v295_v25 = vpop.f32.mrf.mxu2  ;;  %v300_v26 = vpop.f32.mrf.mxu3 }
  0xb8   : > { %v296_v27 = vadd.f32 %v470_v12, %v295_v25  ;;  %v301_v28 = vadd.f32 %v470_v12, %v300_v26 }
  0xba   : > { %308 = vst [vmem:[%s172_s14 + $0x28] sm:$0xff] %v296_v27 }
  0xbb   : > { %310 = vst [vmem:[%s172_s14 + $0x38] sm:$0xff] %v301_v28 }
  0xbc PF: > { %s13_s12 = sadd.s32 1, %s477_s12  }
  0xbd   : > { %p10_p4 = scmp.ge.s32.totalorder %s13_s12, 4  }
  0xbf   :  { %12 = sbr.rel (!%p10_p4) target bundleno = 1 (0x1), region = 62 }

// kernel: bottleneck_forward.4
= control target key start
LH: loop header
LB: loop body
LE: loop exit
PB: predicated region body
PF: predicated region fallthrough
CT: control target
= control target key end

     0   :  { %s898_s12 = smov 0   ;;  %s1019_s0 = inlined_call_operand.vmem [shape: bf16[512,128], index: 0, kind: input, shape index: {}]   ;;  %s1020_s1 = inlined_call_operand.vmem [shape: bf16[128,128], index: 1, kind: input, shape index: {}]   ;;  %s1021_s2 = inlined_call_operand.vmem [shape: f32[1,128], index: 2, kind: input, shape index: {}]   ;;  %s1022_s3 = inlined_call_operand.vmem [shape: bf16[512,128], index: 3, kind: output, shape index: {}]  }
   0x1 LB: > { %s611_s13 = sadd.s32 4294967295, %s876_s12   ;;  %p615_p0 = scmp.ge.s32.totalorder %s876_s12, 1  ;;  %s876_s12 = sphi %s898_s12, %s13_s12  }
   0x2   : > { %p138_p1 = scmp.lt.s32.totalorder %s876_s12, 3 }
   0x4   : > { %p139_p2 = pnand %p615_p0, %p138_p1 }
   0x5   : > { %s616_s22 = sshll.u32 (!%p139_p2), %s611_s13, 5 }
   0x6   : > { %142 = sbr.rel (%p139_p2) target bundleno = 240 (0xf0), region = 32  ;;  %p163_p3 = scmp.lt.s32.totalorder (!%p139_p2), %s616_s22, 63 }
   0xb   : > { %v741_v0 = vld [vmem:[%s1020_s1 + $0x38] sm:$0xff]  ;;  %v740_v1 = vld [vmem:[%s1020_s1 + $0x30] sm:$0xff]  ;;  %v739_v2 = vld [vmem:[%s1020_s1 + $0x28] sm:$0xff]  ;;  %s1024_s22 = smov (!%p163_p3, %s616_s22), 63 }
   0xc   : > { %370 = vmatpush.bf16.msra.mxu0 %v741_v0  ;;  %837 = vmatpush.bf16.msra.mxu1 %v741_v0  ;;  %v738_v3 = vld [vmem:[%s1020_s1 + $0x20] sm:$0xff]  ;;  %v737_v4 = vld [vmem:[%s1020_s1 + $0x18] sm:$0xff]  ;;  %v736_v5 = vld [vmem:[%s1020_s1 + $0x10] sm:$0xff]  ;;  %s617_s29 = sshll.u32 %s1024_s22, 2 }
   0xd   : > { %838 = vmatpush.bf16.msra.mxu2 %v741_v0  ;;  %839 = vmatpush.bf16.msra.mxu3 %v741_v0  ;;  %v735_v6 = vld [vmem:[%s1020_s1 + $0x8] sm:$0xff]  ;;  %v734_v7 = vld [vmem:[%s1020_s1] sm:$0xff]  ;;  %s938_s7 = scalar_lea.vmem %s1019_s0, %s617_s29  ;;  %s970_s13 = scalar_lea.vmem %s1022_s3, %s617_s29 }
   0xe   : > { %v718_v8 = vld [vmem:[%s938_s7] sm:$0xff]  ;;  %v719_v12 = vld [vmem:[%s938_s7 + $0x8] sm:$0xff]  ;;  %v720_v16 = vld [vmem:[%s938_s7 + $0x10] sm:$0xff] }
   0xf   : > { %v722_v9 = vld [vmem:[%s938_s7 + $0x20] sm:$0xff]  ;;  %v723_v13 = vld [vmem:[%s938_s7 + $0x28] sm:$0xff]  ;;  %v724_v17 = vld [vmem:[%s938_s7 + $0x30] sm:$0xff] }
  0x10   : > { %371 = vmatpush.bf16.msra.mxu0 %v740_v1  ;;  %840 = vmatpush.bf16.msra.mxu1 %v740_v1  ;;  %v726_v10 = vld [vmem:[%s938_s7 + $0x40] sm:$0xff]  ;;  %v727_v14 = vld [vmem:[%s938_s7 + $0x48] sm:$0xff]  ;;  %v728_v18 = vld [vmem:[%s938_s7 + $0x50] sm:$0xff] }
  0x11   : > { %841 = vmatpush.bf16.msra.mxu2 %v740_v1  ;;  %842 = vmatpush.bf16.msra.mxu3 %v740_v1  ;;  %v730_v11 = vld [vmem:[%s938_s7 + $0x60] sm:$0xff]  ;;  %v731_v15 = vld [vmem:[%s938_s7 + $0x68] sm:$0xff]  ;;  %v732_v19 = vld [vmem:[%s938_s7 + $0x70] sm:$0xff] }
  0x12   : > { %v721_v20 = vld [vmem:[%s938_s7 + $0x18] sm:$0xff]  ;;  %v959_v26 = vld [vmem:[%s1021_s2] ss:$0 sm:$0xff] }
  0x13   : > { %v725_v21 = vld [vmem:[%s938_s7 + $0x38] sm:$0xff] }
  0x14   : > { %372 = vmatpush.bf16.msra.mxu0 %v739_v2  ;;  %843 = vmatpush.bf16.msra.mxu1 %v739_v2  ;;  %v729_v22 = vld [vmem:[%s938_s7 + $0x58] sm:$0xff] }
  0x15   : > { %844 = vmatpush.bf16.msra.mxu2 %v739_v2  ;;  %845 = vmatpush.bf16.msra.mxu3 %v739_v2  ;;  %v733_v23 = vld [vmem:[%s938_s7 + $0x78] sm:$0xff] }
  0x18   : > { %373 = vmatpush.bf16.msra.mxu0 %v738_v3  ;;  %846 = vmatpush.bf16.msra.mxu1 %v738_v3 }
  0x19   : > { %847 = vmatpush.bf16.msra.mxu2 %v738_v3  ;;  %848 = vmatpush.bf16.msra.mxu3 %v738_v3 }
  0x1c   : > { %374 = vmatpush.bf16.msra.mxu0 %v737_v4  ;;  %849 = vmatpush.bf16.msra.mxu1 %v737_v4 }
  0x1d   : > { %850 = vmatpush.bf16.msra.mxu2 %v737_v4  ;;  %851 = vmatpush.bf16.msra.mxu3 %v737_v4 }
  0x20   : > { %375 = vmatpush.bf16.msra.mxu0 %v736_v5  ;;  %852 = vmatpush.bf16.msra.mxu1 %v736_v5 }
  0x21   : > { %853 = vmatpush.bf16.msra.mxu2 %v736_v5  ;;  %854 = vmatpush.bf16.msra.mxu3 %v736_v5 }
  0x24   : > { %376 = vmatpush.bf16.msra.mxu0 %v735_v6  ;;  %855 = vmatpush.bf16.msra.mxu1 %v735_v6 }
  0x25   : > { %856 = vmatpush.bf16.msra.mxu2 %v735_v6  ;;  %857 = vmatpush.bf16.msra.mxu3 %v735_v6 }
  0x28   : > { %377 = vmatpush.bf16.msra.mxu0 %v734_v7  ;;  %858 = vmatpush.bf16.msra.mxu1 %v734_v7 }
  0x29   : > { %859 = vmatpush.bf16.msra.mxu2 %v734_v7  ;;  %860 = vmatpush.bf16.msra.mxu3 %v734_v7 }
  0x2b   : > { %378 = vmatmul.bf16.vlgmr.msra.gmra.mxu0 %v718_v8  ;;  %398 = vmatmul.bf16.vlgmr.msra.gmra.mxu1 %v722_v9 }
  0x2c   : > { %418 = vmatmul.bf16.vlgmr.msra.gmra.mxu2 %v726_v10  ;;  %438 = vmatmul.bf16.vlgmr.msra.gmra.mxu3 %v730_v11 }
  0x3b   : > { %383 = vmatmul.bf16.gmra.mxu0 %v719_v12  ;;  %403 = vmatmul.bf16.gmra.mxu1 %v723_v13 }
  0x3c   : > { %423 = vmatmul.bf16.gmra.mxu2 %v727_v14  ;;  %443 = vmatmul.bf16.gmra.mxu3 %v731_v15 }
  0x4b   : > { %388 = vmatmul.bf16.gmra.mxu0 %v720_v16  ;;  %408 = vmatmul.bf16.gmra.mxu1 %v724_v17 }
  0x4c   : > { %428 = vmatmul.bf16.gmra.mxu2 %v728_v18  ;;  %448 = vmatmul.bf16.gmra.mxu3 %v732_v19 }
  0x5b   : > { %393 = vmatmul.bf16.gmra.mxu0 %v721_v20  ;;  %413 = vmatmul.bf16.gmra.mxu1 %v725_v21 }
  0x5c   : > { %433 = vmatmul.bf16.gmra.mxu2 %v729_v22  ;;  %453 = vmatmul.bf16.gmra.mxu3 %v733_v23 }
  0xa8   : > { %v379_v24 = vpop.f32.mrf.mxu0  ;;  %v399_v25 = vpop.f32.mrf.mxu1 }
  0xa9   : > { %v380_v27 = vadd.f32 %v959_v26, %v379_v24  ;;  %v400_v28 = vadd.f32 %v959_v26, %v399_v25 }
  0xab   : > { %v459_v35 = vmax.f32 %v380_v27, 0.0  ;;  %v467_v36 = vmax.f32 %v400_v28, 0.0 }
  0xaf   : > { %v419_v29 = vpop.f32.mrf.mxu2  ;;  %v439_v30 = vpop.f32.mrf.mxu3 }
  0xb0   : > { %v381_v31 = vpop.f32.mrf.mxu0  ;;  %v401_v32 = vpop.f32.mrf.mxu1  ;;  %v420_v41 = vadd.f32 %v959_v26, %v419_v29  ;;  %v440_v42 = vadd.f32 %v959_v26, %v439_v30 }
  0xb1   : > { %v382_v33 = vadd.f32 %v959_v26, %v381_v31  ;;  %v402_v34 = vadd.f32 %v959_v26, %v401_v32 }
  0xb2   : > { %v475_v49 = vmax.f32 %v420_v41, 0.0  ;;  %v483_v50 = vmax.f32 %v440_v42, 0.0 }
  0xb3   : > { %v460_v37 = vmax.f32 %v382_v33, 0.0  ;;  %v468_v38 = vmax.f32 %v402_v34, 0.0 }
  0xb5   : > { %v745_v39 = vpack.c.bf16 %v460_v37, %v459_v35  ;;  %v765_v40 = vpack.c.bf16 %v468_v38, %v467_v36 }
  0xb7   : > { %746 = vst [vmem:[%s970_s13] sm:$0xff] %v745_v39   ;;  %v421_v43 = vpop.f32.mrf.mxu2  ;;  %v441_v44 = vpop.f32.mrf.mxu3 }
  0xb8   : > { %825 = vst [vmem:[%s970_s13 + $0x20] sm:$0xff] %v765_v40   ;;  %v422_v45 = vadd.f32 %v959_v26, %v421_v43  ;;  %v442_v46 = vadd.f32 %v959_v26, %v441_v44  ;;  %v384_v47 = vpop.f32.mrf.mxu0  ;;  %v404_v48 = vpop.f32.mrf.mxu1 }
  0xb9   : > { %v385_v55 = vadd.f32 %v959_v26, %v384_v47  ;;  %v405_v56 = vadd.f32 %v959_v26, %v404_v48 }
  0xba   : > { %v476_v51 = vmax.f32 %v422_v45, 0.0  ;;  %v484_v52 = vmax.f32 %v442_v46, 0.0 }
  0xbb   : > { %v461_v63 = vmax.f32 %v385_v55, 0.0  ;;  %v469_v0 = vmax.f32 %v405_v56, 0.0 }
  0xbc   : > { %v785_v53 = vpack.c.bf16 %v476_v51, %v475_v49  ;;  %v805_v54 = vpack.c.bf16 %v484_v52, %v483_v50 }
  0xbe   : > { %829 = vst [vmem:[%s970_s13 + $0x40] sm:$0xff] %v785_v53  }
  0xbf   : > { %833 = vst [vmem:[%s970_s13 + $0x60] sm:$0xff] %v805_v54   ;;  %v424_v57 = vpop.f32.mrf.mxu2  ;;  %v444_v58 = vpop.f32.mrf.mxu3 }
  0xc0   : > { %v386_v59 = vpop.f32.mrf.mxu0  ;;  %v406_v60 = vpop.f32.mrf.mxu1  ;;  %v425_v5 = vadd.f32 %v959_v26, %v424_v57  ;;  %v445_v6 = vadd.f32 %v959_v26, %v444_v58 }
  0xc1   : > { %v387_v61 = vadd.f32 %v959_v26, %v386_v59  ;;  %v407_v62 = vadd.f32 %v959_v26, %v406_v60 }
  0xc2   : > { %v477_v13 = vmax.f32 %v425_v5, 0.0  ;;  %v485_v14 = vmax.f32 %v445_v6, 0.0 }
  0xc3   : > { %v462_v1 = vmax.f32 %v387_v61, 0.0  ;;  %v470_v2 = vmax.f32 %v407_v62, 0.0 }
  0xc5   : > { %v750_v3 = vpack.c.bf16 %v462_v1, %v461_v63  ;;  %v770_v4 = vpack.c.bf16 %v470_v2, %v469_v0 }
  0xc7   : > { %822 = vst [vmem:[%s970_s13 + $0x8] sm:$0xff] %v750_v3   ;;  %v426_v7 = vpop.f32.mrf.mxu2  ;;  %v446_v8 = vpop.f32.mrf.mxu3 }
  0xc8   : > { %826 = vst [vmem:[%s970_s13 + $0x28] sm:$0xff] %v770_v4   ;;  %v427_v9 = vadd.f32 %v959_v26, %v426_v7  ;;  %v447_v10 = vadd.f32 %v959_v26, %v446_v8  ;;  %v389_v11 = vpop.f32.mrf.mxu0  ;;  %v409_v12 = vpop.f32.mrf.mxu1 }
  0xc9   : > { %v390_v19 = vadd.f32 %v959_v26, %v389_v11  ;;  %v410_v20 = vadd.f32 %v959_v26, %v409_v12 }
  0xca   : > { %v478_v15 = vmax.f32 %v427_v9, 0.0  ;;  %v486_v16 = vmax.f32 %v447_v10, 0.0 }
  0xcb   : > { %v463_v28 = vmax.f32 %v390_v19, 0.0  ;;  %v471_v29 = vmax.f32 %v410_v20, 0.0 }
  0xcc   : > { %v790_v17 = vpack.c.bf16 %v478_v15, %v477_v13  ;;  %v810_v18 = vpack.c.bf16 %v486_v16, %v485_v14 }
  0xce   : > { %830 = vst [vmem:[%s970_s13 + $0x48] sm:$0xff] %v790_v17  }
  0xcf   : > { %834 = vst [vmem:[%s970_s13 + $0x68] sm:$0xff] %v810_v18   ;;  %v429_v21 = vpop.f32.mrf.mxu2  ;;  %v449_v22 = vpop.f32.mrf.mxu3 }
  0xd0   : > { %v391_v23 = vpop.f32.mrf.mxu0  ;;  %v411_v24 = vpop.f32.mrf.mxu1  ;;  %v430_v34 = vadd.f32 %v959_v26, %v429_v21  ;;  %v450_v35 = vadd.f32 %v959_v26, %v449_v22 }
  0xd1   : > { %v392_v25 = vadd.f32 %v959_v26, %v391_v23  ;;  %v412_v27 = vadd.f32 %v959_v26, %v411_v24 }
  0xd2   : > { %v479_v42 = vmax.f32 %v430_v34, 0.0  ;;  %v487_v43 = vmax.f32 %v450_v35, 0.0 }
  0xd3   : > { %v464_v30 = vmax.f32 %v392_v25, 0.0  ;;  %v472_v31 = vmax.f32 %v412_v27, 0.0 }
  0xd5   : > { %v755_v32 = vpack.c.bf16 %v464_v30, %v463_v28  ;;  %v775_v33 = vpack.c.bf16 %v472_v31, %v471_v29 }
  0xd7   : > { %823 = vst [vmem:[%s970_s13 + $0x10] sm:$0xff] %v755_v32   ;;  %v431_v36 = vpop.f32.mrf.mxu2  ;;  %v451_v37 = vpop.f32.mrf.mxu3 }
  0xd8   : > { %827 = vst [vmem:[%s970_s13 + $0x30] sm:$0xff] %v775_v33   ;;  %v432_v38 = vadd.f32 %v959_v26, %v431_v36  ;;  %v452_v39 = vadd.f32 %v959_v26, %v451_v37  ;;  %v394_v40 = vpop.f32.mrf.mxu0  ;;  %v414_v41 = vpop.f32.mrf.mxu1 }
  0xd9   : > { %v395_v48 = vadd.f32 %v959_v26, %v394_v40  ;;  %v415_v49 = vadd.f32 %v959_v26, %v414_v41 }
  0xda   : > { %v480_v44 = vmax.f32 %v432_v38, 0.0  ;;  %v488_v45 = vmax.f32 %v452_v39, 0.0 }
  0xdb   : > { %v465_v56 = vmax.f32 %v395_v48, 0.0  ;;  %v473_v57 = vmax.f32 %v415_v49, 0.0 }
  0xdc   : > { %v795_v46 = vpack.c.bf16 %v480_v44, %v479_v42  ;;  %v815_v47 = vpack.c.bf16 %v488_v45, %v487_v43 }
  0xde   : > { %831 = vst [vmem:[%s970_s13 + $0x50] sm:$0xff] %v795_v46  }
  0xdf   : > { %835 = vst [vmem:[%s970_s13 + $0x70] sm:$0xff] %v815_v47   ;;  %v434_v50 = vpop.f32.mrf.mxu2  ;;  %v454_v51 = vpop.f32.mrf.mxu3 }
  0xe0   : > { %v396_v52 = vpop.f32.mrf.mxu0  ;;  %v416_v53 = vpop.f32.mrf.mxu1  ;;  %v435_v62 = vadd.f32 %v959_v26, %v434_v50  ;;  %v455_v63 = vadd.f32 %v959_v26, %v454_v51 }
  0xe1   : > { %v397_v54 = vadd.f32 %v959_v26, %v396_v52  ;;  %v417_v55 = vadd.f32 %v959_v26, %v416_v53 }
  0xe2   : > { %v481_v4 = vmax.f32 %v435_v62, 0.0  ;;  %v489_v5 = vmax.f32 %v455_v63, 0.0 }
  0xe3   : > { %v466_v58 = vmax.f32 %v397_v54, 0.0  ;;  %v474_v59 = vmax.f32 %v417_v55, 0.0 }
  0xe5   : > { %v760_v60 = vpack.c.bf16 %v466_v58, %v465_v56  ;;  %v780_v61 = vpack.c.bf16 %v474_v59, %v473_v57 }
  0xe7   : > { %824 = vst [vmem:[%s970_s13 + $0x18] sm:$0xff] %v760_v60   ;;  %v436_v0 = vpop.f32.mrf.mxu2  ;;  %v456_v1 = vpop.f32.mrf.mxu3 }
  0xe8   : > { %828 = vst [vmem:[%s970_s13 + $0x38] sm:$0xff] %v780_v61   ;;  %v437_v2 = vadd.f32 %v959_v26, %v436_v0  ;;  %v457_v3 = vadd.f32 %v959_v26, %v456_v1 }
  0xea   : > { %v482_v6 = vmax.f32 %v437_v2, 0.0  ;;  %v490_v7 = vmax.f32 %v457_v3, 0.0 }
  0xec   : > { %v800_v8 = vpack.c.bf16 %v482_v6, %v481_v4  ;;  %v820_v9 = vpack.c.bf16 %v490_v7, %v489_v5 }
  0xee   : > { %832 = vst [vmem:[%s970_s13 + $0x58] sm:$0xff] %v800_v8  }
  0xef   : > { %836 = vst [vmem:[%s970_s13 + $0x78] sm:$0xff] %v820_v9  }
  0xf0 PF: > { %s13_s12 = sadd.s32 1, %s876_s12  }
  0xf1   : > { %p10_p4 = scmp.ge.s32.totalorder %s13_s12, 4  }
  0xf3   :  { %12 = sbr.rel (!%p10_p4) target bundleno = 1 (0x1), region = 62 }

// kernel: bottleneck_forward.7
= control target key start
LH: loop header
LB: loop body
LE: loop exit
PB: predicated region body
PF: predicated region fallthrough
CT: control target
= control target key end

     0   :  { %9 = vsyncpa [#allocation3], 0  ;;  %s843_s0 = inlined_call_operand.vmem [shape: bf16[128,128], index: 0, kind: input, shape index: {}]   ;;  %s844_s1 = inlined_call_operand.vmem [shape: bf16[128,128], index: 1, kind: input, shape index: {}]   ;;  %s845_s2 = inlined_call_operand.vmem [shape: f32[1,128], index: 2, kind: input, shape index: {}]   ;;  %s846_s3 = inlined_call_operand.vmem [shape: f32[128,128], index: 3, kind: input, shape index: {}]   ;;  %s847_s4 = inlined_call_operand.hbm [shape: f32[128,128], index: 4, kind: output, shape index: {}]  }
   0x1   :  { %11 = vsyncpa [#allocation3 + $0x1], 0  ;;  %s704_s15 = smov 0   ;;  %s706_s16 = smov 0  }
   0x2   :  { %s708_s17 = smov 0   ;;  %s710_s18 = smov 0  }
   0x3 LB: > { %s725_s19 = sadd.s32 4294967295, %s675_s18   ;;  %s472_s20 = sadd.s32 4294967294, %s675_s18   ;;  %s675_s18 = sphi %s710_s18, %s853_s18   ;;  %s671_s17 = sphi %s708_s17, %s852_s17   ;;  %s667_s16 = sphi %s706_s16, %s851_s16   ;;  %s663_s15 = sphi %s704_s15, %s850_s15  }
   0x4   : > { %s729_s21 = sadd.s32 1, %s675_s18   ;;  %s118_s22 = sadd.s32 1, %s671_s17 }
   0x5   : > { %s115_s23 = ssub.s32 %s675_s18, %s729_s21  ;;  %p128_p0 = scmp.ne.s32.totalorder %s671_s17, %s667_s16 }
   0x6   : > { %p116_p1 = scmp.eq.s32.totalorder %s115_s23, 0  ;;  %p129_p2 = scmp.eq.s32.totalorder %s725_s19, 1 }
   0x7   : > { %p134_p3 = scmp.ne.s32.totalorder %s667_s16, %s663_s15  ;;  %p135_p4 = scmp.eq.s32.totalorder %s472_s20, 1 }
   0x8   : > { %s740_s24 = scalar_select %p116_p1, %s671_s17, %s118_s22  }
   0x9   : > { %p742_p5 = por %p129_p2, %p128_p0  ;;  %p746_p6 = por %p135_p4, %p134_p3 }
   0xa   : > { %p475_p7 = scmp.ge.s32.totalorder %s675_s18, 1  ;;  %p177_p8 = scmp.lt.s32.totalorder %s675_s18, 3 }
   0xc   : > { %p178_p9 = pnand %p475_p7, %p177_p8 }
   0xd   : > { %s477_s9 = sshll.u32 (!%p178_p9), %s725_s19, 3  ;;  %s205_s12 = sand.u32 (!%p178_p9), 1, %s667_s16  }
   0xe   : > { %181 = sbr.rel (%p178_p9) target bundleno = 203 (0xcb), region = 36  ;;  %p209_p10 = scmp.lt.s32.totalorder (!%p178_p9), %s477_s9, 15 }
   0xf   : > { %s546_s14 = sshll.u32 (!%p178_p9), %s725_s19, 6  ;;  %s383_s28 = scalar_lea.sflag (!%p178_p9), [#allocation3], %s205_s12 }
  0x10   : > { %s394_s23 = scalar_lea.hbm (!%p178_p9), %s847_s4, %s546_s14  ;;  %s633_s7 = scalar_lea.hbm (!%p178_p9), %s847_s4, 128 }
  0x11   : > { %s397_s27 = sshll.u32 (!%p178_p9), %s394_s23, 4  ;;  %s398_s27 = int_to_ptr.hbm [resolvable:$true] %s397_s27 }
  0x12   : > { %s627_s29 = sshra.s32 (!%p178_p9), %s398_s27, 4  ;;  %s628_s29 = int_to_ptr.hbm [resolvable:$true] %s627_s29 }
  0x13   : > { %v545_v0 = vld [vmem:[%s844_s1 + $0x38] sm:$0xff]  ;;  %v544_v1 = vld [vmem:[%s844_s1 + $0x30] sm:$0xff]  ;;  %v543_v2 = vld [vmem:[%s844_s1 + $0x28] sm:$0xff]  ;;  %s855_s9 = smov (!%p209_p10, %s477_s9), 15  ;;  %p634_p0 = scmp.lt.s32.totalorder %s628_s29, %s847_s4 }
  0x14   : > { %321 = vmatpush.bf16.msra.mxu0 %v545_v0  ;;  %547 = vmatpush.bf16.msra.mxu1 %v545_v0  ;;  %v542_v3 = vld [vmem:[%s844_s1 + $0x20] sm:$0xff]  ;;  %v541_v4 = vld [vmem:[%s844_s1 + $0x18] sm:$0xff]  ;;  %v540_v5 = vld [vmem:[%s844_s1 + $0x10] sm:$0xff]  ;;  %s478_s22 = sshll.u32 %s855_s9, 2  ;;  %s480_s5 = sshll.u32 %s855_s9, 3 }
  0x15   : > { %548 = vmatpush.bf16.msra.mxu2 %v545_v0  ;;  %549 = vmatpush.bf16.msra.mxu3 %v545_v0  ;;  %v539_v6 = vld [vmem:[%s844_s1 + $0x8] sm:$0xff]  ;;  %v538_v7 = vld [vmem:[%s844_s1] sm:$0xff]  ;;  %s212_s30 = scalar_lea.vmem %s843_s0, %s478_s22  ;;  %s783_s8 = scalar_lea.vmem %s846_s3, %s480_s5 }
  0x16   : > { %v534_v8 = vld [vmem:[%s212_s30] sm:$0xff]  ;;  %v535_v9 = vld [vmem:[%s212_s30 + $0x8] sm:$0xff]  ;;  %v536_v10 = vld [vmem:[%s212_s30 + $0x10] sm:$0xff]  ;;  %s476_s9 = sshll.u32 %s205_s12, 6 }
  0x17   : > { %v537_v11 = vld [vmem:[%s212_s30 + $0x18] sm:$0xff]  ;;  %v612_v12 = vld [vmem:[%s845_s2] ss:$0 sm:$0xff]  ;;  %v352_v16 = vld [vmem:[%s783_s8 + $0x10] sm:$0xff]  ;;  %s793_s13 = scalar_lea.vmem [#allocation2], %s476_s9  ;;  %s629_s30 = scalar_lea.hbm %s628_s29, 64 }
  0x18   : > { %322 = vmatpush.bf16.msra.mxu0 %v544_v1  ;;  %550 = vmatpush.bf16.msra.mxu1 %v544_v1  ;;  %v350_v14 = vld [vmem:[%s783_s8] sm:$0xff]  ;;  %v356_v26 = vld [vmem:[%s783_s8 + $0x30] sm:$0xff]  ;;  %v351_v30 = vld [vmem:[%s783_s8 + $0x8] sm:$0xff]  ;;  %s395_s19 = sshll.u32 %s793_s13, 4  ;;  %p630_p11 = scmp.ne.s32.totalorder %s628_s29, %s629_s30  ;;  %s396_s19 = int_to_ptr.vmem [resolvable:$true] %s395_s19 }
  0x19   : > { %551 = vmatpush.bf16.msra.mxu2 %v544_v1  ;;  %552 = vmatpush.bf16.msra.mxu3 %v544_v1  ;;  %v354_v24 = vld [vmem:[%s783_s8 + $0x20] sm:$0xff]  ;;  %v353_v32 = vld [vmem:[%s783_s8 + $0x18] sm:$0xff]  ;;  %v355_v44 = vld [vmem:[%s783_s8 + $0x28] sm:$0xff]  ;;  %p635_p1 = scmp.lt.s32.totalorder %s633_s7, %s629_s30 }
  0x1a   : > { %v357_v46 = vld [vmem:[%s783_s8 + $0x38] sm:$0xff]  ;;  %p631_p12 = pnand %p630_p11, %p742_p5 }
  0x1b   : > { %p636_p2 = por %p635_p1, %p634_p0 }
  0x1c   : > { %323 = vmatpush.bf16.msra.mxu0 %v543_v2  ;;  %553 = vmatpush.bf16.msra.mxu1 %v543_v2  ;;  %p632_p13 = pneg %p631_p12 }
  0x1d   : > { %554 = vmatpush.bf16.msra.mxu2 %v543_v2  ;;  %555 = vmatpush.bf16.msra.mxu3 %v543_v2 }
  0x1e   : > { %p637_p3 = pnand %p636_p2, %p632_p13 }
  0x20   : > { %324 = vmatpush.bf16.msra.mxu0 %v542_v3  ;;  %556 = vmatpush.bf16.msra.mxu1 %v542_v3 }
  0x21   : > { %557 = vmatpush.bf16.msra.mxu2 %v542_v3  ;;  %558 = vmatpush.bf16.msra.mxu3 %v542_v3 }
  0x24   : > { %325 = vmatpush.bf16.msra.mxu0 %v541_v4  ;;  %559 = vmatpush.bf16.msra.mxu1 %v541_v4 }
  0x25   : > { %560 = vmatpush.bf16.msra.mxu2 %v541_v4  ;;  %561 = vmatpush.bf16.msra.mxu3 %v541_v4 }
  0x28   : > { %326 = vmatpush.bf16.msra.mxu0 %v540_v5  ;;  %562 = vmatpush.bf16.msra.mxu1 %v540_v5 }
  0x29   : > { %563 = vmatpush.bf16.msra.mxu2 %v540_v5  ;;  %564 = vmatpush.bf16.msra.mxu3 %v540_v5 }
  0x2c   : > { %327 = vmatpush.bf16.msra.mxu0 %v539_v6  ;;  %565 = vmatpush.bf16.msra.mxu1 %v539_v6 }
  0x2d   : > { %566 = vmatpush.bf16.msra.mxu2 %v539_v6  ;;  %567 = vmatpush.bf16.msra.mxu3 %v539_v6 }
  0x30   : > { %328 = vmatpush.bf16.msra.mxu0 %v538_v7  ;;  %568 = vmatpush.bf16.msra.mxu1 %v538_v7 }
  0x31   : > { %569 = vmatpush.bf16.msra.mxu2 %v538_v7  ;;  %570 = vmatpush.bf16.msra.mxu3 %v538_v7 }
  0x33   : > { %329 = vmatmul.bf16.vlgmr.msra.gmra.mxu0 %v534_v8  ;;  %334 = vmatmul.bf16.vlgmr.msra.gmra.mxu1 %v535_v9 }
  0x34   : > { %339 = vmatmul.bf16.vlgmr.msra.gmra.mxu2 %v536_v10  ;;  %344 = vmatmul.bf16.vlgmr.msra.gmra.mxu3 %v537_v11 }
  0xb0   : > { %v330_v13 = vpop.f32.mrf.mxu0  ;;  %v335_v15 = vpop.f32.mrf.mxu1 }
  0xb1   : > { %v331_v17 = vadd.f32 %v612_v12, %v330_v13  ;;  %v336_v18 = vadd.f32 %v612_v12, %v335_v15 }
  0xb3   : > { %v358_v19 = vadd.f32 %v350_v14, %v331_v17  ;;  %v360_v20 = vadd.f32 %v352_v16, %v336_v18 }
  0xb5   : > { %v366_v21 = vmax.f32 %v358_v19, 0.0  ;;  %v368_v22 = vmax.f32 %v360_v20, 0.0 }
  0xb7   : > { %374 = vst [vmem:[%s793_s13] sm:$0xff] %v366_v21  ;;  %v340_v23 = vpop.f32.mrf.mxu2  ;;  %v345_v25 = vpop.f32.mrf.mxu3 }
  0xb8   : > { %376 = vst [vmem:[%s793_s13 + $0x10] sm:$0xff] %v368_v22  ;;  %v341_v27 = vadd.f32 %v612_v12, %v340_v23  ;;  %v346_v28 = vadd.f32 %v612_v12, %v345_v25  ;;  %v332_v29 = vpop.f32.mrf.mxu0  ;;  %v337_v31 = vpop.f32.mrf.mxu1 }
  0xb9   : > { %v333_v33 = vadd.f32 %v612_v12, %v332_v29  ;;  %v338_v34 = vadd.f32 %v612_v12, %v337_v31 }
  0xba   : > { %v362_v35 = vadd.f32 %v354_v24, %v341_v27  ;;  %v364_v36 = vadd.f32 %v356_v26, %v346_v28 }
  0xbb   : > { %v359_v37 = vadd.f32 %v351_v30, %v333_v33  ;;  %v361_v38 = vadd.f32 %v353_v32, %v338_v34 }
  0xbc   : > { %v370_v39 = vmax.f32 %v362_v35, 0.0  ;;  %v372_v40 = vmax.f32 %v364_v36, 0.0 }
  0xbd   : > { %v367_v41 = vmax.f32 %v359_v37, 0.0  ;;  %v369_v42 = vmax.f32 %v361_v38, 0.0 }
  0xbe   : > { %378 = vst [vmem:[%s793_s13 + $0x20] sm:$0xff] %v370_v39 }
  0xbf   : > { %380 = vst [vmem:[%s793_s13 + $0x30] sm:$0xff] %v372_v40  ;;  %v342_v43 = vpop.f32.mrf.mxu2  ;;  %v347_v45 = vpop.f32.mrf.mxu3 }
  0xc0   : > { %375 = vst [vmem:[%s793_s13 + $0x8] sm:$0xff] %v367_v41  ;;  %v343_v47 = vadd.f32 %v612_v12, %v342_v43  ;;  %v348_v48 = vadd.f32 %v612_v12, %v347_v45 }
  0xc1   : > { %377 = vst [vmem:[%s793_s13 + $0x18] sm:$0xff] %v369_v42 }
  0xc2   : > { %v363_v49 = vadd.f32 %v355_v44, %v343_v47  ;;  %v365_v50 = vadd.f32 %v357_v46, %v348_v48 }
  0xc4   : > { %v371_v51 = vmax.f32 %v363_v49, 0.0  ;;  %v373_v52 = vmax.f32 %v365_v50, 0.0 }
  0xc6   : > { %379 = vst [vmem:[%s793_s13 + $0x28] sm:$0xff] %v371_v51 }
  0xc7   : > { %381 = vst [vmem:[%s793_s13 + $0x38] sm:$0xff] %v373_v52 }
  0xc8   : > { %640 = shalt.err (!%p637_p3)
}
  0xc9   : > { %s677_s11 = smov 128   ;;  %s678_s12 = smov 8  }
  0xca   : > { %571 = dma.vmem_to_hbm [thread:$0]  (%p742_p5), %s396_s19, 1024, %s398_s27, %s383_s28, %s677_s11, %s677_s11, %s678_s12  }
  0xcb PF: > { %p577_p4 = scmp.ge.s32.totalorder %s675_s18, 2  ;;  %s412_s9 = sand.u32 1, %s663_s15  }
  0xcc   : > { %s413_s13 = scalar_lea.sflag [#allocation3], %s412_s9 }
  0xcd   : > { %p574_p7 = pnand %p577_p4, %p746_p6 }
  0xcf   : > { %p575_p8 = pneg %p574_p7 }
  0xd1   : > { %658 = dma.done.wait (%p575_p8), %s413_s13, 1024  }
  0xd2   : > { %660 = vsyncadd (%p575_p8), %s413_s13, 4294966272  ;;  %p14_p9 = scmp.ge.s32.totalorder %s729_s21, 4   ;;  %s850_s15 = smov %s667_s16 }
  0xd3   : > { %s851_s16 = smov %s671_s17  ;;  %s852_s17 = smov %s740_s24 }
  0xd4   : > { %s853_s18 = smov %s729_s21  ;;  %16 = sbr.rel (!%p14_p9) target bundleno = 3 (0x3), region = 74 }
  0xd9   :  { %419 = vsyncpa [#allocation3], 1 }
  0xda   :  { %421 = vsyncpa [#allocation3 + $0x1], 1 }

// kernel: bottleneck_forward.5
= control target key start
LH: loop header
LB: loop body
LE: loop exit
PB: predicated region body
PF: predicated region fallthrough
CT: control target
= control target key end

     0   :  { %s4106_s12 = smov 0   ;;  %s4108_s13 = smov 0   ;;  %s5851_s0 = inlined_call_operand.vmem [shape: bf16[2,336,128], index: 0, kind: input, shape index: {}]   ;;  %s5852_s1 = inlined_call_operand.vmem [shape: bf16[9,128,128], index: 1, kind: input, shape index: {}]   ;;  %s5853_s2 = inlined_call_operand.vmem [shape: f32[1,128], index: 2, kind: input, shape index: {}]   ;;  %s5854_s3 = inlined_call_operand.vmem [shape: bf16[2,256,128], index: 3, kind: output, shape index: {}]  }
   0x1   :  { %s4110_s14 = smov 0   ;;  %s4112_s15 = smov 0  }
   0x2   :  { %s4114_s16 = smov 0  }
   0x3 LB: > { %s22_s17 = sadd.s32 1, %s4075_s14  ;;  %s25_s18 = sadd.s32 1, %s4079_s15  ;;  %s4083_s16 = sphi %s4114_s16, %s13_s16   ;;  %s4079_s15 = sphi %s4112_s15, %s6139_s15   ;;  %s4075_s14 = sphi %s4110_s14, %s6138_s14   ;;  %s4071_s13 = sphi %s4108_s13, %s6137_s13   ;;  %s4067_s12 = sphi %s4106_s12, %s6136_s12  }
   0x4   : > { %p23_p0 = scmp.ge.s32.totalorder %s22_s17, 2  ;;  %p3365_p1 = scmp.ge.s32.totalorder %s4083_s16, 1 }
   0x5   : > { %p151_p2 = scmp.lt.s32.totalorder %s4083_s16, 5 }
   0x6   : > { %s6141_s17 = smov (%p23_p0, %s22_s17), 0  ;;  %s6143_s18 = smov (!%p23_p0, %s25_s18), %s4079_s15 }
   0x7   : > { %p152_p3 = pnand %p3365_p1, %p151_p2  ;;  %p27_p4 = scmp.ge.s32.totalorder %s6143_s18, 2 }
   0x9   : > { %s6145_s18 = smov (%p27_p4, %s6143_s18), 0  ;;  %155 = sbr.rel (%p152_p3) target bundleno = 554 (0x22a), region = 32 }
   0xe   : > { %v3855_v0 = vld [vmem:[%s5852_s1 + $0x78] sm:$0xff]  ;;  %s3370_s21 = sshll.u32 %s4067_s12, 7  ;;  %v224_v1 = vlaneseq  ;;  %v3854_v3 = vld [vmem:[%s5852_s1 + $0x70] sm:$0xff]  ;;  %v3853_v9 = vld [vmem:[%s5852_s1 + $0x68] sm:$0xff]  ;;  %p179_p5 = scmp.lt.s32.totalorder %s4071_s13, 1  ;;  %v4085_v52 = vmov 0  }
   0xf   : > { %v4146_v2 = vstv %s3370_s21  ;;  %3959 = vmatpush.bf16.msra.mxu1 %v3855_v0  ;;  %3960 = vmatpush.bf16.msra.mxu2 %v3855_v0  ;;  %v3852_v19 = vld [vmem:[%s5852_s1 + $0x60] sm:$0xff]  ;;  %v3851_v32 = vld [vmem:[%s5852_s1 + $0x58] sm:$0xff]  ;;  %v3850_v43 = vld [vmem:[%s5852_s1 + $0x50] sm:$0xff]  ;;  %s4203_s6 = sshra.s32 %s3370_s21, 3  ;;  %v4228_v53 = vunpack.c.l.b16 %v4085_v52  ;;  %v4234_v55 = vunpack.c.h.b16 %v4085_v52 }
  0x10   : > { %v4151_v4 = vshrl.u32 %v224_v1, 7  ;;  %3961 = vmatpush.bf16.msra.mxu3 %v3855_v0  ;;  %973 = vmatpush.bf16.msra.mxu0 %v3855_v0  ;;  %s6147_s13 = smov (!%p179_p5, %s4071_s13), 1  ;;  %v3849_v51 = vld [vmem:[%s5852_s1 + $0x48] sm:$0xff]  ;;  %s3371_s19 = sshll.u32 %s4203_s6, 2  ;;  %v3848_v62 = vld [vmem:[%s5852_s1 + $0x40] sm:$0xff] }
  0x11   : > { %s3983_s5 = smul.u32 168, %s6147_s13 }
  0x12   : > { %v226_v5 = vadd.s32 8, %v4151_v4  ;;  %v227_v6 = vadd.s32 16, %v4151_v4  ;;  %v242_v7 = vadd.s32 %v4146_v2, %v4151_v4  ;;  %v228_v8 = vadd.s32 24, %v4151_v4 }
  0x13   : > { %3962 = vmatpush.bf16.msra.mxu1 %v3854_v3  ;;  %3963 = vmatpush.bf16.msra.mxu2 %v3854_v3  ;;  %v229_v14 = vadd.s32 32, %v4151_v4  ;;  %v230_v31 = vadd.s32 40, %v4151_v4  ;;  %s183_s11 = scalar_lea.vmem %s5851_s0, %s3983_s5 }
  0x14   : > { %v243_v10 = vadd.s32 %v4146_v2, %v226_v5  ;;  %v244_v11 = vadd.s32 %v4146_v2, %v227_v6  ;;  %vm258_vm0 = vcmp.lt.s32.totalorder %v242_v7, 0  ;;  %v259_v12 = vsub.s32 0, %v242_v7  ;;  %3964 = vmatpush.bf16.msra.mxu3 %v3854_v3  ;;  %974 = vmatpush.bf16.msra.mxu0 %v3854_v3  ;;  %s4238_s20 = scalar_lea.vmem %s183_s11, %s3371_s19  ;;  %v3863_v6 = vld [vmem:[%s5852_s1 + $0xb8] sm:$0xff]  ;;  %s3368_s19 = sshll.u32 %s6147_s13, 5 }
  0x15   : > { %v245_v13 = vadd.s32 %v4146_v2, %v228_v8  ;;  %v4173_v25 = vadd.s32 %v4146_v2, %v229_v14  ;;  %v4211_v49 = vadd.s32 %v4146_v2, %v230_v31  ;;  %v4274_v14 = vld [vmem:[%s4238_s20 + $0x28] sm:$0xff]  ;;  %v3871_v31 = vld [vmem:[%s5852_s1 + $0xf8] sm:$0xff] }
  0x16   : > { %v260_v15 = vsel %vm258_vm0, %v259_v12, %v242_v7  ;;  %vm265_vm1 = vcmp.lt.s32.totalorder %v243_v10, 0  ;;  %v266_v16 = vsub.s32 0, %v243_v10  ;;  %vm272_vm2 = vcmp.lt.s32.totalorder %v244_v11, 0  ;;  %v3847_v7 = vld [vmem:[%s5852_s1 + $0x38] sm:$0xff] }
  0x17   : > { %v262_v17 = vand.u32 15, %v260_v15  ;;  %v273_v18 = vsub.s32 0, %v244_v11  ;;  %vm279_vm3 = vcmp.lt.s32.totalorder %v245_v13, 0  ;;  %3965 = vmatpush.bf16.msra.mxu1 %v3853_v9  ;;  %3966 = vmatpush.bf16.msra.mxu2 %v3853_v9  ;;  %v280_v21 = vsub.s32 0, %v245_v13 }
  0x18   : > { %v267_v20 = vsel %vm265_vm1, %v266_v16, %v243_v10  ;;  %3967 = vmatpush.bf16.msra.mxu3 %v3853_v9  ;;  %975 = vmatpush.bf16.msra.mxu0 %v3853_v9  ;;  %vm286_vm7 = vcmp.lt.s32.totalorder %v4173_v25, 0  ;;  %v287_v38 = vsub.s32 0, %v4173_v25 }
  0x19   : > { %v263_v22 = vsub.s32 0, %v262_v17  ;;  %v269_v23 = vand.u32 15, %v267_v20  ;;  %v274_v24 = vsel %vm272_vm2, %v273_v18, %v244_v11  ;;  %v281_v27 = vsel %vm279_vm3, %v280_v21, %v245_v13  ;;  %v4271_v13 = vld [vmem:[%s4238_s20 + $0x18] sm:$0xff]  ;;  %v202_v20 = vld [vmem:[%s4238_s20 + $0x4] sm:$0xf] }
  0x1a   : > { %v276_v26 = vand.u32 15, %v274_v24  ;;  %v283_v30 = vand.u32 15, %v281_v27  ;;  %v4216_v50 = vsel %vm286_vm7, %v287_v38, %v4173_v25  ;;  %v3830_v27 = vld [vmem:[%s4238_s20 + $0x8] sm:$0xff]  ;;  %v3862_v38 = vld [vmem:[%s5852_s1 + $0xb0] sm:$0xff] }
  0x1b   : > { %v264_v28 = vsel %vm258_vm0, %v263_v22, %v262_v17  ;;  %v270_v29 = vsub.s32 0, %v269_v23  ;;  %3968 = vmatpush.bf16.msra.mxu1 %v3852_v19  ;;  %3969 = vmatpush.bf16.msra.mxu2 %v3852_v19 }
  0x1c   : > { %v277_v33 = vsub.s32 0, %v276_v26  ;;  %vm370_vm4 = vcmp.ne.s32.totalorder %v264_v28, 0  ;;  %vm386_vm5 = vcmp.lt.s32.totalorder %v264_v28, 0  ;;  %v418_v34 = vadd.s32 16, %v264_v28  ;;  %3970 = vmatpush.bf16.msra.mxu3 %v3852_v19  ;;  %976 = vmatpush.bf16.msra.mxu0 %v3852_v19 }
  0x1d   : > { %v271_v35 = vsel %vm265_vm1, %v270_v29, %v269_v23  ;;  %v284_v36 = vsub.s32 0, %v283_v30  ;;  %vm4187_vm6 = vmand %vm386_vm5, %vm370_vm4  ;;  %v5933_v19 = vmov 0 }
  0x1e   : > { %v278_v39 = vsel %vm272_vm2, %v277_v33, %v276_v26  ;;  %vm371_vm8 = vcmp.ne.s32.totalorder %v271_v35, 0  ;;  %vm387_vm9 = vcmp.lt.s32.totalorder %v271_v35, 0  ;;  %v419_v40 = vadd.s32 16, %v271_v35  ;;  %v3836_v26 = vld [vmem:[%s4238_s20 + $0x38] sm:$0xff] }
  0x1f   : > { %v285_v41 = vsel %vm279_vm3, %v284_v36, %v283_v30  ;;  %vm372_vm10 = vcmp.ne.s32.totalorder %v278_v39, 0  ;;  %vm388_vm11 = vcmp.lt.s32.totalorder %v278_v39, 0  ;;  %v420_v42 = vadd.s32 16, %v278_v39  ;;  %3971 = vmatpush.bf16.msra.mxu1 %v3851_v32  ;;  %3972 = vmatpush.bf16.msra.mxu2 %v3851_v32  ;;  %vm403_vm14 = vmand %vm387_vm9, %vm371_vm8 }
  0x20   : > { %vm373_vm12 = vcmp.ne.s32.totalorder %v285_v41, 0  ;;  %vm389_vm13 = vcmp.lt.s32.totalorder %v285_v41, 0  ;;  %v421_v44 = vadd.s32 16, %v285_v41  ;;  %v434_v45 = vsel %vm4187_vm6, %v418_v34, %v264_v28  ;;  %3973 = vmatpush.bf16.msra.mxu3 %v3851_v32  ;;  %977 = vmatpush.bf16.msra.mxu0 %v3851_v32  ;;  %vm404_vm15 = vmand %vm388_vm11, %vm372_vm10  ;;  %v3879_v32 = vld [vmem:[%s5852_s1 + $0x138] sm:$0xff] }
  0x21   : > { %v435_v46 = vsel %vm403_vm14, %v419_v40, %v271_v35  ;;  %vm450_vm0 = vcmp.ne.s32.totalorder %v434_v45, 0  ;;  %vm405_vm1 = vmand %vm389_vm13, %vm373_vm12  ;;  %v4206_v47 = vsel %vm404_vm15, %v420_v42, %v278_v39  ;;  %vm546_vm3 = vsmask.f32 3328  ;;  %v3846_v39 = vld [vmem:[%s5852_s1 + $0x30] sm:$0xff] }
  0x22   : > { %vm451_vm2 = vcmp.ne.s32.totalorder %v435_v46, 0  ;;  %v4208_v48 = vsel %vm405_vm1, %v421_v44, %v285_v41  ;;  %vm452_vm4 = vcmp.ne.s32.totalorder %v4206_v47, 0  ;;  %vm514_vm6 = vmpackc.low %vm450_vm0, %vm450_vm0  ;;  %vm547_vm8 = vsmask.f32 7440 }
  0x23   : > { %3974 = vmatpush.bf16.msra.mxu1 %v3850_v43  ;;  %3975 = vmatpush.bf16.msra.mxu2 %v3850_v43  ;;  %vm453_vm5 = vcmp.ne.s32.totalorder %v4208_v48, 0  ;;  %vm515_vm9 = vmpackc.low %vm451_vm2, %vm451_vm2  ;;  %v530_v54 = vsel %vm514_vm6, 65537, %v4085_v52  ;;  %vm466_vm10 = vcmp.ne.s32.totalorder %v434_v45, 15  ;;  %vm467_vm11 = vcmp.ne.s32.totalorder %v435_v46, 15 }
  0x24   : > { %3976 = vmatpush.bf16.msra.mxu3 %v3850_v43  ;;  %978 = vmatpush.bf16.msra.mxu0 %v3850_v43  ;;  %vm516_vm12 = vmpackc.low %vm452_vm4, %vm452_vm4  ;;  %v531_v56 = vsel %vm515_vm9, 65537, %v4085_v52  ;;  %v550_v57 = vshll.u32 %v530_v54, 16  ;;  %v553_v58 = vshrl.u32 %v530_v54, 16  ;;  %vm468_vm13 = vcmp.ne.s32.totalorder %v4206_v47, 15  ;;  %v4348_v47 = vld [vmem:[%s4238_s20 + $0x8] sm:$0xf] }
  0x25   : > { %vm517_vm14 = vmpackc.low %vm453_vm5, %vm453_vm5  ;;  %v532_v59 = vsel %vm516_vm12, 65537, %v4085_v52  ;;  %v559_v60 = vshll.u32 %v531_v56, 16  ;;  %v563_v61 = vshrl.u32 %v531_v56, 16  ;;  %vm469_vm15 = vcmp.ne.s32.totalorder %v4208_v48, 15 }
  0x26   : > { %v4249_v63 = vsel %vm517_vm14, 65537, %v4085_v52  ;;  %vm4253_vm0 = vmor %vm546_vm3, %vm547_vm8  ;;  %v552_v1 = vrot.slane %v550_v57, 5  ;;  %v555_v3 = vrot.slane %v553_v58, 4  ;;  %v569_v5 = vshll.u32 %v532_v59, 16  ;;  %v3870_v57 = vld [vmem:[%s5852_s1 + $0xf0] sm:$0xff] }
  0x27   : > { %3977 = vmatpush.bf16.msra.mxu1 %v3849_v51  ;;  %3978 = vmatpush.bf16.msra.mxu2 %v3849_v51  ;;  %v561_v8 = vrot.slane %v559_v60, 5  ;;  %v565_v9 = vrot.slane %v563_v61, 4  ;;  %v573_v10 = vshrl.u32 %v532_v59, 16  ;;  %v579_v11 = vshll.u32 %v4249_v63, 16  ;;  %vm4266_vm1 = vmpackc.low %vm466_vm10, %vm466_vm10  ;;  %v3878_v58 = vld [vmem:[%s5852_s1 + $0x130] sm:$0xff] }
  0x28   : > { %3979 = vmatpush.bf16.msra.mxu3 %v3849_v51  ;;  %979 = vmatpush.bf16.msra.mxu0 %v3849_v51  ;;  %v556_v15 = vor.u32 %v555_v3, %v552_v1  ;;  %v571_v16 = vrot.slane %v569_v5, 5  ;;  %v708_v17 = vunpack.c.l.b16 %v552_v1  ;;  %v709_v18 = vunpack.c.h.b16 %v552_v1  ;;  %vm4278_vm2 = vmpackc.low %vm467_vm11, %vm467_vm11  ;;  %v4358_v59 = vld [vmem:[%s4238_s20 + $0xc] sm:$0xf] }
  0x29   : > { %v566_v21 = vor.u32 %v565_v9, %v561_v8  ;;  %v575_v22 = vrot.slane %v573_v10, 4  ;;  %v4283_v23 = vrot.slane %v579_v11, 5  ;;  %vm4288_vm3 = vmpackc.low %vm468_vm13, %vm468_vm13  ;;  %vm1315_vm4 = vsmask.f32 256  ;;  %v3845_v1 = vld [vmem:[%s5852_s1 + $0x28] sm:$0xff] }
  0x2a   : > { %v557_v28 = vrot.slane %v556_v15, 4  ;;  %vm712_vm5 = vcmp.ne.s32.totalorder %v708_v17, %v4228_v53  ;;  %vm713_vm6 = vcmp.ne.s32.totalorder %v709_v18, %v4234_v55  ;;  %vm4299_vm8 = vmpackc.low %vm469_vm15, %vm469_vm15  ;;  %v4306_v30 = vsel %vm4266_vm1, 65537, %v4085_v52  ;;  %v3869_v17 = vld [vmem:[%s5852_s1 + $0xe8] sm:$0xff] }
  0x2b   : > { %3980 = vmatpush.bf16.msra.mxu1 %v3848_v62  ;;  %3981 = vmatpush.bf16.msra.mxu2 %v3848_v62  ;;  %v567_v33 = vrot.slane %v566_v21, 4  ;;  %v576_v34 = vor.u32 %v575_v22, %v571_v16  ;;  %vm4314_vm9 = vmpackc.low %vm713_vm6, %vm712_vm5  ;;  %v5927_v35 = vmov 0  ;;  %v4321_v36 = vsel %vm4278_vm2, 65537, %v4085_v52  ;;  %v3877_v18 = vld [vmem:[%s5852_s1 + $0x128] sm:$0xff] }
  0x2c   : > { %3982 = vmatpush.bf16.msra.mxu3 %v3848_v62  ;;  %980 = vmatpush.bf16.msra.mxu0 %v3848_v62  ;;  %v5928_v35 = vsel %vm4314_vm9, 4294967295, %v5927_v35  ;;  %v4326_v37 = vsel %vm4288_vm3, 65537, %v4085_v52  ;;  %v562_v40 = vsel %vm4253_vm0, %v557_v28, %v561_v8  ;;  %v827_v41 = vsel %vm4314_vm9, %v202_v20, 0  ;;  %v3861_v62 = vld [vmem:[%s5852_s1 + $0xa8] sm:$0xff] }
  0x2d   : > { %v4341_v42 = vsel %vm4299_vm8, 65537, %v4085_v52  ;;  %vm1316_vm10 = vsmask.f32 4368  ;;  %v572_v43 = vsel %vm4253_vm0, %v567_v33, %v571_v16  ;;  %v577_v44 = vrot.slane %v576_v34, 4 }
  0x2e   : > { %991 = vmatmul.bf16.vlgmr.msra.gmra.mxu1 %v4271_v13  ;;  %1001 = vmatmul.bf16.vlgmr.msra.gmra.mxu2 %v4274_v14  ;;  %v715_v45 = vunpack.c.l.b16 %v562_v40  ;;  %v716_v46 = vunpack.c.h.b16 %v562_v40  ;;  %v722_v48 = vunpack.c.l.b16 %v572_v43  ;;  %v723_v51 = vunpack.c.h.b16 %v572_v43  ;;  %vm4416_vm8 = vmor %vm1315_vm4, %vm1316_vm10 }
  0x2f   : > { %1782 = vmatpush.bf16.msrb.mxu2 %v3863_v6  ;;  %1202 = vmatpush.bf16.msrb.mxu1 %v3847_v7  ;;  %v1039_v54 = vunpack.c.l.b16 %v827_v41  ;;  %v1319_v56 = vshrl.u32 %v4306_v30, 16  ;;  %v582_v60 = vsel %vm4253_vm0, %v577_v44, %v4283_v23  ;;  %v1322_v61 = vshll.u32 %v4306_v30, 16  ;;  %v4379_v7 = vld [vmem:[%s4238_s20 + $0x10] sm:$0xf]  ;;  %v3868_v44 = vld [vmem:[%s5852_s1 + $0xe0] sm:$0xff] }
  0x30   : > { %1011 = vmatmul.bf16.vlgmr.msra.gmra.mxu3 %v3836_v26  ;;  %981 = vmatmul.bf16.vlgmr.msra.gmra.mxu0 %v3830_v27  ;;  %vm719_vm11 = vcmp.ne.s32.totalorder %v715_v45, %v4228_v53  ;;  %vm720_vm12 = vcmp.ne.s32.totalorder %v716_v46, %v4234_v55  ;;  %v5929_v3 = vmov 0  ;;  %vm726_vm14 = vcmp.ne.s32.totalorder %v722_v48, %v4228_v53  ;;  %v3860_v26 = vld [vmem:[%s5852_s1 + $0xa0] sm:$0xff] }
  0x31   : > { %2060 = vmatpush.bf16.msrb.mxu3 %v3871_v31  ;;  %2196 = vmatpush.bf16.msrb.mxu0 %v3879_v32  ;;  %vm4372_vm13 = vmpackc.low %vm720_vm12, %vm719_vm11  ;;  %vm727_vm15 = vcmp.ne.s32.totalorder %v723_v51, %v4234_v55  ;;  %v729_v5 = vunpack.c.l.b16 %v582_v60  ;;  %v730_v6 = vunpack.c.h.b16 %v582_v60  ;;  %v5931_v8 = vmov 0  ;;  %v3844_v27 = vld [vmem:[%s5852_s1 + $0x20] sm:$0xff]  ;;  %v3859_v51 = vld [vmem:[%s5852_s1 + $0x98] sm:$0xff] }
  0x32   : > { %v5930_v3 = vsel %vm4372_vm13, 4294967295, %v5929_v3  ;;  %vm4381_vm1 = vmpackc.low %vm727_vm15, %vm726_vm14  ;;  %v828_v9 = vsel %vm4372_vm13, %v4348_v47, 0  ;;  %v1321_v10 = vrot.slane %v1319_v56, 7  ;;  %v1327_v11 = vshrl.u32 %v4321_v36, 16 }
  0x33   : > { %1783 = vmatpush.bf16.msrb.mxu2 %v3862_v38  ;;  %1203 = vmatpush.bf16.msrb.mxu1 %v3846_v39  ;;  %v5932_v8 = vsel %vm4381_vm1, 4294967295, %v5931_v8  ;;  %v1330_v12 = vshll.u32 %v4321_v36, 16  ;;  %vm733_vm2 = vcmp.ne.s32.totalorder %v729_v5, %v4228_v53  ;;  %vm734_vm3 = vcmp.ne.s32.totalorder %v730_v6, %v4234_v55 }
  0x34   : > { %v829_v15 = vsel %vm4381_vm1, %v4358_v59, 0  ;;  %v1040_v16 = vunpack.c.l.b16 %v828_v9  ;;  %vm4401_vm5 = vmpackc.low %vm734_vm3, %vm733_vm2  ;;  %v1324_v21 = vor.u32 %v1322_v61, %v1321_v10  ;;  %v1325_v22 = vrot.slane %v1321_v10, 4  ;;  %v4441_v61 = vld [vmem:[%s4238_s20 + $0x20] sm:$0xff] }
  0x35   : > { %2061 = vmatpush.bf16.msrb.mxu3 %v3870_v57  ;;  %2197 = vmatpush.bf16.msrb.mxu0 %v3878_v58  ;;  %v5934_v19 = vsel %vm4401_vm5, 4294967295, %v5933_v19  ;;  %v1041_v20 = vunpack.c.l.b16 %v829_v15  ;;  %v1329_v24 = vrot.slane %v1327_v11, 7  ;;  %v830_v28 = vsel %vm4401_vm5, %v4379_v7, 0  ;;  %v3837_v10 = vld [vmem:[%s4238_s20 + $0x40] sm:$0xff]  ;;  %v4449_v11 = vld [vmem:[%s4238_s20 + $0x10] sm:$0xff] }
  0x36   : > { %v1056_v29 = vpack.c.b16 %v1040_v16, %v1039_v54  ;;  %vm5857_vm6 = vsmask.f32 4352  ;;  %v1336_v31 = vshrl.u32 %v4326_v37, 16  ;;  %v1339_v32 = vshll.u32 %v4326_v37, 16  ;;  %v3876_v37 = vld [vmem:[%s5852_s1 + $0x120] sm:$0xff]  ;;  %v3843_v54 = vld [vmem:[%s5852_s1 + $0x18] sm:$0xff] }
  0x37   : > { %1784 = vmatpush.bf16.msrb.mxu2 %v3861_v62  ;;  %1204 = vmatpush.bf16.msrb.mxu1 %v3845_v1  ;;  %v1042_v33 = vunpack.c.l.b16 %v830_v28  ;;  %v1332_v34 = vor.u32 %v1330_v12, %v1329_v24  ;;  %v1334_v36 = vrot.slane %v1329_v24, 4  ;;  %v1345_v38 = vshrl.u32 %v4341_v42, 16  ;;  %v4444_v62 = vld [vmem:[%s4238_s20 + $0x30] sm:$0xff] }
  0x38   : > { %v1067_v39 = vshrl.u32 %v1056_v29, 16  ;;  %v1070_v40 = vshll.u32 %v1056_v29, 16  ;;  %v1338_v41 = vrot.slane %v1336_v31, 7  ;;  %v1348_v43 = vshll.u32 %v4341_v42, 16  ;;  %v3858_v24 = vld [vmem:[%s5852_s1 + $0x90] sm:$0xff] }
  0x39   : > { %2062 = vmatpush.bf16.msrb.mxu3 %v3869_v17  ;;  %2198 = vmatpush.bf16.msrb.mxu0 %v3877_v18  ;;  %v1057_v45 = vpack.c.b16 %v1042_v33, %v1041_v20  ;;  %v1333_v46 = vsel %vm4416_vm8, %v1325_v22, %v1332_v34  ;;  %v4432_v48 = vrot.slane %v1345_v38, 7  ;;  %v1461_v42 = vunpack.c.l.b16 %v1324_v21  ;;  %v3867_v17 = vld [vmem:[%s5852_s1 + $0xd8] sm:$0xff]  ;;  %v4483_v34 = vld [vmem:[%s4238_s20 + $0x14] sm:$0xf] }
  0x3a   : > { %v1069_v56 = vrot.slane %v1067_v39, 3  ;;  %v1072_v57 = vrot.slane %v1070_v40, 4  ;;  %v1341_v58 = vor.u32 %v1339_v32, %v1338_v41  ;;  %v1343_v60 = vrot.slane %v1338_v41, 4  ;;  %v3875_v18 = vld [vmem:[%s5852_s1 + $0x118] sm:$0xff] }
  0x3b   : > { %1785 = vmatpush.bf16.msrb.mxu2 %v3860_v26  ;;  %1205 = vmatpush.bf16.msrb.mxu1 %v3844_v27  ;;  %v1075_v1 = vshrl.u32 %v1057_v45, 16  ;;  %v1078_v5 = vshll.u32 %v1057_v45, 16  ;;  %v1350_v6 = vor.u32 %v1348_v43, %v4432_v48  ;;  %v1462_v9 = vunpack.c.h.b16 %v1324_v21  ;;  %v3842_v26 = vld [vmem:[%s5852_s1 + $0x10] sm:$0xff]  ;;  %v4501_v43 = vld [vmem:[%s4238_s20 + $0x18] sm:$0xf] }
  0x3c   : > { %v1073_v12 = vor.u32 %v1072_v57, %v1069_v56  ;;  %v1342_v15 = vsel %vm4416_vm8, %v1334_v36, %v1341_v58  ;;  %vm1465_vm4 = vcmp.ne.s32.totalorder %v1461_v42, %v4228_v53  ;;  %v1468_v16 = vunpack.c.l.b16 %v1333_v46  ;;  %v3857_v42 = vld [vmem:[%s5852_s1 + $0x88] sm:$0xff]  ;;  %v3895_v40 = vld [vmem:[%s5852_s1 + $0x1b8] sm:$0xff] }
  0x3d   : > { %2063 = vmatpush.bf16.msrb.mxu3 %v3868_v44  ;;  %2199 = vmatpush.bf16.msrb.mxu0 %v3876_v37  ;;  %v1077_v20 = vrot.slane %v1075_v1, 3  ;;  %v1080_v21 = vrot.slane %v1078_v5, 4  ;;  %v1351_v22 = vsel %vm4416_vm8, %v1343_v60, %v1350_v6  ;;  %vm1466_vm10 = vcmp.ne.s32.totalorder %v1462_v9, %v4234_v55  ;;  %v3874_v37 = vld [vmem:[%s5852_s1 + $0x110] sm:$0xff]  ;;  %v3887_v41 = vld [vmem:[%s5852_s1 + $0x178] sm:$0xff] }
  0x3e   : > { %vm4469_vm11 = vmpackc.low %vm1466_vm10, %vm1465_vm4  ;;  %v1469_v28 = vunpack.c.h.b16 %v1333_v46  ;;  %vm4474_vm12 = vcmp.ne.s32.totalorder %v1468_v16, %v4228_v53  ;;  %v1475_v31 = vunpack.c.l.b16 %v1342_v15  ;;  %v1476_v32 = vunpack.c.h.b16 %v1342_v15  ;;  %996 = vmatmul.bf16.gmra.mxu1 %v4441_v61  ;;  %1006 = vmatmul.bf16.gmra.mxu2 %v4444_v62 }
  0x3f   : > { %1786 = vmatpush.bf16.msrb.mxu2 %v3859_v51  ;;  %1206 = vmatpush.bf16.msrb.mxu1 %v3843_v54  ;;  %v4480_v33 = vor.u32 %v1080_v21, %v1077_v20  ;;  %v1482_v36 = vunpack.c.l.b16 %v1351_v22  ;;  %v1483_v38 = vunpack.c.h.b16 %v1351_v22  ;;  %v1580_v39 = vsel %vm4469_vm11, %v4348_v47, 0  ;;  %v3866_v47 = vld [vmem:[%s5852_s1 + $0xd0] sm:$0xff]  ;;  %v3841_v51 = vld [vmem:[%s5852_s1 + $0x8] sm:$0xff] }
  0x40   : > { %1016 = vmatmul.bf16.gmra.mxu3 %v3837_v10  ;;  %986 = vmatmul.bf16.gmra.mxu0 %v4449_v11  ;;  %vm1473_vm14 = vcmp.ne.s32.totalorder %v1469_v28, %v4234_v55  ;;  %vm4491_vm15 = vcmp.ne.s32.totalorder %v1475_v31, %v4228_v53  ;;  %vm4496_vm2 = vcmp.ne.s32.totalorder %v1476_v32, %v4234_v55  ;;  %v290_v44 = vand.u32 15, %v4216_v50 }
  0x41   : > { %2064 = vmatpush.bf16.msrb.mxu3 %v3867_v17  ;;  %2200 = vmatpush.bf16.msrb.mxu0 %v3875_v18  ;;  %v4512_v45 = vsel %vm5857_vm6, %v1073_v12, %v4480_v33  ;;  %vm4516_vm3 = vmpackc.low %vm1473_vm14, %vm4474_vm12  ;;  %vm1486_vm4 = vcmp.ne.s32.totalorder %v1482_v36, %v4228_v53  ;;  %vm1487_vm10 = vcmp.ne.s32.totalorder %v1483_v38, %v4234_v55  ;;  %v1631_v50 = vunpack.c.l.b16 %v1580_v39  ;;  %v3865_v17 = vld [vmem:[%s5852_s1 + $0xc8] sm:$0xff] }
  0x42   : > { %vm4532_vm12 = vmpackc.low %vm4496_vm2, %vm4491_vm15  ;;  %v1581_v56 = vsel %vm4516_vm3, %v4358_v59, 0  ;;  %vm5855_vm14 = vsmask.f32 7424  ;;  %v1847_v57 = vsel %vm4314_vm9, %v4358_v59, 0  ;;  %v1848_v58 = vsel %vm4372_vm13, %v4379_v7, 0 }
  0x43   : > { %1787 = vmatpush.bf16.msrb.mxu2 %v3858_v24  ;;  %1207 = vmatpush.bf16.msrb.mxu1 %v3842_v26  ;;  %v1849_v60 = vsel %vm4381_vm1, %v4483_v34, 0  ;;  %vm4548_vm15 = vmpackc.low %vm1487_vm10, %vm1486_vm4  ;;  %v5949_v1 = vmov 0  ;;  %v1582_v5 = vsel %vm4532_vm12, %v4379_v7, 0  ;;  %v1632_v6 = vunpack.c.l.b16 %v1581_v56  ;;  %v3873_v7 = vld [vmem:[%s5852_s1 + $0x108] sm:$0xff]  ;;  %v3856_v24 = vld [vmem:[%s5852_s1 + $0x80] sm:$0xff] }
  0x44   : > { %v5950_v1 = vsel %vm4548_vm15, 4294967295, %v5949_v1  ;;  %v1850_v59 = vsel %vm4401_vm5, %v4501_v43, 0  ;;  %v1898_v9 = vunpack.c.l.b16 %v1847_v57  ;;  %v1583_v10 = vsel %vm4548_vm15, %v4483_v34, 0  ;;  %v3840_v26 = vld [vmem:[%s5852_s1] sm:$0xff] }
  0x45   : > { %v1633_v12 = vunpack.c.l.b16 %v1582_v5  ;;  %v1899_v15 = vunpack.c.l.b16 %v1848_v58  ;;  %v1900_v16 = vunpack.c.l.b16 %v1849_v60  ;;  %2065 = vmatpush.bf16.msrb.mxu3 %v3866_v47  ;;  %2201 = vmatpush.bf16.msrb.mxu0 %v3874_v37  ;;  %v1634_v18 = vunpack.c.l.b16 %v1583_v10  ;;  %v3903_v5 = vld [vmem:[%s5852_s1 + $0x1f8] sm:$0xff] }
  0x46   : > { %v1648_v20 = vpack.c.b16 %v1632_v6, %v1631_v50  ;;  %v1901_v21 = vunpack.c.l.b16 %v1850_v59  ;;  %v291_v22 = vsub.s32 0, %v290_v44  ;;  %vm293_vm2 = vcmp.lt.s32.totalorder %v4211_v49, 0  ;;  %v3911_v6 = vld [vmem:[%s5852_s1 + $0x238] sm:$0xff] }
  0x47   : > { %1788 = vmatpush.bf16.msrb.mxu2 %v3857_v42  ;;  %1208 = vmatpush.bf16.msrb.mxu1 %v3841_v51  ;;  %v1915_v28 = vpack.c.b16 %v1899_v15, %v1898_v9  ;;  %v294_v29 = vsub.s32 0, %v4211_v49  ;;  %v583_v31 = vshrl.u32 %v4249_v63, 16  ;;  %v4576_v32 = vpack.c.b16 %v1634_v18, %v1633_v12  ;;  %v3864_v42 = vld [vmem:[%s5852_s1 + $0xc0] sm:$0xff] }
  0x48   : > { %v1659_v36 = vshrl.u32 %v1648_v20, 16  ;;  %v1661_v38 = vshll.u32 %v1648_v20, 16  ;;  %v1916_v39 = vpack.c.b16 %v1901_v21, %v1900_v16  ;;  %v292_v50 = vsel %vm286_vm7, %v291_v22, %v290_v44  ;;  %v3872_v51 = vld [vmem:[%s5852_s1 + $0x100] sm:$0xff]  ;;  %v3894_v22 = vld [vmem:[%s5852_s1 + $0x1b0] sm:$0xff] }
  0x49   : > { %v1925_v47 = vshrl.u32 %v1915_v28, 16  ;;  %v1928_v37 = vshll.u32 %v1915_v28, 16  ;;  %v295_v63 = vsel %vm293_vm2, %v294_v29, %v4211_v49  ;;  %2066 = vmatpush.bf16.msrb.mxu3 %v3865_v17  ;;  %2202 = vmatpush.bf16.msrb.mxu0 %v3873_v7  ;;  %v1666_v57 = vshll.u32 %v4576_v32, 16  ;;  %v3902_v29 = vld [vmem:[%s5852_s1 + $0x1f0] sm:$0xff] }
  0x4a   : > { %v1663_v56 = vrot.slane %v1661_v38, 1  ;;  %v1933_v58 = vshrl.u32 %v1916_v39, 16  ;;  %v1936_v25 = vshll.u32 %v1916_v39, 16  ;;  %v297_v59 = vand.u32 15, %v295_v63 }
  0x4b   : > { %1789 = vmatpush.bf16.msrb.mxu2 %v3856_v24  ;;  %1209 = vmatpush.bf16.msrb.mxu1 %v3840_v26  ;;  %v1927_v44 = vrot.slane %v1925_v47, 3  ;;  %v1930_v60 = vrot.slane %v1928_v37, 4  ;;  %vm374_vm7 = vcmp.ne.s32.totalorder %v292_v50, 0  ;;  %v1668_v10 = vrot.slane %v1666_v57, 1 }
  0x4c   : > { %v1664_v9 = vor.u32 %v1663_v56, %v1659_v36  ;;  %v1935_v12 = vrot.slane %v1933_v58, 3  ;;  %v1938_v15 = vrot.slane %v1936_v25, 4  ;;  %v298_v17 = vsub.s32 0, %v297_v59  ;;  %v3910_v36 = vld [vmem:[%s5852_s1 + $0x230] sm:$0xff] }
  0x4d   : > { %v1931_v16 = vor.u32 %v1930_v60, %v1927_v44  ;;  %vm390_vm4 = vcmp.lt.s32.totalorder %v292_v50, 0  ;;  %v422_v7 = vadd.s32 16, %v292_v50  ;;  %2067 = vmatpush.bf16.msrb.mxu3 %v3864_v42  ;;  %2203 = vmatpush.bf16.msrb.mxu0 %v3872_v51  ;;  %v585_v21 = vrot.slane %v583_v31, 4  ;;  %v3886_v31 = vld [vmem:[%s5852_s1 + $0x170] sm:$0xff] }
  0x4e   : > { %v1669_v18 = vsel %vm5855_vm14, %v1664_v9, %v1668_v10  ;;  %v4603_v20 = vor.u32 %v1938_v15, %v1935_v12  ;;  %vm406_vm10 = vmand %vm390_vm4, %vm374_vm7  ;;  %v299_v24 = vsel %vm293_vm2, %v298_v17, %v297_v59  ;;  %v1670_v28 = vshrl.u32 %v4576_v32, 16  ;;  %1210 = vmatmul.bf16.vlgmr.msrb.gmra.mxu1 %v4512_v45 }
  0x4f   : > { %2740 = vmatpush.bf16.msra.mxu2 %v3895_v40  ;;  %2462 = vmatpush.bf16.msra.mxu1 %v3887_v41  ;;  %v438_v26 = vsel %vm406_vm10, %v422_v7, %v292_v50  ;;  %v231_v38 = vadd.s32 48, %v4151_v4  ;;  %vm375_vm2 = vcmp.ne.s32.totalorder %v299_v24, 0  ;;  %vm391_vm7 = vcmp.lt.s32.totalorder %v299_v24, 0 }
  0x50   : > { %1790 = vmatmul.bf16.vlgmr.msrb.gmra.mxu2 %v1669_v18  ;;  %v1940_v49 = vsel %vm5857_vm6, %v1931_v16, %v4603_v20  ;;  %v423_v32 = vadd.s32 16, %v299_v24  ;;  %2204 = vmatmul.bf16.vlgmr.msrb.gmra.mxu0 %v4449_v11  ;;  %vm407_vm4 = vmand %vm391_vm7, %vm375_vm2  ;;  %vm454_vm10 = vcmp.ne.s32.totalorder %v438_v26, 0  ;;  %v586_v39 = vor.u32 %v585_v21, %v4283_v23 }
  0x51   : > { %2876 = vmatpush.bf16.msra.mxu3 %v3903_v5  ;;  %3142 = vmatpush.bf16.msra.mxu0 %v3911_v6  ;;  %vm470_vm14 = vcmp.ne.s32.totalorder %v438_v26, 15  ;;  %v1352_v40 = vrot.slane %v4432_v48, 4  ;;  %vm518_vm5 = vmpackc.low %vm454_vm10, %vm454_vm10  ;;  %v4628_v45 = vor.u32 %v1670_v28, %v1668_v10  ;;  %v232_v47 = vadd.s32 56, %v4151_v4 }
  0x52   : > { %2068 = vmatmul.bf16.vlgmr.msrb.gmra.mxu3 %v1940_v49  ;;  %v439_v41 = vsel %vm407_vm4, %v423_v32, %v299_v24  ;;  %v4632_v37 = vadd.s32 %v4146_v2, %v231_v38  ;;  %v534_v11 = vsel %vm518_vm5, 65537, %v4085_v52  ;;  %v587_v50 = vrot.slane %v586_v39, 4  ;;  %vm1287_vm7 = vmpackc.low %vm470_vm14, %vm470_vm14 }
  0x53   : > { %2741 = vmatpush.bf16.msra.mxu2 %v3894_v22  ;;  %2463 = vmatpush.bf16.msra.mxu1 %v3886_v31  ;;  %vm455_vm6 = vcmp.ne.s32.totalorder %v439_v41, 0  ;;  %vm471_vm2 = vcmp.ne.s32.totalorder %v439_v41, 15  ;;  %v589_v23 = vshll.u32 %v534_v11, 16  ;;  %v593_v48 = vshrl.u32 %v534_v11, 16  ;;  %v4653_v22 = vld [vmem:[%s4238_s20 + $0x1c] sm:$0xf] }
  0x54   : > { %vm519_vm15 = vmpackc.low %vm455_vm6, %vm455_vm6  ;;  %v1303_v63 = vsel %vm1287_vm7, 65537, %v4085_v52  ;;  %v4637_v42 = vadd.s32 %v4146_v2, %v232_v47  ;;  %vm300_vm5 = vcmp.lt.s32.totalorder %v4632_v37, 0  ;;  %v301_v59 = vsub.s32 0, %v4632_v37 }
  0x55   : > { %2877 = vmatpush.bf16.msra.mxu3 %v3902_v29  ;;  %3143 = vmatpush.bf16.msra.mxu0 %v3910_v36  ;;  %v4640_v51 = vsel %vm519_vm15, 65537, %v4085_v52  ;;  %vm1288_vm4 = vmpackc.low %vm471_vm2, %vm471_vm2  ;;  %v1354_v56 = vshrl.u32 %v1303_v63, 16  ;;  %v1357_v57 = vshll.u32 %v1303_v63, 16  ;;  %v591_v58 = vrot.slane %v589_v23, 5 }
  0x56   : > { %v595_v25 = vrot.slane %v593_v48, 4  ;;  %v599_v44 = vshll.u32 %v4640_v51, 16  ;;  %v603_v60 = vshrl.u32 %v4640_v51, 16  ;;  %v1304_v5 = vsel %vm1288_vm4, 65537, %v4085_v52  ;;  %v3901_v51 = vld [vmem:[%s5852_s1 + $0x1e8] sm:$0xff] }
  0x57   : > { %v1356_v6 = vrot.slane %v1354_v56, 7  ;;  %v592_v9 = vsel %vm4253_vm0, %v587_v50, %v591_v58  ;;  %v1363_v15 = vshrl.u32 %v1304_v5, 16  ;;  %v1366_v26 = vshll.u32 %v1304_v5, 16  ;;  %v4689_v56 = vld [vmem:[%s4238_s20 + $0x20] sm:$0xf] }
  0x58   : > { %v596_v10 = vor.u32 %v595_v25, %v591_v58  ;;  %v4650_v12 = vrot.slane %v599_v44, 5  ;;  %v736_v16 = vunpack.c.l.b16 %v592_v9  ;;  %v737_v17 = vunpack.c.h.b16 %v592_v9 }
  0x59   : > { %v1359_v7 = vor.u32 %v1357_v57, %v1356_v6  ;;  %v1361_v18 = vrot.slane %v1356_v6, 4  ;;  %v4655_v24 = vrot.slane %v1363_v15, 7  ;;  %v302_v28 = vsel %vm300_vm5, %v301_v59, %v4632_v37  ;;  %2878 = vmatpush.bf16.msra.mxu3 %v3901_v51  ;;  %v4776_v51 = vld [vmem:[%s4238_s20 + $0x24] sm:$0xf] }
  0x5a   : > { %v597_v21 = vrot.slane %v596_v10, 4  ;;  %vm740_vm14 = vcmp.ne.s32.totalorder %v736_v16, %v4228_v53  ;;  %vm741_vm15 = vcmp.ne.s32.totalorder %v737_v17, %v4234_v55  ;;  %v304_v31 = vand.u32 15, %v302_v28 }
  0x5b   : > { %v1360_v29 = vsel %vm4416_vm8, %v1352_v40, %v1359_v7  ;;  %vm4667_vm10 = vmpackc.low %vm741_vm15, %vm740_vm14  ;;  %v5951_v38 = vmov 0  ;;  %v1368_v49 = vor.u32 %v1366_v26, %v4655_v24  ;;  %v5953_v48 = vmov 0 }
  0x5c   : > { %v602_v36 = vsel %vm4253_vm0, %v597_v21, %v4650_v12  ;;  %v5952_v38 = vsel %vm4667_vm10, 4294967295, %v5951_v38  ;;  %v1489_v32 = vunpack.c.l.b16 %v1360_v29  ;;  %v1490_v39 = vunpack.c.h.b16 %v1360_v29 }
  0x5d   : > { %v743_v41 = vunpack.c.l.b16 %v602_v36  ;;  %v744_v47 = vunpack.c.h.b16 %v602_v36  ;;  %v831_v40 = vsel %vm4667_vm10, %v4483_v34, 0  ;;  %v1851_v11 = vsel %vm4667_vm10, %v4653_v22, 0 }
  0x5e   : > { %v1043_v50 = vunpack.c.l.b16 %v831_v40  ;;  %v1369_v23 = vsel %vm4416_vm8, %v1361_v18, %v1368_v49  ;;  %vm1493_vm2 = vcmp.ne.s32.totalorder %v1489_v32, %v4228_v53  ;;  %vm1494_vm7 = vcmp.ne.s32.totalorder %v1490_v39, %v4234_v55 }
  0x5f   : > { %vm747_vm4 = vcmp.ne.s32.totalorder %v743_v41, %v4228_v53  ;;  %vm748_vm14 = vcmp.ne.s32.totalorder %v744_v47, %v4234_v55  ;;  %vm4684_vm15 = vmpackc.low %vm1494_vm7, %vm1493_vm2  ;;  %v1496_v34 = vunpack.c.l.b16 %v1369_v23  ;;  %v1497_v63 = vunpack.c.h.b16 %v1369_v23 }
  0x60   : > { %v5954_v48 = vsel %vm4684_vm15, 4294967295, %v5953_v48  ;;  %vm4691_vm6 = vmpackc.low %vm748_vm14, %vm747_vm4  ;;  %v5955_v57 = vmov 0  ;;  %v1584_v58 = vsel %vm4684_vm15, %v4501_v43, 0  ;;  %v1902_v25 = vunpack.c.l.b16 %v1851_v11  ;;  %2209 = vmatmul.bf16.gmra.mxu0 %v4271_v13  ;;  %v3893_v11 = vld [vmem:[%s5852_s1 + $0x1a8] sm:$0xff] }
  0x61   : > { %v5956_v57 = vsel %vm4691_vm6, 4294967295, %v5955_v57  ;;  %v305_v44 = vsub.s32 0, %v304_v31  ;;  %v308_v5 = vsub.s32 0, %v4637_v42  ;;  %v832_v6 = vsel %vm4691_vm6, %v4501_v43, 0  ;;  %2742 = vmatpush.bf16.msra.mxu2 %v3893_v11 }
  0x62   : > { %vm1500_vm2 = vcmp.ne.s32.totalorder %v1496_v34, %v4228_v53  ;;  %vm1501_vm7 = vcmp.ne.s32.totalorder %v1497_v63, %v4234_v55  ;;  %v1635_v59 = vunpack.c.l.b16 %v1584_v58  ;;  %v1044_v9 = vunpack.c.l.b16 %v832_v6 }
  0x63   : > { %vm4705_vm4 = vmpackc.low %vm1501_vm7, %vm1500_vm2  ;;  %v5957_v10 = vmov 0  ;;  %v1852_v15 = vsel %vm4691_vm6, %v4689_v56, 0  ;;  %v306_v16 = vsel %vm300_vm5, %v305_v44, %v304_v31  ;;  %vm5959_vm14 = vcmp.lt.s32.totalorder %v4637_v42, 0 }
  0x64   : > { %v5958_v10 = vsel %vm4705_vm4, 4294967295, %v5957_v10  ;;  %v309_v43 = vsel %vm5959_vm14, %v308_v5, %v4637_v42  ;;  %v1585_v13 = vsel %vm4705_vm4, %v4653_v22, 0  ;;  %v1903_v17 = vunpack.c.l.b16 %v1852_v15  ;;  %vm5960_vm5 = vmmov %vm5959_vm14  ;;  %v3909_v42 = vld [vmem:[%s5852_s1 + $0x228] sm:$0xff] }
  0x65   : > { %v311_v7 = vand.u32 15, %v309_v43  ;;  %vm376_vm2 = vcmp.ne.s32.totalorder %v306_v16, 0  ;;  %v1058_v18 = vpack.c.b16 %v1044_v9, %v1043_v50  ;;  %v1636_v21 = vunpack.c.l.b16 %v1585_v13  ;;  %3144 = vmatpush.bf16.msra.mxu0 %v3909_v42 }
  0x66   : > { %vm392_vm7 = vcmp.lt.s32.totalorder %v306_v16, 0  ;;  %v424_v26 = vadd.s32 16, %v306_v16  ;;  %v1917_v28 = vpack.c.b16 %v1903_v17, %v1902_v25  ;;  %v605_v37 = vrot.slane %v603_v60, 4  ;;  %v3885_v60 = vld [vmem:[%s5852_s1 + $0x168] sm:$0xff] }
  0x67   : > { %v312_v29 = vsub.s32 0, %v311_v7  ;;  %vm408_vm6 = vmand %vm392_vm7, %vm376_vm2  ;;  %v4723_v31 = vadd.s32 64, %v4151_v4  ;;  %v1084_v36 = vshrl.u32 %v1058_v18, 16  ;;  %v1087_v49 = vshll.u32 %v1058_v18, 16  ;;  %2464 = vmatpush.bf16.msra.mxu1 %v3885_v60 }
  0x68   : > { %v4725_v32 = vpack.c.b16 %v1636_v21, %v1635_v59  ;;  %v440_v39 = vsel %vm408_vm6, %v424_v26, %v306_v16  ;;  %v1942_v41 = vshrl.u32 %v1917_v28, 16  ;;  %v1945_v47 = vshll.u32 %v1917_v28, 16 }
  0x69   : > { %v313_v40 = vsel %vm5960_vm5, %v312_v29, %v311_v7  ;;  %vm456_vm14 = vcmp.ne.s32.totalorder %v440_v39, 0  ;;  %v1086_v50 = vrot.slane %v1084_v36, 3  ;;  %v1089_v23 = vrot.slane %v1087_v49, 4 }
  0x6a   : > { %v1674_v34 = vshll.u32 %v4725_v32, 16  ;;  %vm377_vm6 = vcmp.ne.s32.totalorder %v313_v40, 0  ;;  %vm520_vm2 = vmpackc.low %vm456_vm14, %vm456_vm14  ;;  %v1944_v63 = vrot.slane %v1942_v41, 3  ;;  %v1947_v58 = vrot.slane %v1945_v47, 4 }
  0x6b   : > { %vm393_vm7 = vcmp.lt.s32.totalorder %v313_v40, 0  ;;  %v425_v25 = vadd.s32 16, %v313_v40  ;;  %v4742_v44 = vor.u32 %v1089_v23, %v1086_v50  ;;  %v536_v6 = vsel %vm520_vm2, 65537, %v4085_v52 }
  0x6c   : > { %v4744_v5 = vrot.slane %v1674_v34, 1  ;;  %vm409_vm5 = vmand %vm393_vm7, %vm377_vm6  ;;  %v606_v59 = vor.u32 %v605_v37, %v4650_v12  ;;  %v4748_v9 = vor.u32 %v1947_v58, %v1944_v63  ;;  %v609_v16 = vshll.u32 %v536_v6, 16 }
  0x6d   : > { %v441_v15 = vsel %vm409_vm5, %v425_v25, %v313_v40  ;;  %v613_v43 = vshrl.u32 %v536_v6, 16  ;;  %vm5961_vm14 = vsmask.f32 4352  ;;  %vm5962_vm10 = vsmask.f32 7424 }
  0x6e   : > { %v1091_v13 = vsel %vm5961_vm14, %v4480_v33, %v4742_v44  ;;  %v1677_v17 = vsel %vm5962_vm10, %v4628_v45, %v4744_v5  ;;  %vm457_vm6 = vcmp.ne.s32.totalorder %v441_v15, 0  ;;  %v607_v7 = vrot.slane %v606_v59, 4  ;;  %vm5963_vm2 = vmmov %vm5961_vm14 }
  0x6f   : > { %1215 = vmatmul.bf16.gmra.mxu1 %v1091_v13  ;;  %1795 = vmatmul.bf16.gmra.mxu2 %v1677_v17  ;;  %v1949_v12 = vsel %vm5963_vm2, %v4603_v20, %v4748_v9  ;;  %vm521_vm7 = vmpackc.low %vm457_vm6, %vm457_vm6  ;;  %v611_v18 = vrot.slane %v609_v16, 5  ;;  %v615_v21 = vrot.slane %v613_v43, 4  ;;  %vm472_vm5 = vcmp.ne.s32.totalorder %v440_v39, 15  ;;  %v4800_v17 = vld [vmem:[%s4238_s20 + $0x28] sm:$0xf] }
  0x70   : > { %2073 = vmatmul.bf16.gmra.mxu3 %v1949_v12  ;;  %v4760_v26 = vsel %vm521_vm7, 65537, %v4085_v52  ;;  %vm473_vm14 = vcmp.ne.s32.totalorder %v441_v15, 15  ;;  %vm1289_vm4 = vmpackc.low %vm472_vm5, %vm472_vm5  ;;  %v1370_v33 = vrot.slane %v4655_v24, 4  ;;  %v1678_v45 = vshrl.u32 %v4725_v32, 16  ;;  %2214 = vmatmul.bf16.gmra.mxu0 %v4441_v61  ;;  %v3900_v32 = vld [vmem:[%s5852_s1 + $0x1e0] sm:$0xff] }
  0x71   : > { %v612_v28 = vsel %vm4253_vm0, %v607_v7, %v611_v18  ;;  %v616_v29 = vor.u32 %v615_v21, %v611_v18  ;;  %v619_v20 = vshll.u32 %v4760_v26, 16  ;;  %vm1290_vm10 = vmpackc.low %vm473_vm14, %vm473_vm14  ;;  %v234_v37 = vadd.s32 72, %v4151_v4  ;;  %2879 = vmatpush.bf16.msra.mxu3 %v3900_v32 }
  0x72   : > { %v750_v36 = vunpack.c.l.b16 %v612_v28  ;;  %v751_v49 = vunpack.c.h.b16 %v612_v28  ;;  %v1305_v39 = vsel %vm1289_vm4, 65537, %v4085_v52  ;;  %v1306_v41 = vsel %vm1290_vm10, 65537, %v4085_v52 }
  0x73   : > { %v617_v47 = vrot.slane %v616_v29, 4  ;;  %v4770_v24 = vrot.slane %v619_v20, 5  ;;  %v1372_v40 = vshrl.u32 %v1305_v39, 16  ;;  %v1375_v11 = vshll.u32 %v1305_v39, 16 }
  0x74   : > { %vm754_vm6 = vcmp.ne.s32.totalorder %v750_v36, %v4228_v53  ;;  %vm755_vm2 = vcmp.ne.s32.totalorder %v751_v49, %v4234_v55  ;;  %v1381_v60 = vshrl.u32 %v1306_v41, 16  ;;  %v1384_v50 = vshll.u32 %v1306_v41, 16 }
  0x75   : > { %v622_v23 = vsel %vm4253_vm0, %v617_v47, %v4770_v24  ;;  %v623_v34 = vshrl.u32 %v4760_v26, 16  ;;  %vm4782_vm4 = vmpackc.low %vm755_vm2, %vm754_vm6  ;;  %v5964_v42 = vmov 0  ;;  %v1374_v61 = vrot.slane %v1372_v40, 7 }
  0x76   : > { %v5965_v42 = vsel %vm4782_vm4, 4294967295, %v5964_v42  ;;  %v250_v63 = vadd.s32 %v4146_v2, %v4723_v31  ;;  %v757_v58 = vunpack.c.l.b16 %v622_v23  ;;  %v758_v25 = vunpack.c.h.b16 %v622_v23 }
  0x77   : > { %v833_v6 = vsel %vm4782_vm4, %v4653_v22, 0  ;;  %v4791_v59 = vrot.slane %v1381_v60, 7  ;;  %v1377_v16 = vor.u32 %v1375_v11, %v1374_v61  ;;  %v1379_v43 = vrot.slane %v1374_v61, 4 }
  0x78   : > { %v1045_v15 = vunpack.c.l.b16 %v833_v6  ;;  %v1853_v13 = vsel %vm4782_vm4, %v4776_v51, 0  ;;  %vm761_vm7 = vcmp.ne.s32.totalorder %v757_v58, %v4228_v53  ;;  %vm762_vm5 = vcmp.ne.s32.totalorder %v758_v25, %v4234_v55 }
  0x79   : > { %v1386_v31 = vor.u32 %v1384_v50, %v4791_v59  ;;  %v1904_v7 = vunpack.c.l.b16 %v1853_v13  ;;  %vm4802_vm14 = vmpackc.low %vm762_vm5, %vm761_vm7  ;;  %v5966_v22 = vmov 0  ;;  %v1378_v12 = vsel %vm4416_vm8, %v1370_v33, %v1377_v16 }
  0x7a   : > { %v5967_v22 = vsel %vm4802_vm14, 4294967295, %v5966_v22  ;;  %v4809_v18 = vadd.s32 %v4146_v2, %v234_v37  ;;  %vm5867_vm10 = vcmp.lt.s32.totalorder %v250_v63, 0  ;;  %v315_v21 = vsub.s32 0, %v250_v63 }
  0x7b   : > { %v834_v26 = vsel %vm4802_vm14, %v4689_v56, 0  ;;  %v1387_v28 = vsel %vm4416_vm8, %v1379_v43, %v1386_v31  ;;  %v1503_v29 = vunpack.c.l.b16 %v1378_v12  ;;  %v1504_v20 = vunpack.c.h.b16 %v1378_v12 }
  0x7c   : > { %v1046_v36 = vunpack.c.l.b16 %v834_v26  ;;  %v1510_v49 = vunpack.c.l.b16 %v1387_v28  ;;  %v1511_v39 = vunpack.c.h.b16 %v1387_v28  ;;  %v1854_v33 = vsel %vm4802_vm14, %v4800_v17, 0 }
  0x7d   : > { %vm1507_vm6 = vcmp.ne.s32.totalorder %v1503_v29, %v4228_v53  ;;  %vm1508_vm2 = vcmp.ne.s32.totalorder %v1504_v20, %v4234_v55  ;;  %v1905_v37 = vunpack.c.l.b16 %v1854_v33  ;;  %v316_v41 = vsel %vm5867_vm10, %v315_v21, %v250_v63 }
  0x7e   : > { %v1059_v47 = vpack.c.b16 %v1046_v36, %v1045_v15  ;;  %vm4822_vm7 = vmpackc.low %vm1508_vm2, %vm1507_vm6  ;;  %v5968_v40 = vmov 0  ;;  %vm1514_vm5 = vcmp.ne.s32.totalorder %v1510_v49, %v4228_v53  ;;  %vm1515_vm4 = vcmp.ne.s32.totalorder %v1511_v39, %v4234_v55 }
  0x7f   : > { %v5969_v40 = vsel %vm4822_vm7, 4294967295, %v5968_v40  ;;  %v318_v11 = vand.u32 15, %v316_v41  ;;  %vm4828_vm15 = vmpackc.low %vm1515_vm4, %vm1514_vm5  ;;  %v5970_v60 = vmov 0  ;;  %v1586_v50 = vsel %vm4822_vm7, %v4689_v56, 0 }
  0x80   : > { %v5971_v60 = vsel %vm4828_vm15, 4294967295, %v5970_v60  ;;  %v1918_v23 = vpack.c.b16 %v1905_v37, %v1904_v7  ;;  %vm5868_vm10 = vcmp.lt.s32.totalorder %v4809_v18, 0  ;;  %v322_v61 = vsub.s32 0, %v4809_v18  ;;  %2219 = vmatmul.bf16.gmra.mxu0 %v4274_v14  ;;  %v3892_v14 = vld [vmem:[%s5852_s1 + $0x1a0] sm:$0xff] }
  0x81   : > { %v1093_v58 = vshrl.u32 %v1059_v47, 16  ;;  %v1096_v25 = vshll.u32 %v1059_v47, 16  ;;  %v1587_v6 = vsel %vm4828_vm15, %v4776_v51, 0  ;;  %v1637_v15 = vunpack.c.l.b16 %v1586_v50  ;;  %v3908_v50 = vld [vmem:[%s5852_s1 + $0x220] sm:$0xff]  ;;  %2743 = vmatpush.bf16.msra.mxu2 %v3892_v14 }
  0x82   : > { %v1638_v16 = vunpack.c.l.b16 %v1587_v6  ;;  %v1951_v43 = vshrl.u32 %v1918_v23, 16  ;;  %v1954_v13 = vshll.u32 %v1918_v23, 16  ;;  %v319_v31 = vsub.s32 0, %v318_v11  ;;  %3145 = vmatpush.bf16.msra.mxu0 %v3908_v50 }
  0x83   : > { %v1095_v12 = vrot.slane %v1093_v58, 3  ;;  %v1098_v21 = vrot.slane %v1096_v25, 4  ;;  %v323_v56 = vsel %vm5868_vm10, %v322_v61, %v4809_v18  ;;  %v625_v7 = vrot.slane %v623_v34, 4 }
  0x84   : > { %v1651_v26 = vpack.c.b16 %v1638_v16, %v1637_v15  ;;  %v1953_v28 = vrot.slane %v1951_v43, 3  ;;  %v1956_v29 = vrot.slane %v1954_v13, 4  ;;  %vm5972_vm4 = vcmp.lt.s32.totalorder %v250_v63, 0 }
  0x85   : > { %v320_v20 = vsel %vm5972_vm4, %v319_v31, %v318_v11  ;;  %v4844_v36 = vor.u32 %v1098_v21, %v1095_v12  ;;  %v325_v49 = vand.u32 15, %v323_v56  ;;  %v1680_v39 = vor.u32 %v1678_v45, %v4744_v5  ;;  %v3884_v5 = vld [vmem:[%s5852_s1 + $0x160] sm:$0xff] }
  0x86   : > { %vm378_vm6 = vcmp.ne.s32.totalorder %v320_v20, 0  ;;  %vm394_vm2 = vcmp.lt.s32.totalorder %v320_v20, 0  ;;  %v1682_v33 = vshll.u32 %v1651_v26, 16  ;;  %v4850_v37 = vor.u32 %v1956_v29, %v1953_v28  ;;  %2465 = vmatpush.bf16.msra.mxu1 %v3884_v5 }
  0x87   : > { %vm410_vm5 = vmand %vm394_vm2, %vm378_vm6  ;;  %v426_v34 = vadd.s32 16, %v320_v20  ;;  %vm5973_vm10 = vsmask.f32 4352  ;;  %v326_v41 = vsub.s32 0, %v325_v49  ;;  %v626_v47 = vor.u32 %v625_v7, %v4770_v24 }
  0x88   : > { %v1100_v63 = vsel %vm5973_vm10, %v4742_v44, %v4844_v36  ;;  %v1684_v45 = vrot.slane %v1682_v33, 1  ;;  %v1958_v44 = vsel %vm5973_vm10, %v4748_v9, %v4850_v37  ;;  %v1686_v24 = vshrl.u32 %v1651_v26, 16 }
  0x89   : > { %1220 = vmatmul.bf16.gmra.mxu1 %v1100_v63  ;;  %v442_v11 = vsel %vm410_vm5, %v426_v34, %v320_v20  ;;  %2078 = vmatmul.bf16.gmra.mxu3 %v1958_v44  ;;  %vm5974_vm4 = vcmp.lt.s32.totalorder %v4809_v18, 0  ;;  %v235_v61 = vadd.s32 80, %v4151_v4  ;;  %vm5975_vm14 = vsmask.f32 7424 }
  0x8a   : > { %v327_v23 = vsel %vm5974_vm4, %v326_v41, %v325_v49  ;;  %vm458_vm6 = vcmp.ne.s32.totalorder %v442_v11, 0  ;;  %vm474_vm2 = vcmp.ne.s32.totalorder %v442_v11, 15  ;;  %v1685_v58 = vsel %vm5975_vm14, %v1680_v39, %v1684_v45 }
  0x8b   : > { %vm379_vm15 = vcmp.ne.s32.totalorder %v327_v23, 0  ;;  %vm395_vm7 = vcmp.lt.s32.totalorder %v327_v23, 0  ;;  %v427_v9 = vadd.s32 16, %v327_v23  ;;  %vm522_vm5 = vmpackc.low %vm458_vm6, %vm458_vm6  ;;  %1800 = vmatmul.bf16.gmra.mxu2 %v1685_v58  ;;  %v1388_v18 = vrot.slane %v4791_v59, 4 }
  0x8c   : > { %vm411_vm10 = vmand %vm395_vm7, %vm379_vm15  ;;  %v538_v25 = vsel %vm522_vm5, 65537, %v4085_v52  ;;  %v236_v6 = vadd.s32 88, %v4151_v4  ;;  %v4879_v15 = vadd.s32 %v4146_v2, %v235_v61  ;;  %v627_v43 = vrot.slane %v626_v47, 4  ;;  %v4912_v61 = vld [vmem:[%s4238_s20 + $0x2c] sm:$0xf] }
  0x8d   : > { %v443_v16 = vsel %vm411_vm10, %v427_v9, %v327_v23  ;;  %v629_v13 = vshll.u32 %v538_v25, 16  ;;  %v633_v31 = vshrl.u32 %v538_v25, 16  ;;  %vm1291_vm14 = vmpackc.low %vm474_vm2, %vm474_vm2  ;;  %v4887_v26 = vor.u32 %v1686_v24, %v1684_v45 }
  0x8e   : > { %vm459_vm4 = vcmp.ne.s32.totalorder %v443_v16, 0  ;;  %vm475_vm6 = vcmp.ne.s32.totalorder %v443_v16, 15  ;;  %v1307_v12 = vsel %vm1291_vm14, 65537, %v4085_v52  ;;  %v4885_v21 = vadd.s32 %v4146_v2, %v236_v6 }
  0x8f   : > { %vm523_vm15 = vmpackc.low %vm459_vm4, %vm459_vm4  ;;  %v631_v59 = vrot.slane %v629_v13, 5  ;;  %v635_v56 = vrot.slane %v633_v31, 4  ;;  %v1390_v7 = vshrl.u32 %v1307_v12, 16  ;;  %v1393_v29 = vshll.u32 %v1307_v12, 16 }
  0x90   : > { %v4890_v28 = vsel %vm523_vm15, 65537, %v4085_v52  ;;  %vm1292_vm7 = vmpackc.low %vm475_vm6, %vm475_vm6  ;;  %vm5874_vm2 = vcmp.lt.s32.totalorder %v4879_v15, 0  ;;  %v329_v20 = vsub.s32 0, %v4879_v15  ;;  %vm335_vm5 = vcmp.lt.s32.totalorder %v4885_v21, 0  ;;  %2224 = vmatmul.bf16.gmra.mxu0 %v4444_v62 }
  0x91   : > { %v632_v49 = vsel %vm4253_vm0, %v627_v43, %v631_v59  ;;  %v636_v39 = vor.u32 %v635_v56, %v631_v59  ;;  %v639_v33 = vshll.u32 %v4890_v28, 16  ;;  %v643_v34 = vshrl.u32 %v4890_v28, 16 }
  0x92   : > { %v764_v63 = vunpack.c.l.b16 %v632_v49  ;;  %v765_v41 = vunpack.c.h.b16 %v632_v49  ;;  %v1308_v47 = vsel %vm1292_vm7, 65537, %v4085_v52  ;;  %v1392_v14 = vrot.slane %v1390_v7, 7  ;;  %v4928_v7 = vld [vmem:[%s4238_s20 + $0x30] sm:$0xf] }
  0x93   : > { %v637_v32 = vrot.slane %v636_v39, 4  ;;  %v4900_v5 = vrot.slane %v639_v33, 5  ;;  %v1399_v45 = vshrl.u32 %v1308_v47, 16  ;;  %v1402_v44 = vshll.u32 %v1308_v47, 16 }
  0x94   : > { %vm768_vm10 = vcmp.ne.s32.totalorder %v764_v63, %v4228_v53  ;;  %vm769_vm14 = vcmp.ne.s32.totalorder %v765_v41, %v4234_v55  ;;  %v1395_v11 = vor.u32 %v1393_v29, %v1392_v14  ;;  %v1397_v24 = vrot.slane %v1392_v14, 4 }
  0x95   : > { %v642_v50 = vsel %vm4253_vm0, %v637_v32, %v4900_v5  ;;  %vm4907_vm4 = vmpackc.low %vm769_vm14, %vm768_vm10  ;;  %v5976_v23 = vmov 0  ;;  %v4914_v58 = vrot.slane %v1399_v45, 7  ;;  %v330_v9 = vsel %vm5874_vm2, %v329_v20, %v4879_v15 }
  0x96   : > { %v5977_v23 = vsel %vm4907_vm4, 4294967295, %v5976_v23  ;;  %v336_v25 = vsub.s32 0, %v4885_v21  ;;  %v771_v6 = vunpack.c.l.b16 %v642_v50  ;;  %v772_v16 = vunpack.c.h.b16 %v642_v50 }
  0x97   : > { %v835_v43 = vsel %vm4907_vm4, %v4776_v51, 0  ;;  %v1396_v13 = vsel %vm4416_vm8, %v1388_v18, %v1395_v11  ;;  %v1404_v12 = vor.u32 %v1402_v44, %v4914_v58  ;;  %v1855_v51 = vsel %vm4907_vm4, %v4912_v61, 0 }
  0x98   : > { %v1047_v31 = vunpack.c.l.b16 %v835_v43  ;;  %v1517_v59 = vunpack.c.l.b16 %v1396_v13  ;;  %v1518_v56 = vunpack.c.h.b16 %v1396_v13  ;;  %vm775_vm6 = vcmp.ne.s32.totalorder %v771_v6, %v4228_v53 }
  0x99   : > { %vm776_vm15 = vcmp.ne.s32.totalorder %v772_v16, %v4234_v55  ;;  %v332_v29 = vand.u32 15, %v330_v9  ;;  %v5978_v18 = vmov 0  ;;  %v1405_v62 = vsel %vm4416_vm8, %v1397_v24, %v1404_v12 }
  0x9a   : > { %vm4935_vm7 = vmpackc.low %vm776_vm15, %vm775_vm6  ;;  %vm1521_vm10 = vcmp.ne.s32.totalorder %v1517_v59, %v4228_v53  ;;  %vm1522_vm14 = vcmp.ne.s32.totalorder %v1518_v56, %v4234_v55  ;;  %v1906_v20 = vunpack.c.l.b16 %v1855_v51  ;;  %v5980_v39 = vmov 0 }
  0x9b   : > { %v5979_v18 = vsel %vm4935_vm7, 4294967295, %v5978_v18  ;;  %v836_v49 = vsel %vm4935_vm7, %v4800_v17, 0  ;;  %vm4946_vm2 = vmpackc.low %vm1522_vm14, %vm1521_vm10  ;;  %v1524_v33 = vunpack.c.l.b16 %v1405_v62  ;;  %v1525_v63 = vunpack.c.h.b16 %v1405_v62 }
  0x9c   : > { %v5981_v39 = vsel %vm4946_vm2, 4294967295, %v5980_v39  ;;  %v1856_v41 = vsel %vm4935_vm7, %v4928_v7, 0  ;;  %v1048_v47 = vunpack.c.l.b16 %v836_v49  ;;  %v1588_v14 = vsel %vm4946_vm2, %v4800_v17, 0 }
  0x9d   : > { %v1907_v32 = vunpack.c.l.b16 %v1856_v41  ;;  %v333_v45 = vsub.s32 0, %v332_v29  ;;  %vm1528_vm6 = vcmp.ne.s32.totalorder %v1524_v33, %v4228_v53  ;;  %vm1529_vm15 = vcmp.ne.s32.totalorder %v1525_v63, %v4234_v55  ;;  %v3891_v33 = vld [vmem:[%s5852_s1 + $0x198] sm:$0xff] }
  0x9e   : > { %v1639_v44 = vunpack.c.l.b16 %v1588_v14  ;;  %v337_v11 = vsel %vm335_vm5, %v336_v25, %v4885_v21  ;;  %v1060_v24 = vpack.c.b16 %v1048_v47, %v1047_v31  ;;  %vm4961_vm10 = vmpackc.low %vm1529_vm15, %vm1528_vm6  ;;  %v5982_v50 = vmov 0  ;;  %v3899_v63 = vld [vmem:[%s5852_s1 + $0x1d8] sm:$0xff]  ;;  %2744 = vmatpush.bf16.msra.mxu2 %v3891_v33 }
  0x9f   : > { %v5983_v50 = vsel %vm4961_vm10, 4294967295, %v5982_v50  ;;  %v1919_v9 = vpack.c.b16 %v1907_v32, %v1906_v20  ;;  %vm5984_vm14 = vcmp.lt.s32.totalorder %v4879_v15, 0  ;;  %v339_v6 = vand.u32 15, %v337_v11  ;;  %v3883_v41 = vld [vmem:[%s5852_s1 + $0x158] sm:$0xff]  ;;  %2880 = vmatpush.bf16.msra.mxu3 %v3899_v63 }
  0xa0   : > { %v334_v17 = vsel %vm5984_vm14, %v333_v45, %v332_v29  ;;  %v1589_v16 = vsel %vm4961_vm10, %v4912_v61, 0  ;;  %v1102_v13 = vshrl.u32 %v1060_v24, 16  ;;  %v1105_v12 = vshll.u32 %v1060_v24, 16  ;;  %v3907_v14 = vld [vmem:[%s5852_s1 + $0x218] sm:$0xff]  ;;  %2466 = vmatpush.bf16.msra.mxu1 %v3883_v41 }
  0xa1   : > { %vm380_vm7 = vcmp.ne.s32.totalorder %v334_v17, 0  ;;  %vm396_vm4 = vcmp.lt.s32.totalorder %v334_v17, 0  ;;  %v428_v43 = vadd.s32 16, %v334_v17  ;;  %v1640_v25 = vunpack.c.l.b16 %v1589_v16  ;;  %3146 = vmatpush.bf16.msra.mxu0 %v3907_v14 }
  0xa2   : > { %v1960_v31 = vshrl.u32 %v1919_v9, 16  ;;  %vm412_vm6 = vmand %vm396_vm4, %vm380_vm7  ;;  %v1963_v59 = vshll.u32 %v1919_v9, 16  ;;  %v340_v56 = vsub.s32 0, %v339_v6  ;;  %v645_v15 = vrot.slane %v643_v34, 4 }
  0xa3   : > { %v444_v51 = vsel %vm412_vm6, %v428_v43, %v334_v17  ;;  %v1104_v29 = vrot.slane %v1102_v13, 3  ;;  %v1107_v62 = vrot.slane %v1105_v12, 4  ;;  %v4972_v20 = vpack.c.b16 %v1640_v25, %v1639_v44  ;;  %v4026_v12 = vld [vmem:[%s4238_s20 + $0x38] sm:$0xff] }
  0xa4   : > { %v1962_v49 = vrot.slane %v1960_v31, 3  ;;  %v1965_v47 = vrot.slane %v1963_v59, 4  ;;  %v341_v28 = vsel %vm335_vm5, %v340_v56, %v339_v6  ;;  %vm460_vm4 = vcmp.ne.s32.totalorder %v444_v51, 0  ;;  %2229 = vmatmul.bf16.gmra.mxu0 %v4026_v12 }
  0xa5   : > { %v646_v34 = vor.u32 %v645_v15, %v4900_v5  ;;  %v4989_v32 = vor.u32 %v1107_v62, %v1104_v29  ;;  %v1690_v45 = vshll.u32 %v4972_v20, 16  ;;  %vm381_vm7 = vcmp.ne.s32.totalorder %v341_v28, 0  ;;  %vm524_vm14 = vmpackc.low %vm460_vm4, %vm460_vm4 }
  0xa6   : > { %vm397_vm15 = vcmp.lt.s32.totalorder %v341_v28, 0  ;;  %v4992_v44 = vor.u32 %v1965_v47, %v1962_v49  ;;  %v429_v21 = vadd.s32 16, %v341_v28  ;;  %v540_v5 = vsel %vm524_vm14, 65537, %v4085_v52  ;;  %v5016_v47 = vld [vmem:[%s4238_s20 + $0x34] sm:$0xf] }
  0xa7   : > { %vm413_vm5 = vmand %vm397_vm15, %vm381_vm7  ;;  %v647_v11 = vrot.slane %v646_v34, 4  ;;  %vm5985_vm6 = vsmask.f32 4352  ;;  %v4998_v9 = vrot.slane %v1690_v45, 1  ;;  %v649_v17 = vshll.u32 %v540_v5, 16 }
  0xa8   : > { %v1109_v24 = vsel %vm5985_vm6, %v4844_v36, %v4989_v32  ;;  %v653_v6 = vshrl.u32 %v540_v5, 16  ;;  %vm5986_vm4 = vmmov %vm5985_vm6  ;;  %v445_v43 = vsel %vm413_vm5, %v429_v21, %v341_v28  ;;  %vm476_vm7 = vcmp.ne.s32.totalorder %v444_v51, 15 }
  0xa9   : > { %1225 = vmatmul.bf16.gmra.mxu1 %v1109_v24  ;;  %v1967_v16 = vsel %vm5986_vm4, %v4850_v37, %v4992_v44  ;;  %v237_v13 = vadd.s32 96, %v4151_v4  ;;  %vm5987_vm15 = vsmask.f32 7424  ;;  %vm461_vm14 = vcmp.ne.s32.totalorder %v445_v43, 0  ;;  %vm1293_vm6 = vmpackc.low %vm476_vm7, %vm476_vm7 }
  0xaa   : > { %v1693_v25 = vsel %vm5987_vm15, %v4887_v26, %v4998_v9  ;;  %2083 = vmatmul.bf16.gmra.mxu3 %v1967_v16  ;;  %v651_v36 = vrot.slane %v649_v17, 5  ;;  %v655_v31 = vrot.slane %v653_v6, 4  ;;  %vm525_vm10 = vmpackc.low %vm461_vm14, %vm461_vm14  ;;  %vm477_vm2 = vcmp.ne.s32.totalorder %v445_v43, 15 }
  0xab   : > { %1805 = vmatmul.bf16.gmra.mxu2 %v1693_v25  ;;  %v1309_v37 = vsel %vm1293_vm6, 65537, %v4085_v52  ;;  %v1406_v59 = vrot.slane %v4914_v58, 4  ;;  %v1694_v56 = vshrl.u32 %v4972_v20, 16  ;;  %v541_v51 = vsel %vm525_vm10, 65537, %v4085_v52  ;;  %vm1294_vm5 = vmpackc.low %vm477_vm2, %vm477_vm2 }
  0xac   : > { %v652_v26 = vsel %vm4253_vm0, %v647_v11, %v651_v36  ;;  %v656_v15 = vor.u32 %v655_v31, %v651_v36  ;;  %v1408_v29 = vshrl.u32 %v1309_v37, 16  ;;  %v659_v62 = vshll.u32 %v541_v51, 16 }
  0xad   : > { %v778_v49 = vunpack.c.l.b16 %v652_v26  ;;  %v779_v33 = vunpack.c.h.b16 %v652_v26  ;;  %v238_v63 = vadd.s32 104, %v4151_v4  ;;  %v1310_v58 = vsel %vm1294_vm5, 65537, %v4085_v52 }
  0xae   : > { %v657_v41 = vrot.slane %v656_v15, 4  ;;  %v1410_v28 = vrot.slane %v1408_v29, 7  ;;  %v1411_v34 = vshll.u32 %v1309_v37, 16  ;;  %v5019_v14 = vrot.slane %v659_v62, 5  ;;  %v5042_v29 = vld [vmem:[%s4238_s20 + $0x38] sm:$0xf] }
  0xaf   : > { %vm782_vm10 = vcmp.ne.s32.totalorder %v778_v49, %v4228_v53  ;;  %vm783_vm4 = vcmp.ne.s32.totalorder %v779_v33, %v4234_v55  ;;  %v1417_v45 = vshrl.u32 %v1310_v58, 16  ;;  %v663_v21 = vshrl.u32 %v541_v51, 16 }
  0xb0   : > { %vm5023_vm2 = vmpackc.low %vm783_vm4, %vm782_vm10  ;;  %v5988_v5 = vmov 0  ;;  %v1413_v11 = vor.u32 %v1411_v34, %v1410_v28  ;;  %v1415_v24 = vrot.slane %v1410_v28, 4  ;;  %v1420_v17 = vshll.u32 %v1310_v58, 16 }
  0xb1   : > { %v5989_v5 = vsel %vm5023_vm2, 4294967295, %v5988_v5  ;;  %v662_v6 = vsel %vm4253_vm0, %v657_v41, %v5019_v14  ;;  %v837_v16 = vsel %vm5023_vm2, %v4912_v61, 0  ;;  %v5033_v43 = vrot.slane %v1417_v45, 7 }
  0xb2   : > { %v1857_v12 = vsel %vm5023_vm2, %v5016_v47, 0  ;;  %v785_v25 = vunpack.c.l.b16 %v662_v6  ;;  %v786_v36 = vunpack.c.h.b16 %v662_v6  ;;  %v1049_v31 = vunpack.c.l.b16 %v837_v16 }
  0xb3   : > { %v1414_v37 = vsel %vm4416_vm8, %v1406_v59, %v1413_v11  ;;  %v1422_v51 = vor.u32 %v1420_v17, %v5033_v43  ;;  %v1908_v62 = vunpack.c.l.b16 %v1857_v12  ;;  %v254_v61 = vadd.s32 %v4146_v2, %v237_v13 }
  0xb4   : > { %v1531_v26 = vunpack.c.l.b16 %v1414_v37  ;;  %v1532_v15 = vunpack.c.h.b16 %v1414_v37  ;;  %vm789_vm7 = vcmp.ne.s32.totalorder %v785_v25, %v4228_v53  ;;  %vm790_vm15 = vcmp.ne.s32.totalorder %v786_v36, %v4234_v55  ;;  %v4027_v36 = vld [vmem:[%s4238_s20 + $0x40] sm:$0xff] }
  0xb5   : > { %v255_v49 = vadd.s32 %v4146_v2, %v238_v63  ;;  %vm5048_vm14 = vmpackc.low %vm790_vm15, %vm789_vm7  ;;  %v5990_v33 = vmov 0  ;;  %v1423_v59 = vsel %vm4416_vm8, %v1415_v24, %v1422_v51  ;;  %v5056_v41 = vrot.slane %v663_v21, 4  ;;  %2234 = vmatmul.bf16.gmra.mxu0 %v4027_v36 }
  0xb6   : > { %v5991_v33 = vsel %vm5048_vm14, 4294967295, %v5990_v33  ;;  %vm1535_vm6 = vcmp.ne.s32.totalorder %v1531_v26, %v4228_v53  ;;  %vm1536_vm5 = vcmp.ne.s32.totalorder %v1532_v15, %v4234_v55  ;;  %v838_v58 = vsel %vm5048_vm14, %v4928_v7, 0 }
  0xb7   : > { %vm5061_vm10 = vmpackc.low %vm1536_vm5, %vm1535_vm6  ;;  %v5992_v13 = vmov 0  ;;  %v1538_v63 = vunpack.c.l.b16 %v1423_v59  ;;  %v1539_v28 = vunpack.c.h.b16 %v1423_v59  ;;  %v1858_v34 = vsel %vm5048_vm14, %v5042_v29, 0 }
  0xb8   : > { %v5993_v13 = vsel %vm5061_vm10, 4294967295, %v5992_v13  ;;  %v1050_v45 = vunpack.c.l.b16 %v838_v58  ;;  %v1590_v21 = vsel %vm5061_vm10, %v4928_v7, 0  ;;  %v1909_v11 = vunpack.c.l.b16 %v1858_v34 }
  0xb9   : > { %vm342_vm4 = vcmp.lt.s32.totalorder %v254_v61, 0  ;;  %vm1542_vm7 = vcmp.ne.s32.totalorder %v1538_v63, %v4228_v53  ;;  %vm1543_vm15 = vcmp.ne.s32.totalorder %v1539_v28, %v4234_v55  ;;  %v1641_v24 = vunpack.c.l.b16 %v1590_v21 }
  0xba   : > { %v343_v17 = vsub.s32 0, %v254_v61  ;;  %v1061_v6 = vpack.c.b16 %v1050_v45, %v1049_v31  ;;  %vm5073_vm6 = vmpackc.low %vm1543_vm15, %vm1542_vm7  ;;  %v5994_v16 = vmov 0  ;;  %v1920_v12 = vpack.c.b16 %v1909_v11, %v1908_v62 }
  0xbb   : > { %v5995_v16 = vsel %vm5073_vm6, 4294967295, %v5994_v16  ;;  %vm5881_vm5 = vcmp.lt.s32.totalorder %v255_v49, 0  ;;  %v350_v25 = vsub.s32 0, %v255_v49  ;;  %v1591_v7 = vsel %vm5073_vm6, %v5016_v47, 0 }
  0xbc   : > { %v1696_v37 = vor.u32 %v1694_v56, %v4998_v9  ;;  %v344_v51 = vsel %vm342_vm4, %v343_v17, %v254_v61  ;;  %v1111_v31 = vshrl.u32 %v1061_v6, 16  ;;  %v1114_v26 = vshll.u32 %v1061_v6, 16 }
  0xbd   : > { %v1642_v15 = vunpack.c.l.b16 %v1591_v7  ;;  %v1969_v59 = vshrl.u32 %v1920_v12, 16  ;;  %v1972_v58 = vshll.u32 %v1920_v12, 16  ;;  %v346_v62 = vand.u32 15, %v344_v51 }
  0xbe   : > { %v351_v63 = vsel %vm5881_vm5, %v350_v25, %v255_v49  ;;  %v666_v28 = vor.u32 %v5056_v41, %v5019_v14  ;;  %v1113_v34 = vrot.slane %v1111_v31, 3  ;;  %v1116_v45 = vrot.slane %v1114_v26, 4 }
  0xbf   : > { %v1653_v21 = vpack.c.b16 %v1642_v15, %v1641_v24  ;;  %v1971_v11 = vrot.slane %v1969_v59, 3  ;;  %v1974_v36 = vrot.slane %v1972_v58, 4  ;;  %v347_v20 = vsub.s32 0, %v346_v62  ;;  %v3890_v15 = vld [vmem:[%s5852_s1 + $0x190] sm:$0xff] }
  0xc0   : > { %v353_v9 = vand.u32 15, %v351_v63  ;;  %v239_v56 = vadd.s32 112, %v4151_v4  ;;  %v5089_v17 = vor.u32 %v1116_v45, %v1113_v34  ;;  %v240_v12 = vadd.s32 120, %v4151_v4  ;;  %2745 = vmatpush.bf16.msra.mxu2 %v3890_v15 }
  0xc1   : > { %v1698_v6 = vshll.u32 %v1653_v21, 16  ;;  %v1702_v7 = vshrl.u32 %v1653_v21, 16  ;;  %v5092_v51 = vor.u32 %v1974_v36, %v1971_v11  ;;  %v348_v25 = vsel %vm342_vm4, %v347_v20, %v346_v62  ;;  %v3906_v62 = vld [vmem:[%s5852_s1 + $0x210] sm:$0xff] }
  0xc2   : > { %v354_v14 = vsub.s32 0, %v353_v9  ;;  %v5096_v41 = vadd.s32 %v4146_v2, %v239_v56  ;;  %vm5996_vm7 = vsmask.f32 4352  ;;  %vm382_vm15 = vcmp.ne.s32.totalorder %v348_v25, 0  ;;  %3147 = vmatpush.bf16.msra.mxu0 %v3906_v62 }
  0xc3   : > { %v1118_v24 = vsel %vm5996_vm7, %v4989_v32, %v5089_v17  ;;  %v1700_v31 = vrot.slane %v1698_v6, 1  ;;  %vm398_vm5 = vcmp.lt.s32.totalorder %v348_v25, 0  ;;  %vm5997_vm14 = vmmov %vm5996_vm7  ;;  %vm5998_vm2 = vcmp.lt.s32.totalorder %v255_v49, 0  ;;  %v3898_v32 = vld [vmem:[%s5852_s1 + $0x1d0] sm:$0xff] }
  0xc4   : > { %1230 = vmatmul.bf16.gmra.mxu1 %v1118_v24  ;;  %v1976_v4 = vsel %vm5997_vm14, %v4992_v44, %v5092_v51  ;;  %v355_v26 = vsel %vm5998_vm2, %v354_v14, %v353_v9  ;;  %vm414_vm6 = vmand %vm398_vm5, %vm382_vm15  ;;  %v430_v61 = vadd.s32 16, %v348_v25  ;;  %v5112_v59 = vadd.s32 %v4146_v2, %v240_v12  ;;  %v3882_v49 = vld [vmem:[%s5852_s1 + $0x150] sm:$0xff]  ;;  %2881 = vmatpush.bf16.msra.mxu3 %v3898_v32 }
  0xc5   : > { %vm5999_vm4 = vsmask.f32 7424  ;;  %2088 = vmatmul.bf16.gmra.mxu3 %v1976_v4  ;;  %vm383_vm7 = vcmp.ne.s32.totalorder %v355_v26, 0  ;;  %vm399_vm14 = vcmp.lt.s32.totalorder %v355_v26, 0  ;;  %v431_v44 = vadd.s32 16, %v355_v26  ;;  %2467 = vmatpush.bf16.msra.mxu1 %v3882_v49 }
  0xc6   : > { %v1701_v58 = vsel %vm5999_vm4, %v1696_v37, %v1700_v31  ;;  %vm415_vm2 = vmand %vm399_vm14, %vm383_vm7  ;;  %v446_v63 = vsel %vm414_vm6, %v430_v61, %v348_v25  ;;  %v1424_v2 = vrot.slane %v5033_v43, 4  ;;  %vm356_vm5 = vcmp.lt.s32.totalorder %v5096_v41, 0 }
  0xc7   : > { %1810 = vmatmul.bf16.gmra.mxu2 %v1701_v58  ;;  %v357_v37 = vsub.s32 0, %v5096_v41  ;;  %v447_v34 = vsel %vm415_vm2, %v431_v44, %v355_v26  ;;  %vm462_vm15 = vcmp.ne.s32.totalorder %v446_v63, 0  ;;  %vm478_vm4 = vcmp.ne.s32.totalorder %v446_v63, 15 }
  0xc8   : > { %vm5891_vm10 = vcmp.lt.s32.totalorder %v5112_v59, 0  ;;  %vm463_vm1 = vcmp.ne.s32.totalorder %v447_v34, 0  ;;  %vm526_vm13 = vmpackc.low %vm462_vm15, %vm462_vm15  ;;  %vm479_vm9 = vcmp.ne.s32.totalorder %v447_v34, 15  ;;  %v364_v45 = vsub.s32 0, %v5112_v59 }
  0xc9   : > { %v358_v43 = vsel %vm356_vm5, %v357_v37, %v5096_v41  ;;  %vm527_vm6 = vmpackc.low %vm463_vm1, %vm463_vm1  ;;  %v542_v21 = vsel %vm526_vm13, 65537, %v4085_v52  ;;  %v667_v11 = vrot.slane %v666_v28, 4  ;;  %v5130_v36 = vor.u32 %v1702_v7, %v1700_v31 }
  0xca   : > { %v360_v20 = vand.u32 15, %v358_v43  ;;  %v5133_v9 = vsel %vm527_vm6, 65537, %v4085_v52  ;;  %v669_v56 = vshll.u32 %v542_v21, 16  ;;  %v673_v6 = vshrl.u32 %v542_v21, 16  ;;  %vm1295_vm7 = vmpackc.low %vm478_vm4, %vm478_vm4 }
  0xcb   : > { %v5140_v12 = vsel %vm5891_vm10, %v364_v45, %v5112_v59  ;;  %v679_v25 = vshll.u32 %v5133_v9, 16  ;;  %v683_v28 = vshrl.u32 %v5133_v9, 16  ;;  %vm1296_vm13 = vmpackc.low %vm479_vm9, %vm479_vm9  ;;  %v1311_v7 = vsel %vm1295_vm7, 65537, %v4085_v52 }
  0xcc   : > { %v361_v14 = vsub.s32 0, %v360_v20  ;;  %v671_v24 = vrot.slane %v669_v56, 5  ;;  %v675_v31 = vrot.slane %v673_v6, 4  ;;  %v1312_v4 = vsel %vm1296_vm13, 65537, %v4085_v52 }
  0xcd   : > { %v1426_v26 = vshrl.u32 %v1311_v7, 16  ;;  %v5148_v61 = vrot.slane %v679_v25, 5  ;;  %v1429_v15 = vshll.u32 %v1311_v7, 16  ;;  %v1435_v32 = vshrl.u32 %v1312_v4, 16 }
  0xce   : > { %v1438_v58 = vshll.u32 %v1312_v4, 16  ;;  %v672_v44 = vsel %vm4253_vm0, %v667_v11, %v671_v24  ;;  %v676_v49 = vor.u32 %v675_v31, %v671_v24  ;;  %v362_v63 = vsel %vm356_vm5, %v361_v14, %v360_v20  ;;  %v5172_v14 = vpop.f32.mrf.mxu1  ;;  %v5174_v24 = vpop.f32.mrf.mxu0 }
  0xcf   : > { %v1428_v62 = vrot.slane %v1426_v26, 7  ;;  %v792_v37 = vunpack.c.l.b16 %v672_v44  ;;  %v793_v34 = vunpack.c.h.b16 %v672_v44  ;;  %v5154_v43 = vrot.slane %v1435_v32, 7 }
  0xd0   : > { %v367_v45 = vand.u32 15, %v5140_v12  ;;  %v677_v21 = vrot.slane %v676_v49, 4  ;;  %vm384_vm9 = vcmp.ne.s32.totalorder %v362_v63, 0  ;;  %v6000_v20 = vmov 0  ;;  %v5168_v12 = vld [vmem:[%s4238_s20 + $0x3c] sm:$0xf] }
  0xd1   : > { %v1431_v56 = vor.u32 %v1429_v15, %v1428_v62  ;;  %v1433_v6 = vrot.slane %v1428_v62, 4  ;;  %vm796_vm1 = vcmp.ne.s32.totalorder %v792_v37, %v4228_v53  ;;  %vm797_vm14 = vcmp.ne.s32.totalorder %v793_v34, %v4234_v55 }
  0xd2   : > { %v1440_v11 = vor.u32 %v1438_v58, %v5154_v43  ;;  %v368_v25 = vsub.s32 0, %v367_v45  ;;  %v682_v41 = vsel %vm4253_vm0, %v677_v21, %v5148_v61  ;;  %vm5163_vm2 = vmpackc.low %vm797_vm14, %vm796_vm1  ;;  %vm400_vm5 = vcmp.lt.s32.totalorder %v362_v63, 0 }
  0xd3   : > { %v6001_v20 = vsel %vm5163_vm2, 4294967295, %v6000_v20  ;;  %v1432_v7 = vsel %vm4416_vm8, %v1424_v2, %v1431_v56  ;;  %v432_v31 = vadd.s32 16, %v362_v63  ;;  %v799_v4 = vunpack.c.l.b16 %v682_v41  ;;  %v5182_v2 = vld [vmem:[%s4238_s20 + $0x40] sm:$0xf]  ;;  %vm5191_vm6 = vmand %vm400_vm5, %vm384_vm9 }
  0xd4   : > { %6002 = vst [vmem:[#allocation2_spill] sm:$0xff] %v6001_v20  ;;  %v800_v26 = vunpack.c.h.b16 %v682_v41  ;;  %v839_v15 = vsel %vm5163_vm2, %v5016_v47, 0  ;;  %v1441_v32 = vsel %vm4416_vm8, %v1433_v6, %v1440_v11  ;;  %v1545_v44 = vunpack.c.l.b16 %v1432_v7 }
  0xd5   : > { %v1051_v58 = vunpack.c.l.b16 %v839_v15  ;;  %v1546_v49 = vunpack.c.h.b16 %v1432_v7  ;;  %v1552_v62 = vunpack.c.l.b16 %v1441_v32  ;;  %vm803_vm15 = vcmp.ne.s32.totalorder %v799_v4, %v4228_v53 }
  0xd6   : > { %vm804_vm4 = vcmp.ne.s32.totalorder %v800_v26, %v4234_v55  ;;  %v1553_v37 = vunpack.c.h.b16 %v1441_v32  ;;  %v1859_v34 = vsel %vm5163_vm2, %v5168_v12, 0  ;;  %v6005_v56 = vmov 0 }
  0xd7   : > { %vm5195_vm7 = vmpackc.low %vm804_vm4, %vm803_vm15  ;;  %vm1549_vm13 = vcmp.ne.s32.totalorder %v1545_v44, %v4228_v53  ;;  %vm1550_vm1 = vcmp.ne.s32.totalorder %v1546_v49, %v4234_v55  ;;  %vm1556_vm14 = vcmp.ne.s32.totalorder %v1552_v62, %v4228_v53  ;;  %v1910_v6 = vunpack.c.l.b16 %v1859_v34 }
  0xd8   : > { %v6006_v56 = vsel %vm5195_vm7, 4294967295, %v6005_v56  ;;  %v840_v11 = vsel %vm5195_vm7, %v5042_v29, 0  ;;  %vm5205_vm10 = vmpackc.low %vm1550_vm1, %vm1549_vm13  ;;  %v6008_v41 = vmov 0  ;;  %vm1557_vm9 = vcmp.ne.s32.totalorder %v1553_v37, %v4234_v55 }
  0xd9   : > { %6007 = vst [vmem:[#allocation3_spill] sm:$0xff] %v6006_v56  ;;  %v6009_v41 = vsel %vm5205_vm10, 4294967295, %v6008_v41  ;;  %v1860_v7 = vsel %vm5195_vm7, %v5182_v2, 0  ;;  %vm6011_vm5 = vcmp.lt.s32.totalorder %v5112_v59, 0  ;;  %v1052_v26 = vunpack.c.l.b16 %v840_v11  ;;  %vm5215_vm15 = vmpackc.low %vm1557_vm9, %vm1556_vm14 }
  0xda   : > { %6010 = vst [vmem:[#allocation4_spill] sm:$0xff] %v6009_v41  ;;  %v369_v4 = vsel %vm6011_vm5, %v368_v25, %v367_v45  ;;  %v6012_v15 = vmov 0  ;;  %v1592_v32 = vsel %vm5205_vm10, %v5042_v29, 0  ;;  %v1911_v44 = vunpack.c.l.b16 %v1860_v7  ;;  %v3889_v7 = vld [vmem:[%s5852_s1 + $0x188] sm:$0xff] }
  0xdb   : > { %v6013_v15 = vsel %vm5215_vm15, 4294967295, %v6012_v15  ;;  %vm385_vm4 = vcmp.ne.s32.totalorder %v369_v4, 0  ;;  %v1593_v49 = vsel %vm5215_vm15, %v5168_v12, 0  ;;  %v1643_v62 = vunpack.c.l.b16 %v1592_v32  ;;  %v5246_v32 = vpop.f32.mrf.mxu0  ;;  %2746 = vmatpush.bf16.msra.mxu2 %v3889_v7 }
  0xdc   : > { %6014 = vst [vmem:[#allocation5_spill] sm:$0xff] %v6013_v15  ;;  %vm401_vm13 = vcmp.lt.s32.totalorder %v369_v4, 0  ;;  %v433_v37 = vadd.s32 16, %v369_v4  ;;  %v1062_v59 = vpack.c.b16 %v1052_v26, %v1051_v58  ;;  %v1644_v45 = vunpack.c.l.b16 %v1593_v49  ;;  %v3897_v58 = vld [vmem:[%s5852_s1 + $0x1c8] sm:$0xff]  ;;  %v5235_v26 = vpop.f32.mrf.mxu2 }
  0xdd   : > { %v1921_v25 = vpack.c.b16 %v1911_v44, %v1910_v6  ;;  %vm417_vm1 = vmand %vm401_vm13, %vm385_vm4  ;;  %v448_v34 = vsel %vm5191_vm6, %v432_v31, %v362_v63  ;;  %v685_v29 = vrot.slane %v683_v28, 4  ;;  %v5237_v6 = vpop.f32.mrf.mxu3  ;;  %v3881_v63 = vld [vmem:[%s5852_s1 + $0x148] sm:$0xff]  ;;  %6017 = vst [vmem:[#allocation8_spill] sm:$0xff] %v5246_v32  ;;  %2882 = vmatpush.bf16.msra.mxu3 %v3897_v58 }
  0xde   : > { %v449_v11 = vsel %vm417_vm1, %v433_v37, %v369_v4  ;;  %vm464_vm14 = vcmp.ne.s32.totalorder %v448_v34, 0  ;;  %vm480_vm9 = vcmp.ne.s32.totalorder %v448_v34, 15  ;;  %6015 = vst [vmem:[#allocation6_spill] sm:$0xff] %v5237_v6  ;;  %v1120_v31 = vshrl.u32 %v1062_v59, 16  ;;  %v5244_v4 = vpop.f32.mrf.mxu1  ;;  %v3905_v44 = vld [vmem:[%s5852_s1 + $0x208] sm:$0xff]  ;;  %2468 = vmatpush.bf16.msra.mxu1 %v3881_v63 }
  0xdf   : > { %v1123_v9 = vshll.u32 %v1062_v59, 16  ;;  %v5242_v28 = vpack.c.b16 %v1644_v45, %v1643_v62  ;;  %v1978_v21 = vshrl.u32 %v1921_v25, 16  ;;  %vm528_vm6 = vmpackc.low %vm464_vm14, %vm464_vm14  ;;  %6016 = vst [vmem:[#allocation7_spill] sm:$0xff] %v5244_v4  ;;  %v1981_v49 = vshll.u32 %v1921_v25, 16  ;;  %3148 = vmatpush.bf16.msra.mxu0 %v3905_v44 }
  0xe0   : > { %vm465_vm5 = vcmp.ne.s32.totalorder %v449_v11, 0  ;;  %v544_v37 = vsel %vm528_vm6, 65537, %v4085_v52  ;;  %v686_v6 = vor.u32 %v685_v29, %v5148_v61  ;;  %vm5255_vm4 = vmpackc.low %vm480_vm9, %vm480_vm9  ;;  %v1122_v59 = vrot.slane %v1120_v31, 3 }
  0xe1   : > { %v1125_v45 = vrot.slane %v1123_v9, 4  ;;  %v1706_v4 = vshll.u32 %v5242_v28, 16  ;;  %v1980_v32 = vrot.slane %v1978_v21, 3  ;;  %vm529_vm13 = vmpackc.low %vm465_vm5, %vm465_vm5  ;;  %v1983_v25 = vrot.slane %v1981_v49, 4 }
  0xe2   : > { %v545_v56 = vsel %vm529_vm13, 65537, %v4085_v52  ;;  %v687_v61 = vrot.slane %v686_v6, 4  ;;  %v689_v34 = vshll.u32 %v544_v37, 16  ;;  %v693_v15 = vshrl.u32 %v544_v37, 16 }
  0xe3   : > { %v5261_v29 = vor.u32 %v1125_v45, %v1122_v59  ;;  %v5263_v20 = vrot.slane %v1706_v4, 1  ;;  %v699_v7 = vshll.u32 %v545_v56, 16  ;;  %v5265_v58 = vor.u32 %v1983_v25, %v1980_v32 }
  0xe4   : > { %v691_v31 = vrot.slane %v689_v34, 5  ;;  %vm481_vm1 = vcmp.ne.s32.totalorder %v449_v11, 15  ;;  %v1313_v63 = vsel %vm5255_vm4, 65537, %v4085_v52  ;;  %vm6020_vm14 = vsmask.f32 4352 }
  0xe5   : > { %v1127_v9 = vsel %vm6020_vm14, %v5089_v17, %v5261_v29  ;;  %vm6021_vm9 = vsmask.f32 7424  ;;  %v695_v21 = vrot.slane %v693_v15, 4  ;;  %vm1298_vm6 = vmpackc.low %vm481_vm1, %vm481_vm1  ;;  %v5281_v32 = vrot.slane %v699_v7, 5  ;;  %v5284_v17 = vpop.f32.mrf.mxu2  ;;  %v5286_v49 = vpop.f32.mrf.mxu3 }
  0xe6   : > { %v1709_v6 = vsel %vm6021_vm9, %v5130_v36, %v5263_v20  ;;  %1235 = vmatmul.bf16.gmra.mxu1 %v1127_v9  ;;  %vm6022_vm5 = vmmov %vm6020_vm14  ;;  %v692_v4 = vsel %vm4253_vm0, %v687_v61, %v691_v31  ;;  %v1314_v44 = vsel %vm1298_vm6, 65537, %v4085_v52  ;;  %6023 = vst [vmem:[#allocation9_spill] sm:$0xff] %v5284_v17  ;;  %v1444_v62 = vshrl.u32 %v1313_v63, 16  ;;  %v5288_v59 = vpop.f32.mrf.mxu1  ;;  %v5300_v9 = vld [vmem:[%s4238_s20 + $0x44] sm:$0xf] }
  0xe7   : > { %1815 = vmatmul.bf16.gmra.mxu2 %v1709_v6  ;;  %v1985_v11 = vsel %vm6022_vm5, %v5092_v51, %v5265_v58  ;;  %6024 = vst [vmem:[#allocation10_spill] sm:$0xff] %v5286_v49  ;;  %v696_v36 = vor.u32 %v695_v21, %v691_v31  ;;  %v806_v15 = vunpack.c.l.b16 %v692_v4  ;;  %v807_v37 = vunpack.c.h.b16 %v692_v4  ;;  %v5290_v51 = vpop.f32.mrf.mxu0 }
  0xe8   : > { %2093 = vmatmul.bf16.gmra.mxu3 %v1985_v11  ;;  %v1442_v45 = vrot.slane %v5154_v43, 4  ;;  %v1447_v25 = vshll.u32 %v1313_v63, 16  ;;  %v1453_v61 = vshrl.u32 %v1314_v44, 16  ;;  %v1456_v34 = vshll.u32 %v1314_v44, 16 }
  0xe9   : > { %v697_v52 = vrot.slane %v696_v36, 4  ;;  %vm810_vm4 = vcmp.ne.s32.totalorder %v806_v15, %v4228_v53  ;;  %vm811_vm13 = vcmp.ne.s32.totalorder %v807_v37, %v4234_v55  ;;  %v1446_v7 = vrot.slane %v1444_v62, 7 }
  0xea   : > { %vm5295_vm1 = vmpackc.low %vm811_vm13, %vm810_vm4  ;;  %v6025_v31 = vmov 0  ;;  %v1455_v6 = vrot.slane %v1453_v61, 7  ;;  %v703_v21 = vshrl.u32 %v545_v56, 16  ;;  %v5311_v61 = vld [vmem:[%s4238_s20 + $0x48] sm:$0xf] }
  0xeb   : > { %v6026_v31 = vsel %vm5295_vm1, 4294967295, %v6025_v31  ;;  %v702_v43 = vsel %vm4253_vm0, %v697_v52, %v5281_v32  ;;  %v841_v63 = vsel %vm5295_vm1, %v5168_v12, 0  ;;  %v1449_v11 = vor.u32 %v1447_v25, %v1446_v7  ;;  %6028 = vst [vmem:[#allocation12_spill] sm:$0xff] %v5311_v61 }
  0xec   : > { %6027 = vst [vmem:[#allocation11_spill] sm:$0xff] %v6026_v31  ;;  %v1451_v4 = vrot.slane %v1446_v7, 4  ;;  %v813_v44 = vunpack.c.l.b16 %v702_v43  ;;  %v814_v36 = vunpack.c.h.b16 %v702_v43  ;;  %v1053_v15 = vunpack.c.l.b16 %v841_v63  ;;  %v3896_v43 = vld [vmem:[%s5852_s1 + $0x1c0] sm:$0xff] }
  0xed   : > { %v1458_v37 = vor.u32 %v1456_v34, %v1455_v6  ;;  %v1450_v62 = vsel %vm4416_vm8, %v1442_v45, %v1449_v11  ;;  %v1861_v0 = vsel %vm5295_vm1, %v5300_v9, 0  ;;  %v705_v56 = vrot.slane %v703_v21, 4  ;;  %v3888_v45 = vld [vmem:[%s5852_s1 + $0x180] sm:$0xff]  ;;  %v5324_v34 = vld [vmem:[%s4238_s20 + $0x48] sm:$0xff]  ;;  %v5329_v21 = vpop.f32.mrf.mxu2  ;;  %2883 = vmatpush.bf16.msra.mxu3 %v3896_v43 }
  0xee   : > { %v1460_v52 = vrot.slane %v1455_v6, 4  ;;  %vm817_vm0 = vcmp.ne.s32.totalorder %v813_v44, %v4228_v53  ;;  %vm818_vm14 = vcmp.ne.s32.totalorder %v814_v36, %v4234_v55  ;;  %v1559_v7 = vunpack.c.l.b16 %v1450_v62  ;;  %6029 = vst [vmem:[#allocation13_spill] sm:$0xff] %v5324_v34  ;;  %v5331_v6 = vpop.f32.mrf.mxu3  ;;  %v3880_v36 = vld [vmem:[%s5852_s1 + $0x140] sm:$0xff]  ;;  %2747 = vmatpush.bf16.msra.mxu2 %v3888_v45  ;;  %2239 = vmatmul.bf16.gmra.mxu0 %v5324_v34 }
  0xef   : > { %v1459_v25 = vsel %vm4416_vm8, %v1451_v4, %v1458_v37  ;;  %6030 = vst [vmem:[#allocation14_spill] sm:$0xff] %v5329_v21  ;;  %vm5333_vm9 = vmpackc.low %vm818_vm14, %vm817_vm0  ;;  %v6032_v63 = vmov 0  ;;  %v1560_v30 = vunpack.c.h.b16 %v1450_v62  ;;  %v1912_v44 = vunpack.c.l.b16 %v1861_v0  ;;  %v5340_v37 = vpop.f32.mrf.mxu1  ;;  %v5342_v49 = vpop.f32.mrf.mxu0  ;;  %2469 = vmatpush.bf16.msra.mxu1 %v3880_v36 }
  0xf0   : > { %6031 = vst [vmem:[#allocation15_spill] sm:$0xff] %v5331_v6  ;;  %v6033_v63 = vsel %vm5333_vm9, 4294967295, %v6032_v63  ;;  %v1566_v11 = vunpack.c.l.b16 %v1459_v25  ;;  %v1567_v4 = vunpack.c.h.b16 %v1459_v25  ;;  %v3904_v6 = vld [vmem:[%s5852_s1 + $0x200] sm:$0xff]  ;;  %v842_v21 = vsel %vm5333_vm9, %v5182_v2, 0 }
  0xf1   : > { %6034 = vst [vmem:[#allocation16_spill] sm:$0xff] %v6033_v63  ;;  %vm1563_vm8 = vcmp.ne.s32.totalorder %v1559_v7, %v4228_v53  ;;  %v1862_v62 = vsel %vm5333_vm9, %v5311_v61, 0  ;;  %v706_v0 = vor.u32 %v705_v56, %v5281_v32  ;;  %v1054_v25 = vunpack.c.l.b16 %v842_v21  ;;  %3149 = vmatpush.bf16.msra.mxu0 %v3904_v6 }
  0xf2   : > { %6035 = vst [vmem:[#allocation17_spill] sm:$0xff] %v5340_v37  ;;  %vm1564_vm6 = vcmp.ne.s32.totalorder %v1560_v30, %v4234_v55  ;;  %vm1570_vm5 = vcmp.ne.s32.totalorder %v1566_v11, %v4228_v53  ;;  %vm1571_vm4 = vcmp.ne.s32.totalorder %v1567_v4, %v4234_v55  ;;  %v6037_v7 = vmov 0 }
  0xf3   : > { %6036 = vst [vmem:[#allocation18_spill] sm:$0xff] %v5342_v49  ;;  %vm5359_vm13 = vmpackc.low %vm1564_vm6, %vm1563_vm8  ;;  %v1913_v37 = vunpack.c.l.b16 %v1862_v62  ;;  %v707_v49 = vrot.slane %v706_v0, 4  ;;  %v1573_v63 = vunpack.c.l.b16 %v1460_v52  ;;  %v1063_v32 = vpack.c.b16 %v1054_v25, %v1053_v15 }
  0xf4   : > { %v6038_v7 = vsel %vm5359_vm13, 4294967295, %v6037_v7  ;;  %vm5363_vm0 = vmpackc.low %vm1571_vm4, %vm1570_vm5  ;;  %v6040_v56 = vmov 0  ;;  %v1594_v45 = vsel %vm5359_vm13, %v5182_v2, 0  ;;  %v1710_v43 = vshrl.u32 %v5242_v28, 16 }
  0xf5   : > { %6039 = vst [vmem:[#allocation19_spill] sm:$0xff] %v6038_v7  ;;  %v6041_v56 = vsel %vm5363_vm0, 4294967295, %v6040_v56  ;;  %v1574_v21 = vunpack.c.h.b16 %v1460_v52  ;;  %v1595_v30 = vsel %vm5363_vm0, %v5300_v9, 0  ;;  %v1645_v11 = vunpack.c.l.b16 %v1594_v45  ;;  %v5376_v28 = vpop.f32.mrf.mxu2 }
  0xf6   : > { %6042 = vst [vmem:[#allocation20_spill] sm:$0xff] %v6041_v56  ;;  %v1922_v4 = vpack.c.b16 %v1913_v37, %v1912_v44  ;;  %v820_v6 = vunpack.c.l.b16 %v707_v49  ;;  %v1129_v15 = vshrl.u32 %v1063_v32, 16  ;;  %v1132_v36 = vshll.u32 %v1063_v32, 16  ;;  %v5378_v52 = vpop.f32.mrf.mxu3  ;;  %v5382_v44 = vld [vmem:[%s4238_s20 + $0x4c] sm:$0xf] }
  0xf7   : > { %v1646_v62 = vunpack.c.l.b16 %v1595_v30  ;;  %v821_v0 = vunpack.c.h.b16 %v707_v49  ;;  %vm1577_vm8 = vcmp.ne.s32.totalorder %v1573_v63, %v4228_v53  ;;  %6043 = vst [vmem:[#allocation21_spill] sm:$0xff] %v5376_v28  ;;  %v1211_v37 = vpop.f32.mrf.mxu1  ;;  %v5384_v32 = vpop.f32.mrf.mxu0  ;;  %vm1578_vm4 = vcmp.ne.s32.totalorder %v1574_v21, %v4234_v55  ;;  %v4030_v28 = vld [vmem:[%s4238_s20 + $0x18] sm:$0xf] }
  0xf8   : > { %v1987_v25 = vshrl.u32 %v1922_v4, 16  ;;  %v1990_v34 = vshll.u32 %v1922_v4, 16  ;;  %vm824_vm14 = vcmp.ne.s32.totalorder %v820_v6, %v4228_v53  ;;  %6044 = vst [vmem:[#allocation22_spill] sm:$0xff] %v5378_v52  ;;  %v1131_v31 = vrot.slane %v1129_v15, 3 }
  0xf9   : > { %v1134_v56 = vrot.slane %v1132_v36, 4  ;;  %v1655_v45 = vpack.c.b16 %v1646_v62, %v1645_v11  ;;  %vm825_vm6 = vcmp.ne.s32.totalorder %v821_v0, %v4234_v55  ;;  %6045 = vst [vmem:[#allocation23_spill] sm:$0xff] %v5382_v44  ;;  %v6046_v4 = vmov 0 }
  0xfa   : > { %v1989_v49 = vrot.slane %v1987_v25, 3  ;;  %v1992_v30 = vrot.slane %v1990_v34, 4  ;;  %vm5386_vm5 = vmpackc.low %vm825_vm6, %vm824_vm14  ;;  %v5392_v6 = vadd.f32 %v1211_v37, %v5174_v24  ;;  %v1712_v11 = vor.u32 %v1710_v43, %v5263_v20 }
  0xfb   : > { %v6047_v4 = vsel %vm5386_vm5, 4294967295, %v6046_v4  ;;  %v5394_v15 = vor.u32 %v1134_v56, %v1131_v31  ;;  %v1714_v36 = vshll.u32 %v1655_v45, 16  ;;  %v843_v62 = vsel %vm5386_vm5, %v5300_v9, 0  ;;  %vm5402_vm14 = vmpackc.low %vm1578_vm4, %vm1577_vm8 }
  0xfc   : > { %6048 = vst [vmem:[#allocation24_spill] sm:$0xff] %v6047_v4  ;;  %v6049_v34 = vmov 0  ;;  %v5406_v0 = vor.u32 %v1992_v30, %v1989_v49  ;;  %v1055_v55 = vunpack.c.l.b16 %v843_v62  ;;  %v1596_v24 = vsel %vm5402_vm14, %v5311_v61, 0  ;;  %v4029_v4 = vld [vmem:[%s4238_s20 + $0x14] sm:$0xf] }
  0xfd   : > { %v6050_v34 = vsel %vm5402_vm14, 4294967295, %v6049_v34  ;;  %v1863_v20 = vsel %vm5386_vm5, %v5382_v44, 0  ;;  %vm6052_vm6 = vsmask.f32 4352  ;;  %v1716_v53 = vrot.slane %v1714_v36, 1 }
  0xfe   : > { %6051 = vst [vmem:[#allocation25_spill] sm:$0xff] %v6050_v34  ;;  %v1136_v31 = vsel %vm6052_vm6, %v5261_v29, %v5394_v15  ;;  %v1647_v63 = vunpack.c.l.b16 %v1596_v24  ;;  %v1914_v56 = vunpack.c.l.b16 %v1863_v20  ;;  %vm6053_vm8 = vmmov %vm6052_vm6  ;;  %v1064_v21 = vpack.c.b16 %v1055_v55, %v1055_v55  ;;  %v1791_v29 = vpop.f32.mrf.mxu2  ;;  %v5421_v36 = vpop.f32.mrf.mxu3 }
  0xff   : > { %1240 = vmatmul.bf16.gmra.mxu1 %v1136_v31  ;;  %v1994_v43 = vsel %vm6053_vm8, %v5265_v58, %v5406_v0  ;;  %vm6054_vm4 = vsmask.f32 7424  ;;  %v5423_v31 = vpop.f32.mrf.mxu1  ;;  %v5425_v58 = vpop.f32.mrf.mxu0  ;;  %v1718_v55 = vshrl.u32 %v1655_v45, 16  ;;  %vm6057_vm6 = vnez %v5928_v35 }
 0x100   : > { %v1717_v25 = vsel %vm6054_vm4, %v1712_v11, %v1716_v53  ;;  %2098 = vmatmul.bf16.gmra.mxu3 %v1994_v43  ;;  %v1656_v37 = vpack.c.b16 %v1647_v63, %v1647_v63  ;;  %v1923_v49 = vpack.c.b16 %v1914_v56, %v1914_v56  ;;  %v1138_v30 = vshrl.u32 %v1064_v21, 16  ;;  %6055 = vst [vmem:[#allocation26_spill] sm:$0xff] %v5423_v31  ;;  %v4028_v43 = vld [vmem:[%s4238_s20 + $0x10] sm:$0xf] }
 0x101   : > { %1820 = vmatmul.bf16.gmra.mxu2 %v1717_v25  ;;  %v1141_v62 = vshll.u32 %v1064_v21, 16  ;;  %6056 = vst [vmem:[#allocation27_spill] sm:$0xff] %v5425_v58  ;;  %v2261_v63 = vsel %vm4469_vm11, %v4028_v43, 0  ;;  %v2263_v31 = vsel %vm4532_vm12, %v4030_v28, 0  ;;  %v2527_v45 = vsel %vm6057_vm6, %v4029_v4, 0 }
 0x102   : > { %v1996_v24 = vshrl.u32 %v1923_v49, 16  ;;  %v1999_v20 = vshll.u32 %v1923_v49, 16  ;;  %v1722_v11 = vshll.u32 %v1656_v37, 16  ;;  %v1140_v56 = vrot.slane %v1138_v30, 3  ;;  %v4031_v43 = vld [vmem:[%s4238_s20 + $0x1c] sm:$0xf] }
 0x103   : > { %v1143_v21 = vrot.slane %v1141_v62, 4  ;;  %v2262_v49 = vsel %vm4516_vm3, %v4029_v4, 0  ;;  %vm6058_vm8 = vnez %v5930_v3  ;;  %vm6059_vm4 = vnez %v5932_v8  ;;  %v5446_v58 = vld [vmem:[%s4238_s20 + $0x20] sm:$0xf] }
 0x104   : > { %v1998_v25 = vrot.slane %v1996_v24, 3  ;;  %v2001_v52 = vrot.slane %v1999_v20, 4  ;;  %v2528_v37 = vsel %vm6058_vm8, %v4030_v28, 0  ;;  %v2529_v30 = vsel %vm6059_vm4, %v4031_v43, 0 }
 0x105   : > { %v1720_v62 = vor.u32 %v1718_v55, %v1716_v53  ;;  %vm6060_vm5 = vnez %v5950_v1  ;;  %v2312_v20 = vunpack.c.l.b16 %v2261_v63  ;;  %vm6061_vm14 = vnez %v5934_v19 }
 0x106   : > { %v2264_v24 = vsel %vm6060_vm5, %v4031_v43, 0  ;;  %v2530_v35 = vsel %vm6061_vm14, %v5446_v58, 0  ;;  %v1144_v4 = vor.u32 %v1143_v21, %v1140_v56  ;;  %v1724_v34 = vrot.slane %v1722_v11, 1  ;;  %v5453_v55 = vpop.f32.mrf.mxu2  ;;  %v5455_v63 = vpop.f32.mrf.mxu3 }
 0x107   : > { %v2002_v3 = vor.u32 %v2001_v52, %v1998_v25  ;;  %v2313_v7 = vunpack.c.l.b16 %v2262_v49  ;;  %v2578_v17 = vunpack.c.l.b16 %v2527_v45  ;;  %v2579_v44 = vunpack.c.l.b16 %v2528_v37  ;;  %6062 = vst [vmem:[#allocation28_spill] sm:$0xff] %v5453_v55  ;;  %v5463_v52 = vld [vmem:[%s4238_s20 + $0x24] sm:$0xf]  ;;  %v1216_v27 = vpop.f32.mrf.mxu1 }
 0x108   : > { %v2580_v8 = vunpack.c.l.b16 %v2529_v30  ;;  %v2941_v53 = vsel %vm4469_vm11, %v4030_v28, 0  ;;  %6063 = vst [vmem:[#allocation29_spill] sm:$0xff] %v5455_v63  ;;  %v2581_v41 = vunpack.c.l.b16 %v2530_v35  ;;  %v2942_v61 = vsel %vm4516_vm3, %v4031_v43, 0  ;;  %v5468_v28 = vpop.f32.mrf.mxu0 }
 0x109   : > { %v2943_v19 = vsel %vm4532_vm12, %v5446_v58, 0  ;;  %v2944_v11 = vsel %vm6060_vm5, %v5463_v52, 0  ;;  %v2314_v56 = vunpack.c.l.b16 %v2263_v31  ;;  %v2315_v21 = vunpack.c.l.b16 %v2264_v24 }
 0x10a   : > { %v2992_v25 = vunpack.c.l.b16 %v2941_v53  ;;  %v2993_v49 = vunpack.c.l.b16 %v2942_v61  ;;  %vm6064_vm11 = vsmask.f32 4352  ;;  %v2329_v45 = vpack.c.b16 %v2313_v7, %v2312_v20 }
 0x10b   : > { %v1145_v46 = vsel %vm6064_vm11, %v5394_v15, %v1144_v4  ;;  %v2994_v37 = vunpack.c.l.b16 %v2943_v19  ;;  %v2995_v54 = vunpack.c.l.b16 %v2944_v11  ;;  %vm6065_vm3 = vmmov %vm6064_vm11  ;;  %v2595_v30 = vpack.c.b16 %v2579_v44, %v2578_v17 }
 0x10c   : > { %v2003_v43 = vsel %vm6065_vm3, %v5406_v0, %v2002_v3  ;;  %v3009_v35 = vpack.c.b16 %v2993_v49, %v2992_v25  ;;  %v1831_v1 = vadd.f32 %v1791_v29, %v5392_v6  ;;  %vm6066_vm12 = vsmask.f32 7424 }
 0x10d   : > { %v1725_v63 = vsel %vm6066_vm12, %v1720_v62, %v1724_v34  ;;  %v2596_v55 = vpack.c.b16 %v2581_v41, %v2580_v8  ;;  %v5476_v31 = vpack.c.b16 %v2995_v54, %v2994_v37  ;;  %v5478_v15 = vpack.c.b16 %v2315_v21, %v2314_v56  ;;  %v5491_v56 = vld [vmem:[%s4238_s20 + $0x28] sm:$0xf]  ;;  %vm6069_vm6 = vmmov %vm6066_vm12 }
 0x10e   : > { %v3019_v61 = vshrl.u32 %v3009_v35, 16  ;;  %v3021_v24 = vshll.u32 %v3009_v35, 16  ;;  %v2341_v7 = vshll.u32 %v2329_v45, 16  ;;  %v5482_v0 = vadd.f32 %v5421_v36, %v1831_v1  ;;  %v1796_v34 = vpop.f32.mrf.mxu2  ;;  %v2074_v29 = vpop.f32.mrf.mxu3  ;;  %vm6072_vm11 = vmmov %vm6069_vm6 }
 0x10f   : > { %1245 = vmatmul.bf16.gmra.mxu1 %v1145_v46  ;;  %v3026_v20 = vshll.u32 %v5476_v31, 16  ;;  %v2605_v17 = vshrl.u32 %v2595_v30, 16  ;;  %v2608_v44 = vshll.u32 %v2595_v30, 16  ;;  %v1217_v6 = vadd.f32 %v1216_v27, %v5290_v51  ;;  %v5485_v8 = vpop.f32.mrf.mxu1  ;;  %v5497_v27 = vld [vmem:[%s4238_s20 + $0x2c] sm:$0xf] }
 0x110   : > { %2103 = vmatmul.bf16.gmra.mxu3 %v2003_v43  ;;  %v3023_v41 = vrot.slane %v3021_v24, 1  ;;  %v2613_v62 = vshrl.u32 %v2596_v55, 16  ;;  %v2616_v4 = vshll.u32 %v2596_v55, 16  ;;  %v5487_v53 = vpop.f32.mrf.mxu0  ;;  %v2339_v19 = vshrl.u32 %v2329_v45, 16 }
 0x111   : > { %1825 = vmatmul.bf16.gmra.mxu2 %v1725_v63  ;;  %v3028_v3 = vrot.slane %v3026_v20, 1  ;;  %v2343_v11 = vrot.slane %v2341_v7, 1  ;;  %v2346_v63 = vshll.u32 %v5478_v15, 16  ;;  %vm6067_vm5 = vnez %v5954_v48 }
 0x112   : > { %v3024_v36 = vor.u32 %v3023_v41, %v3019_v61  ;;  %v2945_v51 = vsel %vm6067_vm5, %v5491_v56, 0  ;;  %vm6068_vm14 = vnez %v5958_v10  ;;  %v2607_v21 = vrot.slane %v2605_v17, 3 }
 0x113   : > { %v2946_v55 = vsel %vm6068_vm14, %v5497_v27, 0  ;;  %v2610_v25 = vrot.slane %v2608_v44, 4  ;;  %v2615_v46 = vrot.slane %v2613_v62, 3  ;;  %v2618_v45 = vrot.slane %v2616_v4, 4 }
 0x114   : > { %v3029_v49 = vsel %vm6069_vm6, %v3024_v36, %v3028_v3  ;;  %v2996_v37 = vunpack.c.l.b16 %v2945_v51  ;;  %v2997_v54 = vunpack.c.l.b16 %v2946_v55  ;;  %vm6070_vm8 = vnez %v5952_v38  ;;  %v4036_v55 = vld [vmem:[%s4238_s20 + $0x18] sm:$0xff] }
 0x115   : > { %3150 = vmatmul.bf16.vlgmr.msra.gmra.mxu0 %v3029_v49  ;;  %v2531_v43 = vsel %vm6070_vm8, %v5463_v52, 0  ;;  %vm6071_vm4 = vnez %v5956_v57  ;;  %v1833_v35 = vadd.f32 %v1796_v34, %v1217_v6  ;;  %v2344_v1 = vor.u32 %v2343_v11, %v2339_v19 }
 0x116   : > { %v2532_v30 = vsel %vm6071_vm4, %v5491_v56, 0  ;;  %v2348_v61 = vrot.slane %v2346_v63, 1  ;;  %v5509_v24 = vpack.c.b16 %v2997_v54, %v2996_v37  ;;  %v2265_v7 = vsel %vm6067_vm5, %v5446_v58, 0  ;;  %v5517_v38 = vpop.f32.mrf.mxu2  ;;  %v5519_v44 = vpop.f32.mrf.mxu3  ;;  %vm6078_vm4 = vmmov %vm6072_vm11 }
 0x117   : > { %v2266_v20 = vsel %vm6068_vm14, %v5463_v52, 0  ;;  %v2111_v17 = vadd.f32 %v2074_v29, %v1833_v35  ;;  %v2611_v57 = vor.u32 %v2610_v25, %v2607_v21  ;;  %v2619_v41 = vor.u32 %v2618_v45, %v2615_v46  ;;  %v1221_v62 = vpop.f32.mrf.mxu1  ;;  %vm6075_vm14 = vmmov %vm6069_vm6 }
 0x118   : > { %v2582_v6 = vunpack.c.l.b16 %v2531_v43  ;;  %v2583_v34 = vunpack.c.l.b16 %v2532_v30  ;;  %v3030_v4 = vshrl.u32 %v5476_v31, 16  ;;  %v3034_v48 = vshll.u32 %v5509_v24, 16  ;;  %v2215_v10 = vpop.f32.mrf.mxu0  ;;  %v5530_v31 = vld [vmem:[%s4238_s20 + $0x30] sm:$0xf] }
 0x119   : > { %v1222_v58 = vadd.f32 %v1221_v62, %v5172_v14  ;;  %v2349_v52 = vsel %vm6072_vm11, %v2344_v1, %v2348_v61  ;;  %v2316_v29 = vunpack.c.l.b16 %v2265_v7  ;;  %v2317_v19 = vunpack.c.l.b16 %v2266_v20  ;;  %vm6079_vm11 = vmmov %vm6065_vm3 }
 0x11a   : > { %v2620_v36 = vsel %vm6065_vm3, %v2611_v57, %v2619_v41  ;;  %v2597_v11 = vpack.c.b16 %v2583_v34, %v2582_v6  ;;  %v3032_v63 = vor.u32 %v3030_v4, %v3028_v3  ;;  %v3036_v51 = vrot.slane %v3034_v48, 1 }
 0x11b   : > { %v5527_v21 = vpack.c.b16 %v2317_v19, %v2316_v29  ;;  %vm6073_vm12 = vnez %v5969_v40  ;;  %vm6074_vm5 = vnez %v5971_v60  ;;  %v2350_v35 = vshrl.u32 %v5478_v15, 16 }
 0x11c   : > { %v2947_v14 = vsel %vm6073_vm12, %v5530_v31, 0  ;;  %v2948_v25 = vsel %vm6074_vm5, %v5016_v47, 0  ;;  %v2622_v46 = vshrl.u32 %v2597_v11, 16  ;;  %v2625_v45 = vshll.u32 %v2597_v11, 16 }
 0x11d   : > { %v3037_v37 = vsel %vm6075_vm14, %v3032_v63, %v3036_v51  ;;  %v2998_v54 = vunpack.c.l.b16 %v2947_v14  ;;  %v2999_v43 = vunpack.c.l.b16 %v2948_v25  ;;  %v2354_v1 = vshll.u32 %v5527_v21, 16  ;;  %v4038_v25 = vld [vmem:[%s4238_s20 + $0x20] sm:$0xff] }
 0x11e   : > { %v1801_v49 = vpop.f32.mrf.mxu2  ;;  %v2079_v30 = vpop.f32.mrf.mxu3  ;;  %v2624_v47 = vrot.slane %v2622_v46, 3  ;;  %v2627_v6 = vrot.slane %v2625_v45, 4  ;;  %vm6076_vm6 = vnez %v5965_v42  ;;  %vm6077_vm8 = vnez %v5967_v22  ;;  %v5581_v46 = vld [vmem:[%s4238_s20 + $0x38] sm:$0xf] }
 0x11f   : > { %2470 = vmatmul.bf16.vlgmr.msra.gmra.mxu1 %v2349_v52  ;;  %v1835_v3 = vadd.f32 %v1801_v49, %v1222_v58  ;;  %v5541_v20 = vpop.f32.mrf.mxu1  ;;  %v2533_v34 = vsel %vm6076_vm6, %v5497_v27, 0  ;;  %v2534_v62 = vsel %vm6077_vm8, %v5530_v31, 0  ;;  %v5551_v4 = vpack.c.b16 %v2999_v43, %v2998_v54  ;;  %vm6085_vm8 = vmmov %vm6078_vm4 }
 0x120   : > { %2884 = vmatmul.bf16.vlgmr.msra.gmra.mxu3 %v4036_v55  ;;  %v5543_v57 = vpop.f32.mrf.mxu0  ;;  %v5555_v15 = vadd.f32 %v5384_v32, %v5482_v0  ;;  %v5558_v48 = vadd.f32 %v5468_v28, %v2111_v17  ;;  %v2352_v58 = vor.u32 %v2350_v35, %v2348_v61  ;;  %v2356_v52 = vrot.slane %v2354_v1, 1 }
 0x121   : > { %2748 = vmatmul.bf16.vlgmr.msra.gmra.mxu2 %v2620_v36  ;;  %v2113_v7 = vadd.f32 %v2079_v30, %v1835_v3  ;;  %v2267_v42 = vsel %vm6073_vm12, %v5491_v56, 0  ;;  %v2268_v22 = vsel %vm6074_vm5, %v5497_v27, 0  ;;  %v2628_v19 = vor.u32 %v2627_v6, %v2624_v47  ;;  %vm6082_vm5 = vmmov %vm6078_vm4  ;;  %v4040_v47 = vld [vmem:[%s4238_s20 + $0x34] sm:$0xf] }
 0x122   : > { %v2584_v36 = vunpack.c.l.b16 %v2533_v34  ;;  %v2585_v11 = vunpack.c.l.b16 %v2534_v62  ;;  %v3038_v32 = vshrl.u32 %v5509_v24, 16  ;;  %v3042_v28 = vshll.u32 %v5551_v4, 16 }
 0x123   : > { %v5566_v29 = vadd.f32 %v2215_v10, %v2113_v7  ;;  %v2357_v0 = vsel %vm6078_vm4, %v2352_v58, %v2356_v52  ;;  %v2318_v61 = vunpack.c.l.b16 %v2267_v42  ;;  %v2319_v40 = vunpack.c.l.b16 %v2268_v22  ;;  %vm6086_vm4 = vmmov %vm6079_vm11 }
 0x124   : > { %v2629_v60 = vsel %vm6079_vm11, %v2619_v41, %v2628_v19  ;;  %v2598_v27 = vpack.c.b16 %v2585_v11, %v2584_v36  ;;  %v3040_v63 = vor.u32 %v3038_v32, %v3036_v51  ;;  %v3044_v55 = vrot.slane %v3042_v28, 1 }
 0x125   : > { %3155 = vmatmul.bf16.gmra.mxu0 %v3037_v37  ;;  %v5578_v49 = vpack.c.b16 %v2319_v40, %v2318_v61  ;;  %vm6080_vm3 = vnez %v5981_v39  ;;  %vm6081_vm12 = vnez %v5983_v50  ;;  %v2358_v43 = vshrl.u32 %v5527_v21, 16 }
 0x126   : > { %v5571_v56 = vpop.f32.mrf.mxu2  ;;  %v5574_v17 = vpop.f32.mrf.mxu3  ;;  %v2949_v41 = vsel %vm6080_vm3, %v5581_v46, 0  ;;  %v2950_v45 = vsel %vm6081_vm12, %v5168_v12, 0  ;;  %v2631_v51 = vshrl.u32 %v2598_v27, 16  ;;  %v2634_v3 = vshll.u32 %v2598_v27, 16 }
 0x127   : > { %v1226_v10 = vpop.f32.mrf.mxu1  ;;  %v3000_v37 = vunpack.c.l.b16 %v2949_v41  ;;  %v3001_v54 = vunpack.c.l.b16 %v2950_v45  ;;  %v2362_v30 = vshll.u32 %v5578_v49, 16  ;;  %vm6083_vm14 = vnez %v5977_v23 }
 0x128   : > { %v1227_v24 = vadd.f32 %v1226_v10, %v5288_v59  ;;  %v2220_v14 = vpop.f32.mrf.mxu0  ;;  %v3045_v59 = vsel %vm6082_vm5, %v3040_v63, %v3044_v55  ;;  %v2633_v35 = vrot.slane %v2631_v51, 3  ;;  %v2636_v1 = vrot.slane %v2634_v3, 4 }
 0x129   : > { %v2535_v6 = vsel %vm6083_vm14, %v4040_v47, 0  ;;  %vm6084_vm6 = vnez %v5979_v18  ;;  %v5598_v62 = vpack.c.b16 %v3001_v54, %v3000_v37  ;;  %v2360_v42 = vor.u32 %v2358_v43, %v2356_v52 }
 0x12a   : > { %v2536_v34 = vsel %vm6084_vm6, %v5581_v46, 0  ;;  %v2364_v22 = vrot.slane %v2362_v30, 1  ;;  %v2269_v36 = vsel %vm6080_vm3, %v5530_v31, 0  ;;  %v2270_v11 = vsel %vm6081_vm12, %v4040_v47, 0  ;;  %vm6089_vm12 = vmmov %vm6082_vm5 }
 0x12b   : > { %v2637_v28 = vor.u32 %v2636_v1, %v2633_v35  ;;  %v2586_v18 = vunpack.c.l.b16 %v2535_v6  ;;  %v3046_v61 = vshrl.u32 %v5551_v4, 16  ;;  %v3050_v52 = vshll.u32 %v5598_v62, 16  ;;  %vm6092_vm6 = vmmov %vm6085_vm8 }
 0x12c   : > { %v2320_v39 = vunpack.c.l.b16 %v2269_v36  ;;  %v2321_v31 = vunpack.c.l.b16 %v2270_v11  ;;  %vm6087_vm11 = vnez %v5993_v13  ;;  %vm6088_vm3 = vnez %v5995_v16 }
 0x12d   : > { %v2638_v50 = vsel %vm6086_vm4, %v2628_v19, %v2637_v28  ;;  %v3048_v10 = vor.u32 %v3046_v61, %v3044_v55  ;;  %v3052_v63 = vrot.slane %v3050_v52, 1  ;;  %v2951_v4 = vsel %vm6087_vm11, %v5182_v2, 0 }
 0x12e   : > { %v1806_v7 = vpop.f32.mrf.mxu2  ;;  %v2084_v21 = vpop.f32.mrf.mxu3  ;;  %v5616_v41 = vpack.c.b16 %v2321_v31, %v2320_v39  ;;  %v3002_v3 = vunpack.c.l.b16 %v2951_v4  ;;  %v2366_v37 = vshrl.u32 %v5578_v49, 16  ;;  %vm6090_vm5 = vnez %v5989_v5  ;;  %v4042_v31 = vld [vmem:[%s4238_s20 + $0x30] sm:$0xff]  ;;  %v6096_v4 = vld [vmem:[#allocation23_spill] sm:$0xff] }
 0x12f   : > { %2475 = vmatmul.bf16.gmra.mxu1 %v2357_v0  ;;  %v1837_v58 = vadd.f32 %v1806_v7, %v1227_v24  ;;  %v2587_v0 = vunpack.c.l.b16 %v2536_v34  ;;  %v5613_v24 = vpop.f32.mrf.mxu1  ;;  %v3053_v55 = vsel %vm6089_vm12, %v3048_v10, %v3052_v63  ;;  %v2537_v7 = vsel %vm6090_vm5, %v5168_v12, 0  ;;  %v5685_v10 = vld [vmem:[%s4238_s20 + $0x54] sm:$0xf] }
 0x130   : > { %2889 = vmatmul.bf16.gmra.mxu3 %v4038_v25  ;;  %v5605_v23 = vpop.f32.mrf.mxu0  ;;  %v4041_v25 = vld [vmem:[%s4238_s20 + $0x28] sm:$0xff]  ;;  %v2370_v54 = vshll.u32 %v5616_v41, 16  ;;  %vm6091_vm14 = vnez %v5991_v33  ;;  %v2368_v49 = vor.u32 %v2366_v37, %v2364_v22  ;;  %v2588_v5 = vunpack.c.l.b16 %v2537_v7 }
 0x131   : > { %2753 = vmatmul.bf16.gmra.mxu2 %v2629_v60  ;;  %v2115_v32 = vadd.f32 %v2084_v21, %v1837_v58  ;;  %v2365_v60 = vsel %vm6085_vm8, %v2360_v42, %v2364_v22  ;;  %v2599_v27 = vpack.c.b16 %v2587_v0, %v2586_v18  ;;  %v2538_v47 = vsel %vm6091_vm14, %v5182_v2, 0  ;;  %vm6093_vm8 = vmmov %vm6086_vm4 }
 0x132   : > { %v2372_v34 = vrot.slane %v2370_v54, 1  ;;  %v2271_v42 = vsel %vm6087_vm11, %v5581_v46, 0  ;;  %v2272_v21 = vsel %vm6088_vm3, %v5168_v12, 0  ;;  %v2589_v11 = vunpack.c.l.b16 %v2538_v47  ;;  %vm6098_vm4 = vmmov %vm6092_vm6  ;;  %v6099_v47 = vld [vmem:[#allocation9_spill] sm:$0xff] }
 0x133   : > { %v5609_v40 = vadd.f32 %v2220_v14, %v2115_v32  ;;  %v2952_v14 = vsel %vm6088_vm3, %v5300_v9, 0  ;;  %v2640_v19 = vshrl.u32 %v2599_v27, 16  ;;  %v2643_v45 = vshll.u32 %v2599_v27, 16  ;;  %v6094_v27 = vld [vmem:[#allocation12_spill] sm:$0xff] }
 0x134   : > { %v3054_v33 = vshrl.u32 %v5598_v62, 16  ;;  %v2373_v22 = vsel %vm6092_vm6, %v2368_v49, %v2372_v34  ;;  %v2322_v18 = vunpack.c.l.b16 %v2271_v42  ;;  %v2323_v0 = vunpack.c.l.b16 %v2272_v21 }
 0x135   : > { %3160 = vmatmul.bf16.gmra.mxu0 %v3045_v59  ;;  %v3003_v59 = vunpack.c.l.b16 %v2952_v14  ;;  %v2642_v35 = vrot.slane %v2640_v19, 3  ;;  %v2645_v1 = vrot.slane %v2643_v45, 4  ;;  %v2600_v52 = vpack.c.b16 %v2589_v11, %v2588_v5 }
 0x136   : > { %v5627_v43 = vpop.f32.mrf.mxu2  ;;  %v5629_v30 = vpop.f32.mrf.mxu3  ;;  %v3056_v16 = vor.u32 %v3054_v33, %v3052_v63  ;;  %v5651_v62 = vpack.c.b16 %v2323_v0, %v2322_v18  ;;  %v2374_v37 = vshrl.u32 %v5616_v41, 16  ;;  %v2539_v5 = vsel %vm5163_vm2, %v5300_v9, 0  ;;  %vm6102_vm2 = vmmov %vm6098_vm4 }
 0x137   : > { %v5637_v6 = vpack.c.b16 %v3003_v59, %v3002_v3  ;;  %v2646_v36 = vor.u32 %v2645_v1, %v2642_v35  ;;  %v2652_v19 = vshll.u32 %v2600_v52, 16  ;;  %v2540_v41 = vsel %vm5195_vm7, %v6094_v27, 0  ;;  %vm6106_vm7 = vmmov %vm6102_vm2 }
 0x138   : > { %v2225_v51 = vpop.f32.mrf.mxu0  ;;  %v2378_v54 = vshll.u32 %v5651_v62, 16  ;;  %v2273_v0 = vsel %vm5205_vm10, %v5182_v2, 0  ;;  %v2541_v11 = vsel %vm5295_vm1, %v6096_v4, 0  ;;  %vm6111_vm1 = vmmov %vm6093_vm8 }
 0x139   : > { %v3058_v32 = vshll.u32 %v5637_v6, 16  ;;  %v2647_v13 = vsel %vm6093_vm8, %v2637_v28, %v2646_v36  ;;  %v2954_v28 = vsel %vm5215_vm15, %v6096_v4, 0  ;;  %v2654_v7 = vrot.slane %v2652_v19, 4  ;;  %v5691_v19 = vld [vmem:[%s4238_s20 + $0x50] sm:$0xf]  ;;  %vm6118_vm11 = vmmov %vm6102_vm2 }
 0x13a   : > { %v3005_v59 = vunpack.c.l.b16 %v2954_v28  ;;  %vm6119_vm3 = vmmov %vm6111_vm1 }
 0x13b   : > { %v3060_v12 = vrot.slane %v3058_v32, 1  ;;  %v2380_v32 = vrot.slane %v2378_v54, 1  ;;  %vm6122_vm12 = vmmov %vm6102_vm2 }
 0x13c   : > { %vm6124_vm5 = vmmov %vm6102_vm2 }
 0x13d   : > { %v3061_v45 = vsel %vm6098_vm4, %v3056_v16, %v3060_v12  ;;  %v2590_v16 = vunpack.c.l.b16 %v2539_v5  ;;  %vm6125_vm14 = vmmov %vm6111_vm1 }
 0x13f   : > { %2480 = vmatmul.bf16.gmra.mxu1 %v2365_v60 }
 0x140   : > { %2894 = vmatmul.bf16.gmra.mxu3 %v4041_v25  ;;  %v2227_v61 = vpop.f32.mrf.mxu0  ;;  %v2953_v25 = vsel %vm5205_vm10, %v6094_v27, 0  ;;  %vm6103_vm10 = vmmov %vm6093_vm8 }
 0x141   : > { %2758 = vmatmul.bf16.gmra.mxu2 %v2638_v50  ;;  %v1231_v58 = vpop.f32.mrf.mxu1  ;;  %v3004_v3 = vunpack.c.l.b16 %v2953_v25 }
 0x142   : > { %v1232_v46 = vadd.f32 %v1231_v58, %v5235_v26  ;;  %v2649_v26 = vshrl.u32 %v2600_v52, 16 }
 0x143   : > { %v5673_v33 = vpack.c.b16 %v3005_v59, %v3004_v3 }
 0x144   : > { %v2651_v1 = vrot.slane %v2649_v26, 3 }
 0x145   : > { %3165 = vmatmul.bf16.gmra.mxu0 %v3053_v55 }
 0x148   : > { %v2089_v39 = vpop.f32.mrf.mxu3  ;;  %v5665_v42 = vpop.f32.mrf.mxu0 }
 0x149   : > { %v1233_v55 = vpop.f32.mrf.mxu1 }
 0x14a   : > { %v1811_v60 = vpop.f32.mrf.mxu2  ;;  %v1234_v49 = vadd.f32 %v1233_v55, %v6099_v47  ;;  %v2955_v55 = vsel %vm5359_vm13, %v5691_v19, 0 }
 0x14b   : > { %v1839_v50 = vadd.f32 %v1811_v60, %v1232_v46  ;;  %v2655_v46 = vor.u32 %v2654_v7, %v2651_v1  ;;  %v2591_v60 = vunpack.c.l.b16 %v2540_v41  ;;  %v3006_v54 = vunpack.c.l.b16 %v2955_v55 }
 0x14c   : > { %v2382_v7 = vshrl.u32 %v5651_v62, 16  ;;  %v2275_v62 = vsel %vm5359_vm13, %v6094_v27, 0  ;;  %vm6115_vm13 = vmmov %vm6102_vm2 }
 0x14d   : > { %v2117_v63 = vadd.f32 %v2089_v39, %v1839_v50  ;;  %v3062_v39 = vshrl.u32 %v5637_v6, 16  ;;  %v2324_v50 = vunpack.c.l.b16 %v2273_v0  ;;  %v2601_v14 = vpack.c.b16 %v2591_v60, %v2590_v16 }
 0x14e   : > { %v2592_v16 = vunpack.c.l.b16 %v2541_v11  ;;  %v2326_v27 = vunpack.c.l.b16 %v2275_v62 }
 0x14f   : > { %2485 = vmatmul.bf16.gmra.mxu1 %v2373_v22  ;;  %v5662_v35 = vadd.f32 %v2225_v51, %v2117_v63  ;;  %v2376_v51 = vor.u32 %v2374_v37, %v2372_v34  ;;  %v3066_v34 = vshll.u32 %v5673_v33, 16  ;;  %v3064_v28 = vor.u32 %v3062_v39, %v3060_v12  ;;  %v4043_v63 = vld [vmem:[%s4238_s20 + $0x38] sm:$0xff]  ;;  %v6109_v39 = vld [vmem:[#allocation14_spill] sm:$0xff] }
 0x150   : > { %2899 = vmatmul.bf16.gmra.mxu3 %v4042_v31  ;;  %v2091_v18 = vpop.f32.mrf.mxu3  ;;  %v2658_v59 = vshrl.u32 %v2601_v14, 16  ;;  %v2661_v12 = vshll.u32 %v2601_v14, 16 }
 0x151   : > { %2763 = vmatmul.bf16.gmra.mxu2 %v2647_v13  ;;  %v2274_v13 = vsel %vm5215_vm15, %v5300_v9, 0  ;;  %v2381_v31 = vsel %vm6102_vm2, %v2376_v51, %v2380_v32  ;;  %v2656_v9 = vsel %vm6103_vm10, %v2646_v36, %v2655_v46  ;;  %v3068_v26 = vrot.slane %v3066_v34, 1  ;;  %v5702_v36 = vpop.f32.mrf.mxu0  ;;  %vm6110_vm15 = vmmov %vm6102_vm2 }
 0x152   : > { %v1813_v58 = vpop.f32.mrf.mxu2  ;;  %v2325_v25 = vunpack.c.l.b16 %v2274_v13  ;;  %v2663_v21 = vrot.slane %v2661_v12, 4  ;;  %v2542_v51 = vsel %vm5333_vm9, %v5691_v19, 0  ;;  %v2276_v13 = vsel %vm5363_vm0, %v6096_v4, 0  ;;  %v223_v4 = vld [vmem:[%s4238_s20 + $0x58] sm:$0xf]  ;;  %v4044_v12 = vld [vmem:[%s4238_s20 + $0x40] sm:$0xff] }
 0x153   : > { %v1840_v22 = vadd.f32 %v1813_v58, %v1234_v49  ;;  %v3069_v37 = vsel %vm6106_vm7, %v3064_v28, %v3068_v26  ;;  %v2660_v58 = vrot.slane %v2658_v59, 3  ;;  %v2593_v60 = vunpack.c.l.b16 %v2542_v51 }
 0x154   : > { %v5694_v6 = vpack.c.b16 %v2325_v25, %v2324_v50  ;;  %v2327_v14 = vunpack.c.l.b16 %v2276_v13 }
 0x155   : > { %3170 = vmatmul.bf16.gmra.mxu0 %v3061_v45  ;;  %v2118_v52 = vadd.f32 %v2091_v18, %v1840_v22  ;;  %v2384_v18 = vor.u32 %v2382_v7, %v2380_v32  ;;  %v3070_v32 = vshrl.u32 %v5673_v33, 16  ;;  %v2602_v55 = vpack.c.b16 %v2593_v60, %v2592_v16 }
 0x156   : > { %v2386_v47 = vshll.u32 %v5694_v6, 16  ;;  %v2390_v11 = vshrl.u32 %v5694_v6, 16 }
 0x157   : > { %v5687_v2 = vadd.f32 %v2227_v61, %v2118_v52  ;;  %v2956_v61 = vsel %vm5363_vm0, %v5685_v10, 0  ;;  %v2664_v52 = vor.u32 %v2663_v21, %v2660_v58  ;;  %v6114_v58 = vld [vmem:[#allocation21_spill] sm:$0xff] }
 0x158   : > { %v3007_v1 = vunpack.c.l.b16 %v2956_v61  ;;  %v2388_v0 = vrot.slane %v2386_v47, 1  ;;  %v3072_v61 = vor.u32 %v3070_v32, %v3068_v26  ;;  %v2667_v47 = vshrl.u32 %v2602_v55, 16 }
 0x159   : > { %v2665_v45 = vsel %vm6111_vm1, %v2655_v46, %v2664_v52 }
 0x15a   : > { %v5713_v22 = vpack.c.b16 %v3007_v1, %v3006_v54  ;;  %v2389_v25 = vsel %vm6110_vm15, %v2384_v18, %v2388_v0  ;;  %v6112_v54 = vld [vmem:[#allocation25_spill] sm:$0xff]  ;;  %v2669_v13 = vrot.slane %v2667_v47, 3  ;;  %v2392_v32 = vor.u32 %v2390_v11, %v2388_v0 }
 0x15b   : > { %vm6113_vm9 = vnez %v6112_v54  ;;  %v6121_v54 = vld [vmem:[#allocation6_spill] sm:$0xff] }
 0x15c   : > { %v3074_v50 = vshll.u32 %v5713_v22, 16  ;;  %v2957_v1 = vsel %vm6113_vm9, %v223_v4, 0 }
 0x15d   : > { %v3008_v5 = vunpack.c.l.b16 %v2957_v1 }
 0x15e   : > { %v3076_v59 = vrot.slane %v3074_v50, 1 }
 0x15f   : > { %2490 = vmatmul.bf16.gmra.mxu1 %v2381_v31  ;;  %v5722_v31 = vpop.f32.mrf.mxu0 }
 0x160   : > { %2904 = vmatmul.bf16.gmra.mxu3 %v4043_v63  ;;  %v3077_v21 = vsel %vm6115_vm13, %v3072_v61, %v3076_v59 }
 0x161   : > { %2768 = vmatmul.bf16.gmra.mxu2 %v2656_v9 }
 0x163   : > { %v1236_v49 = vpop.f32.mrf.mxu1 }
 0x164   : > { %v1237_v34 = vadd.f32 %v1236_v49, %v6109_v39  ;;  %v2670_v49 = vshll.u32 %v2602_v55, 16 }
 0x165   : > { %3175 = vmatmul.bf16.gmra.mxu0 %v3069_v37  ;;  %v2336_v37 = vpack.c.b16 %v2327_v14, %v2326_v27  ;;  %v3078_v14 = vshrl.u32 %v5713_v22, 16 }
 0x166   : > { %v2672_v16 = vrot.slane %v2670_v49, 4 }
 0x167   : > { %v2394_v41 = vshll.u32 %v2336_v37, 16  ;;  %v2237_v18 = vpop.f32.mrf.mxu0 }
 0x169   : > { %v2396_v50 = vrot.slane %v2394_v41, 1 }
 0x16a   : > { %v1816_v9 = vpop.f32.mrf.mxu2 }
 0x16b   : > { %v1841_v28 = vadd.f32 %v1816_v9, %v1237_v34  ;;  %v2094_v63 = vpop.f32.mrf.mxu3  ;;  %v1238_v33 = vpop.f32.mrf.mxu1  ;;  %v3017_v34 = vpack.c.b16 %v3008_v5, %v3008_v5  ;;  %v2673_v9 = vor.u32 %v2672_v16, %v2669_v13  ;;  %v2397_v4 = vsel %vm6118_vm11, %v2392_v32, %v2396_v50  ;;  %v6123_v16 = vld [vmem:[#allocation10_spill] sm:$0xff]  ;;  %v3839_v32 = vld [vmem:[%s4238_s20 + $0x50] sm:$0xff]  ;;  %s3367_s20 = sshll.u32 %s4067_s12, 4 }
 0x16c   : > { %v1239_v46 = vadd.f32 %v1238_v33, %v6114_v58  ;;  %p187_p6 = scmp.lt.s32.totalorder %s3367_s20, 31 }
 0x16d   : > { %v2119_v3 = vadd.f32 %v2094_v63, %v1841_v28  ;;  %v3082_v28 = vshll.u32 %v3017_v34, 16 }
 0x16e   : > { %s6149_s20 = smov (!%p187_p6, %s3367_s20), 31 }
 0x16f   : > { %2495 = vmatmul.bf16.gmra.mxu1 %v2389_v25  ;;  %v5733_v7 = vadd.f32 %v5665_v42, %v2119_v3  ;;  %v6116_v42 = vld [vmem:[#allocation24_spill] sm:$0xff]  ;;  %v2277_v25 = vsel %vm6113_vm9, %v5691_v19, 0  ;;  %v2240_v55 = vpop.f32.mrf.mxu0  ;;  %v3080_v3 = vor.u32 %v3078_v14, %v3076_v59  ;;  %v3084_v61 = vrot.slane %v3082_v28, 1  ;;  %v6120_v19 = vld [vmem:[#allocation13_spill] sm:$0xff]  ;;  %s190_s12 = sadd.s32 %s3368_s19, %s6149_s20 }
 0x170   : > { %2909 = vmatmul.bf16.gmra.mxu3 %v4044_v12  ;;  %vm6117_vm0 = vnez %v6116_v42  ;;  %s3369_s21 = sshll.u32 %s190_s12, 2 }
 0x171   : > { %2773 = vmatmul.bf16.gmra.mxu2 %v2665_v45  ;;  %v2543_v39 = vsel %vm6117_vm0, %v5685_v10, 0  ;;  %v2328_v45 = vunpack.c.l.b16 %v2277_v25  ;;  %v2674_v10 = vsel %vm6119_vm3, %v2664_v52, %v2673_v9  ;;  %v3085_v47 = vsel %vm6122_vm12, %v3080_v3, %v3084_v61  ;;  %s5791_s23 = scalar_lea.vmem %s5854_s3, %s3369_s21 }
 0x172   : > { %v1818_v26 = vpop.f32.mrf.mxu2  ;;  %v2594_v27 = vunpack.c.l.b16 %v2543_v39 }
 0x173   : > { %v1842_v51 = vadd.f32 %v1818_v26, %v1239_v46  ;;  %v2096_v62 = vpop.f32.mrf.mxu3  ;;  %v2398_v46 = vshrl.u32 %v2336_v37, 16 }
 0x174   : > { %v2603_v0 = vpack.c.b16 %v2594_v27, %v2594_v27 }
 0x175   : > { %3180 = vmatmul.bf16.gmra.mxu0 %v3077_v21  ;;  %v2120_v60 = vadd.f32 %v2096_v62, %v1842_v51  ;;  %v2400_v11 = vor.u32 %v2398_v46, %v2396_v50 }
 0x176   : > { %v2676_v12 = vshrl.u32 %v2603_v0, 16  ;;  %v2679_v33 = vshll.u32 %v2603_v0, 16 }
 0x177   : > { %v5745_v6 = vadd.f32 %v5702_v36, %v2120_v60  ;;  %v2337_v36 = vpack.c.b16 %v2328_v45, %v2328_v45  ;;  %v2242_v51 = vpop.f32.mrf.mxu0 }
 0x178   : > { %v2678_v5 = vrot.slane %v2676_v12, 3  ;;  %v2681_v59 = vrot.slane %v2679_v33, 4 }
 0x179   : > { %v2402_v52 = vshll.u32 %v2337_v36, 16 }
 0x17a   : > { %v2682_v13 = vor.u32 %v2681_v59, %v2678_v5 }
 0x17b   : > { %v2404_v41 = vrot.slane %v2402_v52, 1 }
 0x17c   : > { %v1241_v63 = vpop.f32.mrf.mxu1  ;;  %v2683_v27 = vsel %vm6125_vm14, %v2673_v9, %v2682_v13 }
 0x17d   : > { %v1242_v22 = vadd.f32 %v1241_v63, %v6121_v54  ;;  %v2405_v37 = vsel %vm6124_vm5, %v2400_v11, %v2404_v41  ;;  %v6131_v11 = vld [vmem:[#allocation29_spill] sm:$0xff] }
 0x17f   : > { %2500 = vmatmul.bf16.gmra.mxu1 %v2397_v4 }
 0x180   : > { %2914 = vmatmul.bf16.gmra.mxu3 %v6120_v19  ;;  %v6127_v19 = vld [vmem:[#allocation22_spill] sm:$0xff] }
 0x181   : > { %2778 = vmatmul.bf16.gmra.mxu2 %v2674_v10 }
 0x183   : > { %v2099_v1 = vpop.f32.mrf.mxu3 }
 0x184   : > { %v1821_v49 = vpop.f32.mrf.mxu2  ;;  %v1243_v58 = vpop.f32.mrf.mxu1 }
 0x185   : > { %v1843_v21 = vadd.f32 %v1821_v49, %v1242_v22  ;;  %3185 = vmatmul.bf16.gmra.mxu0 %v3085_v47  ;;  %v1244_v60 = vadd.f32 %v1243_v58, %v6123_v16  ;;  %v6130_v58 = vld [vmem:[#allocation28_spill] sm:$0xff] }
 0x187   : > { %v2121_v26 = vadd.f32 %v2099_v1, %v1843_v21  ;;  %v6129_v1 = vld [vmem:[#allocation26_spill] sm:$0xff] }
 0x189   : > { %v5754_v62 = vadd.f32 %v5722_v31, %v2121_v26  ;;  %v6126_v31 = vld [vmem:[#allocation15_spill] sm:$0xff] }
 0x18b   : > { %v2101_v42 = vpop.f32.mrf.mxu3 }
 0x18c   : > { %v1823_v39 = vpop.f32.mrf.mxu2  ;;  %v1246_v34 = vpop.f32.mrf.mxu1 }
 0x18d   : > { %v1844_v25 = vadd.f32 %v1823_v39, %v1244_v60  ;;  %v1247_v28 = vadd.f32 %v1246_v34, %v6126_v31  ;;  %v6132_v60 = vld [vmem:[#allocation27_spill] sm:$0xff] }
 0x18f   : > { %v2122_v14 = vadd.f32 %v2101_v42, %v1844_v25  ;;  %2505 = vmatmul.bf16.gmra.mxu1 %v2405_v37  ;;  %v5778_v25 = vld [vmem:[%s5853_s2] ss:$0 sm:$0xff] }
 0x190   : > { %2919 = vmatmul.bf16.gmra.mxu3 %v3839_v32 }
 0x191   : > { %2783 = vmatmul.bf16.gmra.mxu2 %v2683_v27  ;;  %v5760_v50 = vadd.f32 %v2237_v18, %v2122_v14  ;;  %v6128_v18 = vld [vmem:[#allocation8_spill] sm:$0xff]  ;;  %v6133_v14 = vld [vmem:[#allocation18_spill] sm:$0xff] }
 0x192   : > { %v3151_v4 = vpop.f32.mrf.mxu0  ;;  %v1214_v47 = vadd.f32 %v6129_v1, %v6128_v18  ;;  %v1219_v31 = vadd.f32 %v5485_v8, %v6133_v14 }
 0x193   : > { %v2104_v63 = vpop.f32.mrf.mxu3 }
 0x194   : > { %v1826_v45 = vpop.f32.mrf.mxu2  ;;  %v1248_v10 = vpop.f32.mrf.mxu1  ;;  %v1832_v46 = vadd.f32 %v6130_v58, %v1214_v47 }
 0x195   : > { %v1845_v0 = vadd.f32 %v1826_v45, %v1247_v28  ;;  %v1249_v36 = vadd.f32 %v1248_v10, %v6127_v19 }
 0x196   : > { %v2110_v41 = vadd.f32 %v6131_v11, %v1832_v46 }
 0x197   : > { %v2123_v3 = vadd.f32 %v2104_v63, %v1845_v0  ;;  %v1834_v63 = vadd.f32 %v5517_v38, %v1219_v31 }
 0x198   : > { %v2246_v42 = vadd.f32 %v6132_v60, %v2110_v41 }
 0x199   : > { %v5763_v61 = vadd.f32 %v2240_v55, %v2123_v3 }
 0x19a   : > { %v3153_v9 = vpop.f32.mrf.mxu0 }
 0x19b   : > { %v2106_v12 = vpop.f32.mrf.mxu3 }
 0x19c   : > { %v1828_v33 = vpop.f32.mrf.mxu2  ;;  %v2471_v54 = vpop.f32.mrf.mxu1 }
 0x19d   : > { %v1846_v22 = vadd.f32 %v1828_v33, %v1249_v36  ;;  %v2511_v21 = vadd.f32 %v2471_v54, %v5555_v15  ;;  %v2112_v33 = vadd.f32 %v5519_v44, %v1834_v63  ;;  %v6135_v63 = vld [vmem:[#allocation17_spill] sm:$0xff] }
 0x19f   : > { %v2124_v49 = vadd.f32 %v2106_v12, %v1846_v22 }
 0x1a1   : > { %v5769_v52 = vadd.f32 %v2242_v51, %v2124_v49 }
 0x1a2   : > { %v3156_v5 = vpop.f32.mrf.mxu0 }
 0x1a3   : > { %v2885_v55 = vpop.f32.mrf.mxu3 }
 0x1a4   : > { %v2749_v59 = vpop.f32.mrf.mxu2  ;;  %v2473_v26 = vpop.f32.mrf.mxu1 }
 0x1a5   : > { %v2789_v13 = vadd.f32 %v2749_v59, %v2511_v21  ;;  %v2512_v39 = vadd.f32 %v2473_v26, %v2246_v42  ;;  %v6134_v21 = vld [vmem:[#allocation7_spill] sm:$0xff] }
 0x1a7   : > { %v2925_v16 = vadd.f32 %v2885_v55, %v2789_v13  ;;  %v1224_v55 = vadd.f32 %v5541_v20, %v6134_v21 }
 0x1a9   : > { %v3191_v15 = vadd.f32 %v3151_v4, %v2925_v16  ;;  %v1836_v26 = vadd.f32 %v5571_v56, %v1224_v55 }
 0x1aa   : > { %v3158_v37 = vpop.f32.mrf.mxu0 }
 0x1ab   : > { %v2887_v34 = vpop.f32.mrf.mxu3  ;;  %v3211_v45 = vadd.f32 %v5778_v25, %v3191_v15 }
 0x1ac   : > { %v2751_v51 = vpop.f32.mrf.mxu2  ;;  %v2476_v32 = vpop.f32.mrf.mxu1 }
 0x1ad   : > { %v2790_v27 = vadd.f32 %v2751_v51, %v2512_v39  ;;  %v2513_v0 = vadd.f32 %v2476_v32, %v5558_v48  ;;  %v3227_v54 = vmax.f32 %v3211_v45, 0.0  ;;  %v2248_v48 = vadd.f32 %v5487_v53, %v2112_v33 }
 0x1ae   : > { %v1229_v45 = vadd.f32 %v5613_v24, %v6135_v63 }
 0x1af   : > { %v2926_v28 = vadd.f32 %v2887_v34, %v2790_v27 }
 0x1b1   : > { %v3192_v10 = vadd.f32 %v3153_v9, %v2926_v28 }
 0x1b2   : > { %v3161_v19 = vpop.f32.mrf.mxu0 }
 0x1b3   : > { %v3212_v4 = vadd.f32 %v5778_v25, %v3192_v10  ;;  %v2890_v3 = vpop.f32.mrf.mxu3 }
 0x1b4   : > { %v2754_v36 = vpop.f32.mrf.mxu2  ;;  %v2478_v12 = vpop.f32.mrf.mxu1 }
 0x1b5   : > { %v3228_v8 = vmax.f32 %v3212_v4, 0.0  ;;  %v2791_v22 = vadd.f32 %v2754_v36, %v2513_v0  ;;  %v2514_v18 = vadd.f32 %v2478_v12, %v2248_v48  ;;  %v1838_v4 = vadd.f32 %v5627_v43, %v1229_v45 }
 0x1b7   : > { %v3915_v38 = vpack.c.bf16 %v3228_v8, %v3227_v54  ;;  %v2927_v9 = vadd.f32 %v2890_v3, %v2791_v22 }
 0x1b9   : > { %3916 = vst [vmem:[%s5791_s23] sm:$0xff] %v3915_v38   ;;  %v3193_v44 = vadd.f32 %v3156_v5, %v2927_v9  ;;  %v2114_v5 = vadd.f32 %v5574_v17, %v1836_v26 }
 0x1ba   : > { %v3163_v47 = vpop.f32.mrf.mxu0 }
 0x1bb   : > { %v2892_v1 = vpop.f32.mrf.mxu3  ;;  %v3213_v11 = vadd.f32 %v5778_v25, %v3193_v44  ;;  %v2250_v56 = vadd.f32 %v5543_v57, %v2114_v5 }
 0x1bc   : > { %v2756_v49 = vpop.f32.mrf.mxu2  ;;  %v2481_v58 = vpop.f32.mrf.mxu1 }
 0x1bd   : > { %v2792_v46 = vadd.f32 %v2756_v49, %v2514_v18  ;;  %v2515_v53 = vadd.f32 %v2481_v58, %v5566_v29  ;;  %v3229_v39 = vmax.f32 %v3213_v11, 0.0 }
 0x1bf   : > { %v2928_v59 = vadd.f32 %v2892_v1, %v2792_v46 }
 0x1c1   : > { %v3194_v41 = vadd.f32 %v3158_v37, %v2928_v59 }
 0x1c2   : > { %v3166_v20 = vpop.f32.mrf.mxu0 }
 0x1c3   : > { %v3214_v13 = vadd.f32 %v5778_v25, %v3194_v41  ;;  %v2895_v16 = vpop.f32.mrf.mxu3 }
 0x1c4   : > { %v2759_v60 = vpop.f32.mrf.mxu2  ;;  %v2483_v42 = vpop.f32.mrf.mxu1 }
 0x1c5   : > { %v3230_v34 = vmax.f32 %v3214_v13, 0.0  ;;  %v2793_v51 = vadd.f32 %v2759_v60, %v2515_v53  ;;  %v2516_v27 = vadd.f32 %v2483_v42, %v2250_v56 }
 0x1c7   : > { %v3920_v32 = vpack.c.bf16 %v3230_v34, %v3229_v39  ;;  %v2929_v15 = vadd.f32 %v2895_v16, %v2793_v51 }
 0x1c9   : > { %3952 = vst [vmem:[%s5791_s23 + $0x8] sm:$0xff] %v3920_v32   ;;  %v3195_v28 = vadd.f32 %v3161_v19, %v2929_v15  ;;  %v2116_v19 = vadd.f32 %v5629_v30, %v1838_v4 }
 0x1ca   : > { %v3168_v10 = vpop.f32.mrf.mxu0 }
 0x1cb   : > { %v2897_v37 = vpop.f32.mrf.mxu3  ;;  %v3215_v0 = vadd.f32 %v5778_v25, %v3195_v28  ;;  %v2252_v43 = vadd.f32 %v5605_v23, %v2116_v19 }
 0x1cc   : > { %v2761_v14 = vpop.f32.mrf.mxu2  ;;  %v2486_v31 = vpop.f32.mrf.mxu1 }
 0x1cd   : > { %v2794_v29 = vadd.f32 %v2761_v14, %v2516_v27  ;;  %v2517_v57 = vadd.f32 %v2486_v31, %v5609_v40  ;;  %v3231_v8 = vmax.f32 %v3215_v0, 0.0 }
 0x1cf   : > { %v2930_v17 = vadd.f32 %v2897_v37, %v2794_v29 }
 0x1d1   : > { %v3196_v3 = vadd.f32 %v3163_v47, %v2930_v17 }
 0x1d2   : > { %v3171_v48 = vpop.f32.mrf.mxu0 }
 0x1d3   : > { %v3216_v36 = vadd.f32 %v5778_v25, %v3196_v3  ;;  %v2900_v12 = vpop.f32.mrf.mxu3 }
 0x1d4   : > { %v2764_v33 = vpop.f32.mrf.mxu2  ;;  %v2488_v54 = vpop.f32.mrf.mxu1 }
 0x1d5   : > { %v3232_v22 = vmax.f32 %v3216_v36, 0.0  ;;  %v2795_v24 = vadd.f32 %v2764_v33, %v2517_v57  ;;  %v2518_v18 = vadd.f32 %v2488_v54, %v2252_v43 }
 0x1d7   : > { %v3925_v38 = vpack.c.bf16 %v3232_v22, %v3231_v8  ;;  %v2931_v9 = vadd.f32 %v2900_v12, %v2795_v24 }
 0x1d9   : > { %3953 = vst [vmem:[%s5791_s23 + $0x10] sm:$0xff] %v3925_v38   ;;  %v3197_v40 = vadd.f32 %v3166_v20, %v2931_v9 }
 0x1da   : > { %v3173_v26 = vpop.f32.mrf.mxu0 }
 0x1db   : > { %v2902_v1 = vpop.f32.mrf.mxu3  ;;  %v3217_v46 = vadd.f32 %v5778_v25, %v3197_v40 }
 0x1dc   : > { %v2766_v47 = vpop.f32.mrf.mxu2  ;;  %v2491_v49 = vpop.f32.mrf.mxu1 }
 0x1dd   : > { %v2796_v58 = vadd.f32 %v2766_v47, %v2518_v18  ;;  %v2519_v55 = vadd.f32 %v2491_v49, %v5662_v35  ;;  %v3233_v41 = vmax.f32 %v3217_v46, 0.0 }
 0x1df   : > { %v2932_v44 = vadd.f32 %v2902_v1, %v2796_v58 }
 0x1e1   : > { %v3198_v30 = vadd.f32 %v3168_v10, %v2932_v44 }
 0x1e2   : > { %v3176_v32 = vpop.f32.mrf.mxu0 }
 0x1e3   : > { %v3218_v21 = vadd.f32 %v5778_v25, %v3198_v30  ;;  %v2905_v59 = vpop.f32.mrf.mxu3 }
 0x1e4   : > { %v2769_v11 = vpop.f32.mrf.mxu2  ;;  %v2493_v23 = vpop.f32.mrf.mxu1 }
 0x1e5   : > { %v3234_v13 = vmax.f32 %v3218_v21, 0.0  ;;  %v2797_v53 = vadd.f32 %v2769_v11, %v2519_v55  ;;  %v2520_v42 = vadd.f32 %v2493_v23, %v5687_v2 }
 0x1e7   : > { %v3930_v16 = vpack.c.bf16 %v3234_v13, %v3233_v41  ;;  %v2933_v60 = vadd.f32 %v2905_v59, %v2797_v53 }
 0x1e9   : > { %3954 = vst [vmem:[%s5791_s23 + $0x18] sm:$0xff] %v3930_v16   ;;  %v3199_v51 = vadd.f32 %v3171_v48, %v2933_v60 }
 0x1ea   : > { %v3178_v17 = vpop.f32.mrf.mxu0 }
 0x1eb   : > { %v2907_v5 = vpop.f32.mrf.mxu3  ;;  %v3219_v15 = vadd.f32 %v5778_v25, %v3199_v51 }
 0x1ec   : > { %v2771_v39 = vpop.f32.mrf.mxu2  ;;  %v2496_v34 = vpop.f32.mrf.mxu1 }
 0x1ed   : > { %v2798_v20 = vadd.f32 %v2771_v39, %v2520_v42  ;;  %v2521_v37 = vadd.f32 %v2496_v34, %v5733_v7  ;;  %v3235_v29 = vmax.f32 %v3219_v15, 0.0 }
 0x1ef   : > { %v2934_v35 = vadd.f32 %v2907_v5, %v2798_v20 }
 0x1f1   : > { %v3200_v56 = vadd.f32 %v3173_v26, %v2934_v35 }
 0x1f2   : > { %v3181_v19 = vpop.f32.mrf.mxu0 }
 0x1f3   : > { %v3220_v27 = vadd.f32 %v5778_v25, %v3200_v56  ;;  %v2910_v14 = vpop.f32.mrf.mxu3 }
 0x1f4   : > { %v2774_v31 = vpop.f32.mrf.mxu2  ;;  %v2498_v28 = vpop.f32.mrf.mxu1 }
 0x1f5   : > { %v3236_v2 = vmax.f32 %v3220_v27, 0.0  ;;  %v2799_v63 = vadd.f32 %v2774_v31, %v2521_v37  ;;  %v2522_v4 = vadd.f32 %v2498_v28, %v5745_v6 }
 0x1f7   : > { %v3935_v45 = vpack.c.bf16 %v3236_v2, %v3235_v29  ;;  %v2935_v10 = vadd.f32 %v2910_v14, %v2799_v63 }
 0x1f9   : > { %3955 = vst [vmem:[%s5791_s23 + $0x20] sm:$0xff] %v3935_v45   ;;  %v3201_v57 = vadd.f32 %v3176_v32, %v2935_v10 }
 0x1fa   : > { %v3183_v40 = vpop.f32.mrf.mxu0 }
 0x1fb   : > { %v2912_v0 = vpop.f32.mrf.mxu3  ;;  %v3221_v7 = vadd.f32 %v5778_v25, %v3201_v57 }
 0x1fc   : > { %v2776_v3 = vpop.f32.mrf.mxu2  ;;  %v2501_v36 = vpop.f32.mrf.mxu1 }
 0x1fd   : > { %v2800_v12 = vadd.f32 %v2776_v3, %v2522_v4  ;;  %v2523_v22 = vadd.f32 %v2501_v36, %v5754_v62  ;;  %v3237_v43 = vmax.f32 %v3221_v7, 0.0 }
 0x1ff   : > { %v2936_v33 = vadd.f32 %v2912_v0, %v2800_v12 }
 0x201   : > { %v3202_v54 = vadd.f32 %v3178_v17, %v2936_v33 }
 0x202   : > { %v3186_v53 = vpop.f32.mrf.mxu0 }
 0x203   : > { %v3222_v8 = vadd.f32 %v5778_v25, %v3202_v54  ;;  %v2915_v24 = vpop.f32.mrf.mxu3 }
 0x204   : > { %v2779_v38 = vpop.f32.mrf.mxu2  ;;  %v2503_v9 = vpop.f32.mrf.mxu1 }
 0x205   : > { %v3238_v6 = vmax.f32 %v3222_v8, 0.0  ;;  %v2801_v48 = vadd.f32 %v2779_v38, %v2523_v22  ;;  %v2524_v47 = vadd.f32 %v2503_v9, %v5760_v50 }
 0x207   : > { %v3940_v18 = vpack.c.bf16 %v3238_v6, %v3237_v43  ;;  %v2937_v1 = vadd.f32 %v2915_v24, %v2801_v48 }
 0x209   : > { %3956 = vst [vmem:[%s5791_s23 + $0x28] sm:$0xff] %v3940_v18   ;;  %v3203_v44 = vadd.f32 %v3181_v19, %v2937_v1 }
 0x20a   : > { %v3188_v35 = vpop.f32.mrf.mxu0 }
 0x20b   : > { %v2917_v49 = vpop.f32.mrf.mxu3  ;;  %v3223_v62 = vadd.f32 %v5778_v25, %v3203_v44 }
 0x20c   : > { %v2781_v58 = vpop.f32.mrf.mxu2  ;;  %v2506_v30 = vpop.f32.mrf.mxu1 }
 0x20d   : > { %v2802_v46 = vadd.f32 %v2781_v58, %v2524_v47  ;;  %v2525_v26 = vadd.f32 %v2506_v30, %v5763_v61  ;;  %v3239_v41 = vmax.f32 %v3223_v62, 0.0 }
 0x20f   : > { %v2938_v21 = vadd.f32 %v2917_v49, %v2802_v46 }
 0x211   : > { %v3204_v55 = vadd.f32 %v3183_v40, %v2938_v21 }
 0x213   : > { %v3224_v59 = vadd.f32 %v5778_v25, %v3204_v55  ;;  %v2920_v23 = vpop.f32.mrf.mxu3 }
 0x214   : > { %v2784_v11 = vpop.f32.mrf.mxu2  ;;  %v2508_v60 = vpop.f32.mrf.mxu1 }
 0x215   : > { %v3240_v13 = vmax.f32 %v3224_v59, 0.0  ;;  %v2803_v50 = vadd.f32 %v2784_v11, %v2525_v26  ;;  %v2526_v5 = vadd.f32 %v2508_v60, %v5769_v52 }
 0x217   : > { %v3945_v16 = vpack.c.bf16 %v3240_v13, %v3239_v41  ;;  %v2939_v42 = vadd.f32 %v2920_v23, %v2803_v50 }
 0x219   : > { %3957 = vst [vmem:[%s5791_s23 + $0x30] sm:$0xff] %v3945_v16   ;;  %v3205_v34 = vadd.f32 %v3186_v53, %v2939_v42 }
 0x21b   : > { %v2922_v20 = vpop.f32.mrf.mxu3  ;;  %v3225_v61 = vadd.f32 %v5778_v25, %v3205_v34 }
 0x21c   : > { %v2786_v39 = vpop.f32.mrf.mxu2 }
 0x21d   : > { %v2804_v51 = vadd.f32 %v2786_v39, %v2526_v5  ;;  %v3241_v27 = vmax.f32 %v3225_v61, 0.0 }
 0x21f   : > { %v2940_v32 = vadd.f32 %v2922_v20, %v2804_v51 }
 0x221   : > { %v3206_v15 = vadd.f32 %v3188_v35, %v2940_v32 }
 0x223   : > { %v3226_v56 = vadd.f32 %v5778_v25, %v3206_v15 }
 0x225   : > { %v3242_v37 = vmax.f32 %v3226_v56, 0.0 }
 0x227   : > { %v3950_v14 = vpack.c.bf16 %v3242_v37, %v3241_v27 }
 0x229   : > { %3958 = vst [vmem:[%s5791_s23 + $0x38] sm:$0xff] %v3950_v14  }
 0x22a PF: > { %s13_s16 = sadd.s32 1, %s4083_s16   ;;  %s6136_s12 = smov %s4075_s14 }
 0x22b   : > { %p10_p7 = scmp.ge.s32.totalorder %s13_s16, 6   ;;  %s6137_s13 = smov %s4079_s15 }
 0x22c   : > { %s6138_s14 = smov %s6141_s17  ;;  %s6139_s15 = smov %s6145_s18 }
 0x22d   :  { %12 = sbr.rel (!%p10_p7) target bundleno = 3 (0x3), region = 71 }

</bundles_post_ra>
